<compile_context>
chip_gen: v7x
topology: tpu7x:2x2x1
jax: 0.10.0
libtpu: 0.0.40
codegen_flags: <defaults>
</compile_context>

<pallas_src>
import jax
import jax.numpy as jnp
from jax.experimental import pallas as pl
from jax.experimental.pallas import tpu as pltpu

_GELU_C = 0.7978845608028654  # sqrt(2/pi)


def _gelu(x):
    # tanh-approximation GELU (runs on the EUP slot).
    return 0.5 * x * (1.0 + jnp.tanh(_GELU_C * (x + 0.044715 * x * x * x)))


def _dw3x3_lane_dense(x, w9, bias, r, row, col, H, W):
    """Depthwise 3x3 conv with zero padding on lane-dense (C, H*W) data.

    x    : (Cc, H*W) f32 input at full resolution (possibly nearest-upsampled).
    w9   : (Cc, 9) f32 taps, k = (dy+1)*3 + (dx+1).
    bias : (Cc, 1) f32 or None.
    r    : tap dilation (the SAFM pooling stride); r=1 is a plain 3x3 conv.
    row/col : (1, H*W) int32 spatial coordinates of every lane.
    """
    HW = H * W
    acc = jnp.zeros(x.shape, jnp.float32)
    for dy in (-1, 0, 1):
        oy = dy * r
        if abs(oy) >= H:            # tap reads only zero padding -> contributes 0
            continue
        for dx in (-1, 0, 1):
            ox = dx * r
            if abs(ox) >= W:
                continue
            k = (dy + 1) * 3 + (dx + 1)
            off = oy * W + ox       # flattened-spatial offset of this tap
            # want out[p] = x[p + off]  ->  jnp.roll-style shift of -off (XLU)
            shifted = x if off == 0 else pltpu.roll(x, shift=(-off) % HW, axis=1)
            valid = ((row + oy >= 0) & (row + oy < H) &
                     (col + ox >= 0) & (col + ox < W))
            acc = acc + jnp.where(valid, shifted, 0.0) * w9[:, k:k + 1]
    if bias is not None:
        acc = acc + bias
    return acc


# --------------------------------------------------------------------------
# Kernel 1: norm1 + proj_1 + adaptive-avg-pool gate + GELU   ->  xg
# --------------------------------------------------------------------------

def _make_safm_front_kernel(eps=1e-6):
    def kernel(x_ref, ln_w_ref, ln_b_ref, pw_ref, pb_ref, sig_ref, o_ref):
        x = x_ref[0]                                           # (C, HW) f32
        # channels_first LayerNorm (normalize over the channel / sublane axis)
        u = jnp.mean(x, axis=0, keepdims=True)
        var = jnp.mean((x - u) ** 2, axis=0, keepdims=True)
        xn = ln_w_ref[...] * ((x - u) * jax.lax.rsqrt(var + eps)) + ln_b_ref[...]
        # proj_1 (1x1 conv) on the MXU: bf16 operands, f32 accumulation
        y = jnp.dot(pw_ref[...], xn.astype(jnp.bfloat16),
                    preferred_element_type=jnp.float32) + pb_ref[...]
        # adaptive_avg_pool2d(., 1) gate:  y + sigma * (y - mean_HW(y))
        x_d = jnp.mean(y, axis=1, keepdims=True)
        y = y + sig_ref[...] * (y - x_d)
        o_ref[0] = _gelu(y)
    return kernel


# --------------------------------------------------------------------------
# Kernel 2: SAFM tail (4 dw3x3 levels + aggr + gate + residual)
#           + norm2 + full FeedForward2 + residual
# --------------------------------------------------------------------------

def _make_safm_tail_ffn_kernel(H, W, cd, hidden, eps=1e-6):
    def kernel(x_ref, xg_ref, u1_ref, u2_ref, u3_ref,          # batched inputs
               row_ref, col_ref,
               mfr_w_ref, mfr_b_ref, agg_w_ref, agg_b_ref,
               ln_w_ref, ln_b_ref, pin_w_ref, dw_w_ref,
               dec_w_ref, dec_b_ref, sig2_ref, pout_w_ref,     # params
               o_ref):
        row = row_ref[...]                                     # (1, HW) int32
        col = col_ref[...]
        xg = xg_ref[0]                                         # (C, HW) f32

        # ---- SAFM multi-level depthwise 3x3, all levels fused & lane-dense ----
        levels = (xg[:cd, :], u1_ref[0], u2_ref[0], u3_ref[0])
        strides = (1, 4, 8, 16)
        agg = None
        for i in range(4):
            s_i = _dw3x3_lane_dense(levels[i], mfr_w_ref[i], mfr_b_ref[i],
                                    strides[i], row, col, H, W)
            # aggr 1x1 conv applied per level chunk (sum of 4 narrow matmuls)
            contrib = jnp.dot(agg_w_ref[i], s_i.astype(jnp.bfloat16),
                              preferred_element_type=jnp.float32)
            agg = contrib if agg is None else agg + contrib
        agg = agg + agg_b_ref[...]

        # aggr -> GELU -> * gated x -> + residual (end of SAFM branch)
        y1 = _gelu(agg) * xg + x_ref[0]                        # (C, HW)

        # ---- norm2 ----
        u2 = jnp.mean(y1, axis=0, keepdims=True)
        var2 = jnp.mean((y1 - u2) ** 2, axis=0, keepdims=True)
        yn = ln_w_ref[...] * ((y1 - u2) * jax.lax.rsqrt(var2 + eps)) + ln_b_ref[...]

        # ---- FeedForward2 ----
        z = jnp.dot(pin_w_ref[...], yn.astype(jnp.bfloat16),
                    preferred_element_type=jnp.float32)        # (2*hidden, HW)
        zd = _dw3x3_lane_dense(z, dw_w_ref[...], None, 1, row, col, H, W)
        v = zd[:hidden, :] * zd[hidden:, :]                    # chunk(2) product
        # decompose (hidden -> 1 channel 1x1 conv): VPU mul + sublane reduce
        d = jnp.sum(v * dec_w_ref[...], axis=0, keepdims=True) + dec_b_ref[...]
        v = v + sig2_ref[...] * (v - _gelu(d))
        out = jnp.dot(pout_w_ref[...], v.astype(jnp.bfloat16),
                      preferred_element_type=jnp.float32) + y1
        o_ref[0] = out
    return kernel


# --------------------------------------------------------------------------
# pallas_call plumbing: grid over batch, full (C, H*W) block per step
# --------------------------------------------------------------------------

def _run_per_batch(kernel, batched, params, out_shape, out_dtype=jnp.float32):
    B = batched[0].shape[0]

    def batched_spec(shape):
        trail = len(shape) - 1
        return pl.BlockSpec((1,) + tuple(shape[1:]),
                            lambda b, _t=trail: (b,) + (0,) * _t)

    def param_spec(shape):
        nd = len(shape)
        return pl.BlockSpec(tuple(shape), lambda b, _n=nd: (0,) * _n)

    return pl.pallas_call(
        kernel,
        out_shape=jax.ShapeDtypeStruct(tuple(out_shape), out_dtype),
        grid=(B,),
        in_specs=([batched_spec(a.shape) for a in batched] +
                  [param_spec(p.shape) for p in params]),
        out_specs=batched_spec(out_shape),
        compiler_params=pltpu.CompilerParams(dimension_semantics=("parallel",)),
    )(*batched, *params)


# --------------------------------------------------------------------------
# AttBlock forward
# --------------------------------------------------------------------------

def att_block_forward(x, p):
    B, C, H, W = x.shape
    n_levels = 4
    assert C % n_levels == 0, "dim must be divisible by n_levels=4"
    assert H % 16 == 0 and W % 16 == 0, "H, W must be divisible by 2**n_levels"
    HW = H * W
    cd = C // n_levels
    hidden = int(C * 2.0)                     # ffn_scale = 2.0

    xf = x.reshape(B, C, HW)

    # ---- K1: norm1 + proj_1 + pool-gate + GELU  ->  xg ----
    xg = _run_per_batch(
        _make_safm_front_kernel(),
        [xf],
        [p['ln1_w'], p['ln1_b'], p['proj1_w'], p['proj1_b'], p['safm_sigma']],
        (B, C, HW))

    # ---- glue: adaptive max-pool + nearest upsample for SAFM levels 1..3 ----
    # TODO(synk): pure data-movement (pool / nearest-upsample) stays in plain
    # JAX; the per-level 3x3 convs themselves run inside K2 via dilated taps.
    xg4 = xg.reshape(B, C, H, W)
    ups = []
    for i in range(1, n_levels):
        r = 2 ** (i + 1)
        ph, pw = H // r, W // r
        chunk = xg4[:, i * cd:(i + 1) * cd]
        pooled = chunk.reshape(B, cd, ph, r, pw, r).max(axis=(3, 5))
        up = jnp.repeat(jnp.repeat(pooled, r, axis=2), r, axis=3)
        ups.append(up.reshape(B, cd, HW))

    pos = jnp.arange(HW, dtype=jnp.int32)
    row_ids = (pos // W).reshape(1, HW)
    col_ids = (pos % W).reshape(1, HW)

    # ---- K2: SAFM tail (4 dw3x3 + aggr + gate + residual) + norm2 + FFN ----
    out = _run_per_batch(
        _make_safm_tail_ffn_kernel(H, W, cd, hidden),
        [xf, xg] + ups,
        [row_ids, col_ids,
         p['mfr_w'], p['mfr_b'], p['aggr_w'], p['aggr_b'],
         p['ln2_w'], p['ln2_b'], p['pin_w'], p['ffd_dw_w'],
         p['dec_w'], p['dec_b'], p['ffd_sigma'], p['pout_w']],
        (B, C, HW))
    return out.reshape(B, C, H, W)


# --------------------------------------------------------------------------
# Deterministic synthetic parameters (shapes from AttBlock.__init__)
# --------------------------------------------------------------------------

def init_params(key, dim):
    hidden = int(dim * 2.0)
    cd = dim // 4
    f32, bf16 = jnp.float32, jnp.bfloat16
    ks = jax.random.split(key, 11)
    rn = lambda k, shape: 0.1 * jax.random.normal(k, shape, dtype=f32)
    aggr_w = rn(ks[4], (dim, dim))
    return {
        'ln1_w': jnp.ones((dim, 1), f32), 'ln1_b': jnp.zeros((dim, 1), f32),
        'ln2_w': jnp.ones((dim, 1), f32), 'ln2_b': jnp.zeros((dim, 1), f32),
        # SAFM7
        'proj1_w': rn(ks[0], (dim, dim)).astype(bf16),
        'proj1_b': rn(ks[1], (dim, 1)),
        'safm_sigma': jnp.full((dim, 1), 1e-5, f32),
        'mfr_w': rn(ks[2], (4, cd, 9)),                        # 4 depthwise 3x3
        'mfr_b': rn(ks[3], (4, cd, 1)),
        # aggr 1x1 weight pre-split along input channels into the 4 level chunks
        'aggr_w': aggr_w.reshape(dim, 4, cd).transpose(1, 0, 2).astype(bf16),
        'aggr_b': rn(ks[5], (dim, 1)),
        # FeedForward2
        'pin_w': rn(ks[6], (2 * hidden, dim)).astype(bf16),    # project_in (no bias)
        'ffd_dw_w': rn(ks[7], (2 * hidden, 9)),                # dwconv (no bias)
        'dec_w': rn(ks[8], (hidden, 1)),                       # decompose weight
        'dec_b': rn(ks[9], (1, 1)),                            # decompose bias
        'ffd_sigma': jnp.full((hidden, 1), 1e-5, f32),
        'pout_w': rn(ks[10], (dim, hidden)).astype(bf16),      # project_out (no bias)
    }


if __name__ == "__main__":
    B, dim, H, W = 2, 8, 16, 16               # dim % 4 == 0, H/W % 16 == 0
    key = jax.random.PRNGKey(0)
    kx, kp = jax.random.split(key)
    x = jax.random.normal(kx, (B, dim, H, W), dtype=jnp.float32)
    params = init_params(kp, dim)

    fwd = jax.jit(att_block_forward)
    y = jax.block_until_ready(fwd(x, params))
    assert y.shape == (B, dim, H, W) and y.dtype == jnp.float32
    assert bool(jnp.isfinite(y).all())
    print("KERNEL_OK")
</pallas_src>

<mosaic_0001>
module attributes {stable_mosaic.version = 11 : i64} {
  func.func @kernel(%arg0: i32, %arg1: memref<1x8x256xf32, #tpu.memory_space<vmem>>, %arg2: memref<8x1xf32, #tpu.memory_space<vmem>>, %arg3: memref<8x1xf32, #tpu.memory_space<vmem>>, %arg4: memref<8x8xbf16, #tpu.memory_space<vmem>>, %arg5: memref<8x1xf32, #tpu.memory_space<vmem>>, %arg6: memref<8x1xf32, #tpu.memory_space<vmem>>, %arg7: memref<1x8x256xf32, #tpu.memory_space<vmem>>) attributes {dimension_semantics = [#tpu.dimension_semantics<parallel>], iteration_bounds = array<i64: 2>, scalar_prefetch = 0 : i64, scratch_operands = 0 : i64, tpu.core_type = #tpu.core_type<tc>, window_params = [{transform_indices = @transform_0, window_bounds = array<i64: 1, 8, 256>}, {pipeline_mode = #tpu.pipeline_mode<synchronous>, transform_indices = @transform_1, window_bounds = array<i64: 8, 1>}, {pipeline_mode = #tpu.pipeline_mode<synchronous>, transform_indices = @transform_2, window_bounds = array<i64: 8, 1>}, {pipeline_mode = #tpu.pipeline_mode<synchronous>, transform_indices = @transform_3, window_bounds = array<i64: 8, 8>}, {pipeline_mode = #tpu.pipeline_mode<synchronous>, transform_indices = @transform_4, window_bounds = array<i64: 8, 1>}, {pipeline_mode = #tpu.pipeline_mode<synchronous>, transform_indices = @transform_5, window_bounds = array<i64: 8, 1>}, {transform_indices = @transform_6, window_bounds = array<i64: 1, 8, 256>}]} {
    %c0 = arith.constant 0 : index
    %c0_0 = arith.constant 0 : index
    %c0_1 = arith.constant 0 : index
    %0 = vector.load %arg1[%c0, %c0_0, %c0_1] : memref<1x8x256xf32, #tpu.memory_space<vmem>>, vector<1x8x256xf32>
    %1 = vector.shape_cast %0 : vector<1x8x256xf32> to vector<8x256xf32>
    %cst = arith.constant dense<0.000000e+00> : vector<256xf32>
    %2 = vector.multi_reduction <add>, %1, %cst [0] : vector<8x256xf32> to vector<256xf32>
    %3 = vector.shape_cast %2 : vector<256xf32> to vector<1x256xf32>
    %cst_2 = arith.constant 8.000000e+00 : f32
    %4 = vector.broadcast %cst_2 : f32 to vector<1x256xf32>
    %5 = arith.divf %3, %4 : vector<1x256xf32>
    %6 = vector.broadcast %5 : vector<1x256xf32> to vector<8x256xf32>
    %7 = arith.subf %1, %6 : vector<8x256xf32>
    %8 = arith.mulf %7, %7 : vector<8x256xf32>
    %cst_3 = arith.constant dense<0.000000e+00> : vector<256xf32>
    %9 = vector.multi_reduction <add>, %8, %cst_3 [0] : vector<8x256xf32> to vector<256xf32>
    %10 = vector.shape_cast %9 : vector<256xf32> to vector<1x256xf32>
    %cst_4 = arith.constant 8.000000e+00 : f32
    %11 = vector.broadcast %cst_4 : f32 to vector<1x256xf32>
    %12 = arith.divf %10, %11 : vector<1x256xf32>
    %c0_5 = arith.constant 0 : index
    %c0_6 = arith.constant 0 : index
    %13 = vector.load %arg2[%c0_5, %c0_6] : memref<8x1xf32, #tpu.memory_space<vmem>>, vector<8x1xf32>
    %14 = vector.broadcast %5 : vector<1x256xf32> to vector<8x256xf32>
    %15 = arith.subf %1, %14 : vector<8x256xf32>
    %cst_7 = arith.constant 9.99999997E-7 : f32
    %16 = vector.broadcast %cst_7 : f32 to vector<1x256xf32>
    %17 = arith.addf %12, %16 : vector<1x256xf32>
    %18 = math.rsqrt %17 : vector<1x256xf32>
    %19 = vector.broadcast %18 : vector<1x256xf32> to vector<8x256xf32>
    %20 = arith.mulf %15, %19 : vector<8x256xf32>
    %21 = vector.broadcast %13 : vector<8x1xf32> to vector<8x256xf32>
    %22 = arith.mulf %21, %20 : vector<8x256xf32>
    %c0_8 = arith.constant 0 : index
    %c0_9 = arith.constant 0 : index
    %23 = vector.load %arg3[%c0_8, %c0_9] : memref<8x1xf32, #tpu.memory_space<vmem>>, vector<8x1xf32>
    %24 = vector.broadcast %23 : vector<8x1xf32> to vector<8x256xf32>
    %25 = arith.addf %22, %24 : vector<8x256xf32>
    %c0_10 = arith.constant 0 : index
    %c0_11 = arith.constant 0 : index
    %26 = vector.load %arg4[%c0_10, %c0_11] : memref<8x8xbf16, #tpu.memory_space<vmem>>, vector<8x8xbf16>
    %27 = arith.truncf %25 : vector<8x256xf32> to vector<8x256xbf16>
    %cst_12 = arith.constant dense<0.000000e+00> : vector<8x256xf32>
    %28 = tpu.matmul %26, %27, %cst_12 {dimension_numbers = #tpu.dot_dimension_numbers<[1], [0], [0], [1], [0, 0, 1, 1], [], []>} : vector<8x8xbf16>, vector<8x256xbf16>, vector<8x256xf32> -> vector<8x256xf32>
    %c0_13 = arith.constant 0 : index
    %c0_14 = arith.constant 0 : index
    %29 = vector.load %arg5[%c0_13, %c0_14] : memref<8x1xf32, #tpu.memory_space<vmem>>, vector<8x1xf32>
    %30 = vector.broadcast %29 : vector<8x1xf32> to vector<8x256xf32>
    %31 = arith.addf %28, %30 : vector<8x256xf32>
    %cst_15 = arith.constant dense<0.000000e+00> : vector<8xf32>
    %32 = vector.multi_reduction <add>, %31, %cst_15 [1] : vector<8x256xf32> to vector<8xf32>
    %33 = vector.shape_cast %32 : vector<8xf32> to vector<8x1xf32>
    %cst_16 = arith.constant 2.560000e+02 : f32
    %34 = vector.broadcast %cst_16 : f32 to vector<8x1xf32>
    %35 = arith.divf %33, %34 : vector<8x1xf32>
    %c0_17 = arith.constant 0 : index
    %c0_18 = arith.constant 0 : index
    %36 = vector.load %arg6[%c0_17, %c0_18] : memref<8x1xf32, #tpu.memory_space<vmem>>, vector<8x1xf32>
    %37 = vector.broadcast %35 : vector<8x1xf32> to vector<8x256xf32>
    %38 = arith.subf %31, %37 : vector<8x256xf32>
    %39 = vector.broadcast %36 : vector<8x1xf32> to vector<8x256xf32>
    %40 = arith.mulf %39, %38 : vector<8x256xf32>
    %41 = arith.addf %31, %40 : vector<8x256xf32>
    %cst_19 = arith.constant 5.000000e-01 : f32
    %42 = vector.broadcast %cst_19 : f32 to vector<8x256xf32>
    %43 = arith.mulf %42, %41 : vector<8x256xf32>
    %cst_20 = arith.constant 4.471500e-02 : f32
    %44 = vector.broadcast %cst_20 : f32 to vector<8x256xf32>
    %45 = arith.mulf %44, %41 : vector<8x256xf32>
    %46 = arith.mulf %45, %41 : vector<8x256xf32>
    %47 = arith.mulf %46, %41 : vector<8x256xf32>
    %48 = arith.addf %41, %47 : vector<8x256xf32>
    %cst_21 = arith.constant 0.797884583 : f32
    %49 = vector.broadcast %cst_21 : f32 to vector<8x256xf32>
    %50 = arith.mulf %49, %48 : vector<8x256xf32>
    %51 = math.tanh %50 : vector<8x256xf32>
    %cst_22 = arith.constant 1.000000e+00 : f32
    %52 = vector.broadcast %cst_22 : f32 to vector<8x256xf32>
    %53 = arith.addf %52, %51 : vector<8x256xf32>
    %54 = arith.mulf %43, %53 : vector<8x256xf32>
    %c0_23 = arith.constant 0 : index
    %c0_24 = arith.constant 0 : index
    %c0_25 = arith.constant 0 : index
    %55 = vector.load %arg7[%c0_23, %c0_24, %c0_25] : memref<1x8x256xf32, #tpu.memory_space<vmem>>, vector<1x8x256xf32>
    %56 = vector.shape_cast %55 : vector<1x8x256xf32> to vector<8x256xf32>
    %57 = vector.shape_cast %54 : vector<8x256xf32> to vector<1x8x256xf32>
    tpu.vector_store %arg7[%c0_23, %c0_24, %c0_25], %57 {strides = array<i32>} : memref<1x8x256xf32, #tpu.memory_space<vmem>>, vector<1x8x256xf32>,
    return
  }
  func.func @transform_0(%arg0: i32) -> (i32, i32, i32) {
    %c0_i32 = arith.constant 0 : i32
    %c0_i32_0 = arith.constant 0 : i32
    %c0_i32_1 = arith.constant 0 : i32
    return %arg0, %c0_i32, %c0_i32_0 : i32, i32, i32
  }
  func.func @transform_1(%arg0: i32) -> (i32, i32) {
    %c0_i32 = arith.constant 0 : i32
    %c0_i32_0 = arith.constant 0 : i32
    %c0_i32_1 = arith.constant 0 : i32
    return %c0_i32, %c0_i32_0 : i32, i32
  }
  func.func @transform_2(%arg0: i32) -> (i32, i32) {
    %c0_i32 = arith.constant 0 : i32
    %c0_i32_0 = arith.constant 0 : i32
    %c0_i32_1 = arith.constant 0 : i32
    return %c0_i32, %c0_i32_0 : i32, i32
  }
  func.func @transform_3(%arg0: i32) -> (i32, i32) {
    %c0_i32 = arith.constant 0 : i32
    %c0_i32_0 = arith.constant 0 : i32
    %c0_i32_1 = arith.constant 0 : i32
    return %c0_i32, %c0_i32_0 : i32, i32
  }
  func.func @transform_4(%arg0: i32) -> (i32, i32) {
    %c0_i32 = arith.constant 0 : i32
    %c0_i32_0 = arith.constant 0 : i32
    %c0_i32_1 = arith.constant 0 : i32
    return %c0_i32, %c0_i32_0 : i32, i32
  }
  func.func @transform_5(%arg0: i32) -> (i32, i32) {
    %c0_i32 = arith.constant 0 : i32
    %c0_i32_0 = arith.constant 0 : i32
    %c0_i32_1 = arith.constant 0 : i32
    return %c0_i32, %c0_i32_0 : i32, i32
  }
  func.func @transform_6(%arg0: i32) -> (i32, i32, i32) {
    %c0_i32 = arith.constant 0 : i32
    %c0_i32_0 = arith.constant 0 : i32
    %c0_i32_1 = arith.constant 0 : i32
    return %arg0, %c0_i32, %c0_i32_0 : i32, i32, i32
  }
}

module attributes {stable_mosaic.version = 11 : i64} {
  func.func @kernel(%arg0: i32, %arg1: memref<1x8x256xf32, #tpu.memory_space<vmem>>, %arg2: memref<1x8x256xf32, #tpu.memory_space<vmem>>, %arg3: memref<1x2x256xf32, #tpu.memory_space<vmem>>, %arg4: memref<1x2x256xf32, #tpu.memory_space<vmem>>, %arg5: memref<1x2x256xf32, #tpu.memory_space<vmem>>, %arg6: memref<1x256xi32, #tpu.memory_space<vmem>>, %arg7: memref<1x256xi32, #tpu.memory_space<vmem>>, %arg8: memref<4x2x9xf32, #tpu.memory_space<vmem>>, %arg9: memref<4x2x1xf32, #tpu.memory_space<vmem>>, %arg10: memref<4x8x2xbf16, #tpu.memory_space<vmem>>, %arg11: memref<8x1xf32, #tpu.memory_space<vmem>>, %arg12: memref<8x1xf32, #tpu.memory_space<vmem>>, %arg13: memref<8x1xf32, #tpu.memory_space<vmem>>, %arg14: memref<32x8xbf16, #tpu.memory_space<vmem>>, %arg15: memref<32x9xf32, #tpu.memory_space<vmem>>, %arg16: memref<16x1xf32, #tpu.memory_space<vmem>>, %arg17: memref<1x1xf32, #tpu.memory_space<vmem>>, %arg18: memref<16x1xf32, #tpu.memory_space<vmem>>, %arg19: memref<8x16xbf16, #tpu.memory_space<vmem>>, %arg20: memref<1x8x256xf32, #tpu.memory_space<vmem>>) attributes {dimension_semantics = [#tpu.dimension_semantics<parallel>], iteration_bounds = array<i64: 2>, scalar_prefetch = 0 : i64, scratch_operands = 0 : i64, tpu.core_type = #tpu.core_type<tc>, window_params = [{transform_indices = @transform_0, window_bounds = array<i64: 1, 8, 256>}, {transform_indices = @transform_1, window_bounds = array<i64: 1, 8, 256>}, {transform_indices = @transform_2, window_bounds = array<i64: 1, 2, 256>}, {transform_indices = @transform_3, window_bounds = array<i64: 1, 2, 256>}, {transform_indices = @transform_4, window_bounds = array<i64: 1, 2, 256>}, {pipeline_mode = #tpu.pipeline_mode<synchronous>, transform_indices = @transform_5, window_bounds = array<i64: 1, 256>}, {pipeline_mode = #tpu.pipeline_mode<synchronous>, transform_indices = @transform_6, window_bounds = array<i64: 1, 256>}, {pipeline_mode = #tpu.pipeline_mode<synchronous>, transform_indices = @transform_7, window_bounds = array<i64: 4, 2, 9>}, {pipeline_mode = #tpu.pipeline_mode<synchronous>, transform_indices = @transform_8, window_bounds = array<i64: 4, 2, 1>}, {pipeline_mode = #tpu.pipeline_mode<synchronous>, transform_indices = @transform_9, window_bounds = array<i64: 4, 8, 2>}, {pipeline_mode = #tpu.pipeline_mode<synchronous>, transform_indices = @transform_10, window_bounds = array<i64: 8, 1>}, {pipeline_mode = #tpu.pipeline_mode<synchronous>, transform_indices = @transform_11, window_bounds = array<i64: 8, 1>}, {pipeline_mode = #tpu.pipeline_mode<synchronous>, transform_indices = @transform_12, window_bounds = array<i64: 8, 1>}, {pipeline_mode = #tpu.pipeline_mode<synchronous>, transform_indices = @transform_13, window_bounds = array<i64: 32, 8>}, {pipeline_mode = #tpu.pipeline_mode<synchronous>, transform_indices = @transform_14, window_bounds = array<i64: 32, 9>}, {pipeline_mode = #tpu.pipeline_mode<synchronous>, transform_indices = @transform_15, window_bounds = array<i64: 16, 1>}, {pipeline_mode = #tpu.pipeline_mode<synchronous>, transform_indices = @transform_16, window_bounds = array<i64: 1, 1>}, {pipeline_mode = #tpu.pipeline_mode<synchronous>, transform_indices = @transform_17, window_bounds = array<i64: 16, 1>}, {pipeline_mode = #tpu.pipeline_mode<synchronous>, transform_indices = @transform_18, window_bounds = array<i64: 8, 16>}, {transform_indices = @transform_19, window_bounds = array<i64: 1, 8, 256>}]} {
    %c0 = arith.constant 0 : index
    %c0_0 = arith.constant 0 : index
    %0 = vector.load %arg6[%c0, %c0_0] : memref<1x256xi32, #tpu.memory_space<vmem>>, vector<1x256xi32>
    %c0_1 = arith.constant 0 : index
    %c0_2 = arith.constant 0 : index
    %1 = vector.load %arg7[%c0_1, %c0_2] : memref<1x256xi32, #tpu.memory_space<vmem>>, vector<1x256xi32>
    %c0_3 = arith.constant 0 : index
    %c0_4 = arith.constant 0 : index
    %c0_5 = arith.constant 0 : index
    %2 = vector.load %arg2[%c0_3, %c0_4, %c0_5] : memref<1x8x256xf32, #tpu.memory_space<vmem>>, vector<1x8x256xf32>
    %3 = vector.shape_cast %2 : vector<1x8x256xf32> to vector<8x256xf32>
    %4 = vector.extract_strided_slice %3 {offsets = [0, 0], sizes = [2, 256], strides = [1, 1]} : vector<8x256xf32> to vector<2x256xf32>
    %c0_6 = arith.constant 0 : index
    %c0_7 = arith.constant 0 : index
    %c0_8 = arith.constant 0 : index
    %5 = vector.load %arg3[%c0_6, %c0_7, %c0_8] : memref<1x2x256xf32, #tpu.memory_space<vmem>>, vector<1x2x256xf32>
    %6 = vector.shape_cast %5 : vector<1x2x256xf32> to vector<2x256xf32>
    %c0_9 = arith.constant 0 : index
    %c0_10 = arith.constant 0 : index
    %c0_11 = arith.constant 0 : index
    %7 = vector.load %arg4[%c0_9, %c0_10, %c0_11] : memref<1x2x256xf32, #tpu.memory_space<vmem>>, vector<1x2x256xf32>
    %8 = vector.shape_cast %7 : vector<1x2x256xf32> to vector<2x256xf32>
    %c0_12 = arith.constant 0 : index
    %c0_13 = arith.constant 0 : index
    %c0_14 = arith.constant 0 : index
    %9 = vector.load %arg5[%c0_12, %c0_13, %c0_14] : memref<1x2x256xf32, #tpu.memory_space<vmem>>, vector<1x2x256xf32>
    %10 = vector.shape_cast %9 : vector<1x2x256xf32> to vector<2x256xf32>
    %c0_15 = arith.constant 0 : index
    %c0_16 = arith.constant 0 : index
    %c0_17 = arith.constant 0 : index
    %11 = vector.load %arg8[%c0_15, %c0_16, %c0_17] : memref<4x2x9xf32, #tpu.memory_space<vmem>>, vector<1x2x9xf32>
    %12 = vector.shape_cast %11 : vector<1x2x9xf32> to vector<2x9xf32>
    %c0_18 = arith.constant 0 : index
    %c0_19 = arith.constant 0 : index
    %c0_20 = arith.constant 0 : index
    %13 = vector.load %arg9[%c0_18, %c0_19, %c0_20] : memref<4x2x1xf32, #tpu.memory_space<vmem>>, vector<1x2x1xf32>
    %14 = vector.shape_cast %13 : vector<1x2x1xf32> to vector<2x1xf32>
    %cst = arith.constant 0.000000e+00 : f32
    %15 = vector.broadcast %cst : f32 to vector<2x256xf32>
    %c17_i32 = arith.constant 17 : i32
    %16 = tpu.dynamic_rotate %4 by %c17_i32 dim 1 : vector<2x256xf32>, i32 -> vector<2x256xf32>
    %c-1_i32 = arith.constant -1 : i32
    %17 = vector.broadcast %c-1_i32 : i32 to vector<1x256xi32>
    %18 = arith.addi %0, %17 : vector<1x256xi32>
    %c0_i32 = arith.constant 0 : i32
    %19 = vector.broadcast %c0_i32 : i32 to vector<1x256xi32>
    %20 = arith.cmpi sge, %18, %19 : vector<1x256xi32>
    %c-1_i32_21 = arith.constant -1 : i32
    %21 = vector.broadcast %c-1_i32_21 : i32 to vector<1x256xi32>
    %22 = arith.addi %0, %21 : vector<1x256xi32>
    %c16_i32 = arith.constant 16 : i32
    %23 = vector.broadcast %c16_i32 : i32 to vector<1x256xi32>
    %24 = arith.cmpi slt, %22, %23 : vector<1x256xi32>
    %25 = arith.andi %20, %24 : vector<1x256xi1>
    %c-1_i32_22 = arith.constant -1 : i32
    %26 = vector.broadcast %c-1_i32_22 : i32 to vector<1x256xi32>
    %27 = arith.addi %1, %26 : vector<1x256xi32>
    %c0_i32_23 = arith.constant 0 : i32
    %28 = vector.broadcast %c0_i32_23 : i32 to vector<1x256xi32>
    %29 = arith.cmpi sge, %27, %28 : vector<1x256xi32>
    %30 = arith.andi %25, %29 : vector<1x256xi1>
    %c-1_i32_24 = arith.constant -1 : i32
    %31 = vector.broadcast %c-1_i32_24 : i32 to vector<1x256xi32>
    %32 = arith.addi %1, %31 : vector<1x256xi32>
    %c16_i32_25 = arith.constant 16 : i32
    %33 = vector.broadcast %c16_i32_25 : i32 to vector<1x256xi32>
    %34 = arith.cmpi slt, %32, %33 : vector<1x256xi32>
    %35 = arith.andi %30, %34 : vector<1x256xi1>
    %cst_26 = arith.constant 0.000000e+00 : f32
    %36 = vector.shape_cast %35 : vector<1x256xi1> to vector<1x256xi1>
    %37 = vector.broadcast %36 : vector<1x256xi1> to vector<2x256xi1>
    %38 = vector.broadcast %cst_26 : f32 to vector<2x256xf32>
    %39 = arith.select %37, %16, %38 : vector<2x256xi1>, vector<2x256xf32>
    %40 = vector.extract_strided_slice %12 {offsets = [0, 0], sizes = [2, 1], strides = [1, 1]} : vector<2x9xf32> to vector<2x1xf32>
    %41 = vector.broadcast %40 : vector<2x1xf32> to vector<2x256xf32>
    %42 = arith.mulf %39, %41 : vector<2x256xf32>
    %43 = arith.addf %15, %42 : vector<2x256xf32>
    %c16_i32_27 = arith.constant 16 : i32
    %44 = tpu.dynamic_rotate %4 by %c16_i32_27 dim 1 : vector<2x256xf32>, i32 -> vector<2x256xf32>
    %c-1_i32_28 = arith.constant -1 : i32
    %45 = vector.broadcast %c-1_i32_28 : i32 to vector<1x256xi32>
    %46 = arith.addi %0, %45 : vector<1x256xi32>
    %c0_i32_29 = arith.constant 0 : i32
    %47 = vector.broadcast %c0_i32_29 : i32 to vector<1x256xi32>
    %48 = arith.cmpi sge, %46, %47 : vector<1x256xi32>
    %c-1_i32_30 = arith.constant -1 : i32
    %49 = vector.broadcast %c-1_i32_30 : i32 to vector<1x256xi32>
    %50 = arith.addi %0, %49 : vector<1x256xi32>
    %c16_i32_31 = arith.constant 16 : i32
    %51 = vector.broadcast %c16_i32_31 : i32 to vector<1x256xi32>
    %52 = arith.cmpi slt, %50, %51 : vector<1x256xi32>
    %53 = arith.andi %48, %52 : vector<1x256xi1>
    %c0_i32_32 = arith.constant 0 : i32
    %54 = vector.broadcast %c0_i32_32 : i32 to vector<1x256xi32>
    %55 = arith.addi %1, %54 : vector<1x256xi32>
    %c0_i32_33 = arith.constant 0 : i32
    %56 = vector.broadcast %c0_i32_33 : i32 to vector<1x256xi32>
    %57 = arith.cmpi sge, %55, %56 : vector<1x256xi32>
    %58 = arith.andi %53, %57 : vector<1x256xi1>
    %c0_i32_34 = arith.constant 0 : i32
    %59 = vector.broadcast %c0_i32_34 : i32 to vector<1x256xi32>
    %60 = arith.addi %1, %59 : vector<1x256xi32>
    %c16_i32_35 = arith.constant 16 : i32
    %61 = vector.broadcast %c16_i32_35 : i32 to vector<1x256xi32>
    %62 = arith.cmpi slt, %60, %61 : vector<1x256xi32>
    %63 = arith.andi %58, %62 : vector<1x256xi1>
    %cst_36 = arith.constant 0.000000e+00 : f32
    %64 = vector.shape_cast %63 : vector<1x256xi1> to vector<1x256xi1>
    %65 = vector.broadcast %64 : vector<1x256xi1> to vector<2x256xi1>
    %66 = vector.broadcast %cst_36 : f32 to vector<2x256xf32>
    %67 = arith.select %65, %44, %66 : vector<2x256xi1>, vector<2x256xf32>
    %68 = vector.extract_strided_slice %12 {offsets = [0, 1], sizes = [2, 1], strides = [1, 1]} : vector<2x9xf32> to vector<2x1xf32>
    %69 = vector.broadcast %68 : vector<2x1xf32> to vector<2x256xf32>
    %70 = arith.mulf %67, %69 : vector<2x256xf32>
    %71 = arith.addf %43, %70 : vector<2x256xf32>
    %c15_i32 = arith.constant 15 : i32
    %72 = tpu.dynamic_rotate %4 by %c15_i32 dim 1 : vector<2x256xf32>, i32 -> vector<2x256xf32>
    %c-1_i32_37 = arith.constant -1 : i32
    %73 = vector.broadcast %c-1_i32_37 : i32 to vector<1x256xi32>
    %74 = arith.addi %0, %73 : vector<1x256xi32>
    %c0_i32_38 = arith.constant 0 : i32
    %75 = vector.broadcast %c0_i32_38 : i32 to vector<1x256xi32>
    %76 = arith.cmpi sge, %74, %75 : vector<1x256xi32>
    %c-1_i32_39 = arith.constant -1 : i32
    %77 = vector.broadcast %c-1_i32_39 : i32 to vector<1x256xi32>
    %78 = arith.addi %0, %77 : vector<1x256xi32>
    %c16_i32_40 = arith.constant 16 : i32
    %79 = vector.broadcast %c16_i32_40 : i32 to vector<1x256xi32>
    %80 = arith.cmpi slt, %78, %79 : vector<1x256xi32>
    %81 = arith.andi %76, %80 : vector<1x256xi1>
    %c1_i32 = arith.constant 1 : i32
    %82 = vector.broadcast %c1_i32 : i32 to vector<1x256xi32>
    %83 = arith.addi %1, %82 : vector<1x256xi32>
    %c0_i32_41 = arith.constant 0 : i32
    %84 = vector.broadcast %c0_i32_41 : i32 to vector<1x256xi32>
    %85 = arith.cmpi sge, %83, %84 : vector<1x256xi32>
    %86 = arith.andi %81, %85 : vector<1x256xi1>
    %c1_i32_42 = arith.constant 1 : i32
    %87 = vector.broadcast %c1_i32_42 : i32 to vector<1x256xi32>
    %88 = arith.addi %1, %87 : vector<1x256xi32>
    %c16_i32_43 = arith.constant 16 : i32
    %89 = vector.broadcast %c16_i32_43 : i32 to vector<1x256xi32>
    %90 = arith.cmpi slt, %88, %89 : vector<1x256xi32>
    %91 = arith.andi %86, %90 : vector<1x256xi1>
    %cst_44 = arith.constant 0.000000e+00 : f32
    %92 = vector.shape_cast %91 : vector<1x256xi1> to vector<1x256xi1>
    %93 = vector.broadcast %92 : vector<1x256xi1> to vector<2x256xi1>
    %94 = vector.broadcast %cst_44 : f32 to vector<2x256xf32>
    %95 = arith.select %93, %72, %94 : vector<2x256xi1>, vector<2x256xf32>
    %96 = vector.extract_strided_slice %12 {offsets = [0, 2], sizes = [2, 1], strides = [1, 1]} : vector<2x9xf32> to vector<2x1xf32>
    %97 = vector.broadcast %96 : vector<2x1xf32> to vector<2x256xf32>
    %98 = arith.mulf %95, %97 : vector<2x256xf32>
    %99 = arith.addf %71, %98 : vector<2x256xf32>
    %c1_i32_45 = arith.constant 1 : i32
    %100 = tpu.dynamic_rotate %4 by %c1_i32_45 dim 1 : vector<2x256xf32>, i32 -> vector<2x256xf32>
    %c0_i32_46 = arith.constant 0 : i32
    %101 = vector.broadcast %c0_i32_46 : i32 to vector<1x256xi32>
    %102 = arith.addi %0, %101 : vector<1x256xi32>
    %c0_i32_47 = arith.constant 0 : i32
    %103 = vector.broadcast %c0_i32_47 : i32 to vector<1x256xi32>
    %104 = arith.cmpi sge, %102, %103 : vector<1x256xi32>
    %c0_i32_48 = arith.constant 0 : i32
    %105 = vector.broadcast %c0_i32_48 : i32 to vector<1x256xi32>
    %106 = arith.addi %0, %105 : vector<1x256xi32>
    %c16_i32_49 = arith.constant 16 : i32
    %107 = vector.broadcast %c16_i32_49 : i32 to vector<1x256xi32>
    %108 = arith.cmpi slt, %106, %107 : vector<1x256xi32>
    %109 = arith.andi %104, %108 : vector<1x256xi1>
    %c-1_i32_50 = arith.constant -1 : i32
    %110 = vector.broadcast %c-1_i32_50 : i32 to vector<1x256xi32>
    %111 = arith.addi %1, %110 : vector<1x256xi32>
    %c0_i32_51 = arith.constant 0 : i32
    %112 = vector.broadcast %c0_i32_51 : i32 to vector<1x256xi32>
    %113 = arith.cmpi sge, %111, %112 : vector<1x256xi32>
    %114 = arith.andi %109, %113 : vector<1x256xi1>
    %c-1_i32_52 = arith.constant -1 : i32
    %115 = vector.broadcast %c-1_i32_52 : i32 to vector<1x256xi32>
    %116 = arith.addi %1, %115 : vector<1x256xi32>
    %c16_i32_53 = arith.constant 16 : i32
    %117 = vector.broadcast %c16_i32_53 : i32 to vector<1x256xi32>
    %118 = arith.cmpi slt, %116, %117 : vector<1x256xi32>
    %119 = arith.andi %114, %118 : vector<1x256xi1>
    %cst_54 = arith.constant 0.000000e+00 : f32
    %120 = vector.shape_cast %119 : vector<1x256xi1> to vector<1x256xi1>
    %121 = vector.broadcast %120 : vector<1x256xi1> to vector<2x256xi1>
    %122 = vector.broadcast %cst_54 : f32 to vector<2x256xf32>
    %123 = arith.select %121, %100, %122 : vector<2x256xi1>, vector<2x256xf32>
    %124 = vector.extract_strided_slice %12 {offsets = [0, 3], sizes = [2, 1], strides = [1, 1]} : vector<2x9xf32> to vector<2x1xf32>
    %125 = vector.broadcast %124 : vector<2x1xf32> to vector<2x256xf32>
    %126 = arith.mulf %123, %125 : vector<2x256xf32>
    %127 = arith.addf %99, %126 : vector<2x256xf32>
    %c0_i32_55 = arith.constant 0 : i32
    %128 = vector.broadcast %c0_i32_55 : i32 to vector<1x256xi32>
    %129 = arith.addi %0, %128 : vector<1x256xi32>
    %c0_i32_56 = arith.constant 0 : i32
    %130 = vector.broadcast %c0_i32_56 : i32 to vector<1x256xi32>
    %131 = arith.cmpi sge, %129, %130 : vector<1x256xi32>
    %c0_i32_57 = arith.constant 0 : i32
    %132 = vector.broadcast %c0_i32_57 : i32 to vector<1x256xi32>
    %133 = arith.addi %0, %132 : vector<1x256xi32>
    %c16_i32_58 = arith.constant 16 : i32
    %134 = vector.broadcast %c16_i32_58 : i32 to vector<1x256xi32>
    %135 = arith.cmpi slt, %133, %134 : vector<1x256xi32>
    %136 = arith.andi %131, %135 : vector<1x256xi1>
    %c0_i32_59 = arith.constant 0 : i32
    %137 = vector.broadcast %c0_i32_59 : i32 to vector<1x256xi32>
    %138 = arith.addi %1, %137 : vector<1x256xi32>
    %c0_i32_60 = arith.constant 0 : i32
    %139 = vector.broadcast %c0_i32_60 : i32 to vector<1x256xi32>
    %140 = arith.cmpi sge, %138, %139 : vector<1x256xi32>
    %141 = arith.andi %136, %140 : vector<1x256xi1>
    %c0_i32_61 = arith.constant 0 : i32
    %142 = vector.broadcast %c0_i32_61 : i32 to vector<1x256xi32>
    %143 = arith.addi %1, %142 : vector<1x256xi32>
    %c16_i32_62 = arith.constant 16 : i32
    %144 = vector.broadcast %c16_i32_62 : i32 to vector<1x256xi32>
    %145 = arith.cmpi slt, %143, %144 : vector<1x256xi32>
    %146 = arith.andi %141, %145 : vector<1x256xi1>
    %cst_63 = arith.constant 0.000000e+00 : f32
    %147 = vector.shape_cast %146 : vector<1x256xi1> to vector<1x256xi1>
    %148 = vector.broadcast %147 : vector<1x256xi1> to vector<2x256xi1>
    %149 = vector.broadcast %cst_63 : f32 to vector<2x256xf32>
    %150 = arith.select %148, %4, %149 : vector<2x256xi1>, vector<2x256xf32>
    %151 = vector.extract_strided_slice %12 {offsets = [0, 4], sizes = [2, 1], strides = [1, 1]} : vector<2x9xf32> to vector<2x1xf32>
    %152 = vector.broadcast %151 : vector<2x1xf32> to vector<2x256xf32>
    %153 = arith.mulf %150, %152 : vector<2x256xf32>
    %154 = arith.addf %127, %153 : vector<2x256xf32>
    %c255_i32 = arith.constant 255 : i32
    %155 = tpu.dynamic_rotate %4 by %c255_i32 dim 1 : vector<2x256xf32>, i32 -> vector<2x256xf32>
    %c0_i32_64 = arith.constant 0 : i32
    %156 = vector.broadcast %c0_i32_64 : i32 to vector<1x256xi32>
    %157 = arith.addi %0, %156 : vector<1x256xi32>
    %c0_i32_65 = arith.constant 0 : i32
    %158 = vector.broadcast %c0_i32_65 : i32 to vector<1x256xi32>
    %159 = arith.cmpi sge, %157, %158 : vector<1x256xi32>
    %c0_i32_66 = arith.constant 0 : i32
    %160 = vector.broadcast %c0_i32_66 : i32 to vector<1x256xi32>
    %161 = arith.addi %0, %160 : vector<1x256xi32>
    %c16_i32_67 = arith.constant 16 : i32
    %162 = vector.broadcast %c16_i32_67 : i32 to vector<1x256xi32>
    %163 = arith.cmpi slt, %161, %162 : vector<1x256xi32>
    %164 = arith.andi %159, %163 : vector<1x256xi1>
    %c1_i32_68 = arith.constant 1 : i32
    %165 = vector.broadcast %c1_i32_68 : i32 to vector<1x256xi32>
    %166 = arith.addi %1, %165 : vector<1x256xi32>
    %c0_i32_69 = arith.constant 0 : i32
    %167 = vector.broadcast %c0_i32_69 : i32 to vector<1x256xi32>
    %168 = arith.cmpi sge, %166, %167 : vector<1x256xi32>
    %169 = arith.andi %164, %168 : vector<1x256xi1>
    %c1_i32_70 = arith.constant 1 : i32
    %170 = vector.broadcast %c1_i32_70 : i32 to vector<1x256xi32>
    %171 = arith.addi %1, %170 : vector<1x256xi32>
    %c16_i32_71 = arith.constant 16 : i32
    %172 = vector.broadcast %c16_i32_71 : i32 to vector<1x256xi32>
    %173 = arith.cmpi slt, %171, %172 : vector<1x256xi32>
    %174 = arith.andi %169, %173 : vector<1x256xi1>
    %cst_72 = arith.constant 0.000000e+00 : f32
    %175 = vector.shape_cast %174 : vector<1x256xi1> to vector<1x256xi1>
    %176 = vector.broadcast %175 : vector<1x256xi1> to vector<2x256xi1>
    %177 = vector.broadcast %cst_72 : f32 to vector<2x256xf32>
    %178 = arith.select %176, %155, %177 : vector<2x256xi1>, vector<2x256xf32>
    %179 = vector.extract_strided_slice %12 {offsets = [0, 5], sizes = [2, 1], strides = [1, 1]} : vector<2x9xf32> to vector<2x1xf32>
    %180 = vector.broadcast %179 : vector<2x1xf32> to vector<2x256xf32>
    %181 = arith.mulf %178, %180 : vector<2x256xf32>
    %182 = arith.addf %154, %181 : vector<2x256xf32>
    %c241_i32 = arith.constant 241 : i32
    %183 = tpu.dynamic_rotate %4 by %c241_i32 dim 1 : vector<2x256xf32>, i32 -> vector<2x256xf32>
    %c1_i32_73 = arith.constant 1 : i32
    %184 = vector.broadcast %c1_i32_73 : i32 to vector<1x256xi32>
    %185 = arith.addi %0, %184 : vector<1x256xi32>
    %c0_i32_74 = arith.constant 0 : i32
    %186 = vector.broadcast %c0_i32_74 : i32 to vector<1x256xi32>
    %187 = arith.cmpi sge, %185, %186 : vector<1x256xi32>
    %c1_i32_75 = arith.constant 1 : i32
    %188 = vector.broadcast %c1_i32_75 : i32 to vector<1x256xi32>
    %189 = arith.addi %0, %188 : vector<1x256xi32>
    %c16_i32_76 = arith.constant 16 : i32
    %190 = vector.broadcast %c16_i32_76 : i32 to vector<1x256xi32>
    %191 = arith.cmpi slt, %189, %190 : vector<1x256xi32>
    %192 = arith.andi %187, %191 : vector<1x256xi1>
    %c-1_i32_77 = arith.constant -1 : i32
    %193 = vector.broadcast %c-1_i32_77 : i32 to vector<1x256xi32>
    %194 = arith.addi %1, %193 : vector<1x256xi32>
    %c0_i32_78 = arith.constant 0 : i32
    %195 = vector.broadcast %c0_i32_78 : i32 to vector<1x256xi32>
    %196 = arith.cmpi sge, %194, %195 : vector<1x256xi32>
    %197 = arith.andi %192, %196 : vector<1x256xi1>
    %c-1_i32_79 = arith.constant -1 : i32
    %198 = vector.broadcast %c-1_i32_79 : i32 to vector<1x256xi32>
    %199 = arith.addi %1, %198 : vector<1x256xi32>
    %c16_i32_80 = arith.constant 16 : i32
    %200 = vector.broadcast %c16_i32_80 : i32 to vector<1x256xi32>
    %201 = arith.cmpi slt, %199, %200 : vector<1x256xi32>
    %202 = arith.andi %197, %201 : vector<1x256xi1>
    %cst_81 = arith.constant 0.000000e+00 : f32
    %203 = vector.shape_cast %202 : vector<1x256xi1> to vector<1x256xi1>
    %204 = vector.broadcast %203 : vector<1x256xi1> to vector<2x256xi1>
    %205 = vector.broadcast %cst_81 : f32 to vector<2x256xf32>
    %206 = arith.select %204, %183, %205 : vector<2x256xi1>, vector<2x256xf32>
    %207 = vector.extract_strided_slice %12 {offsets = [0, 6], sizes = [2, 1], strides = [1, 1]} : vector<2x9xf32> to vector<2x1xf32>
    %208 = vector.broadcast %207 : vector<2x1xf32> to vector<2x256xf32>
    %209 = arith.mulf %206, %208 : vector<2x256xf32>
    %210 = arith.addf %182, %209 : vector<2x256xf32>
    %c240_i32 = arith.constant 240 : i32
    %211 = tpu.dynamic_rotate %4 by %c240_i32 dim 1 : vector<2x256xf32>, i32 -> vector<2x256xf32>
    %c1_i32_82 = arith.constant 1 : i32
    %212 = vector.broadcast %c1_i32_82 : i32 to vector<1x256xi32>
    %213 = arith.addi %0, %212 : vector<1x256xi32>
    %c0_i32_83 = arith.constant 0 : i32
    %214 = vector.broadcast %c0_i32_83 : i32 to vector<1x256xi32>
    %215 = arith.cmpi sge, %213, %214 : vector<1x256xi32>
    %c1_i32_84 = arith.constant 1 : i32
    %216 = vector.broadcast %c1_i32_84 : i32 to vector<1x256xi32>
    %217 = arith.addi %0, %216 : vector<1x256xi32>
    %c16_i32_85 = arith.constant 16 : i32
    %218 = vector.broadcast %c16_i32_85 : i32 to vector<1x256xi32>
    %219 = arith.cmpi slt, %217, %218 : vector<1x256xi32>
    %220 = arith.andi %215, %219 : vector<1x256xi1>
    %c0_i32_86 = arith.constant 0 : i32
    %221 = vector.broadcast %c0_i32_86 : i32 to vector<1x256xi32>
    %222 = arith.addi %1, %221 : vector<1x256xi32>
    %c0_i32_87 = arith.constant 0 : i32
    %223 = vector.broadcast %c0_i32_87 : i32 to vector<1x256xi32>
    %224 = arith.cmpi sge, %222, %223 : vector<1x256xi32>
    %225 = arith.andi %220, %224 : vector<1x256xi1>
    %c0_i32_88 = arith.constant 0 : i32
    %226 = vector.broadcast %c0_i32_88 : i32 to vector<1x256xi32>
    %227 = arith.addi %1, %226 : vector<1x256xi32>
    %c16_i32_89 = arith.constant 16 : i32
    %228 = vector.broadcast %c16_i32_89 : i32 to vector<1x256xi32>
    %229 = arith.cmpi slt, %227, %228 : vector<1x256xi32>
    %230 = arith.andi %225, %229 : vector<1x256xi1>
    %cst_90 = arith.constant 0.000000e+00 : f32
    %231 = vector.shape_cast %230 : vector<1x256xi1> to vector<1x256xi1>
    %232 = vector.broadcast %231 : vector<1x256xi1> to vector<2x256xi1>
    %233 = vector.broadcast %cst_90 : f32 to vector<2x256xf32>
    %234 = arith.select %232, %211, %233 : vector<2x256xi1>, vector<2x256xf32>
    %235 = vector.extract_strided_slice %12 {offsets = [0, 7], sizes = [2, 1], strides = [1, 1]} : vector<2x9xf32> to vector<2x1xf32>
    %236 = vector.broadcast %235 : vector<2x1xf32> to vector<2x256xf32>
    %237 = arith.mulf %234, %236 : vector<2x256xf32>
    %238 = arith.addf %210, %237 : vector<2x256xf32>
    %c239_i32 = arith.constant 239 : i32
    %239 = tpu.dynamic_rotate %4 by %c239_i32 dim 1 : vector<2x256xf32>, i32 -> vector<2x256xf32>
    %c1_i32_91 = arith.constant 1 : i32
    %240 = vector.broadcast %c1_i32_91 : i32 to vector<1x256xi32>
    %241 = arith.addi %0, %240 : vector<1x256xi32>
    %c0_i32_92 = arith.constant 0 : i32
    %242 = vector.broadcast %c0_i32_92 : i32 to vector<1x256xi32>
    %243 = arith.cmpi sge, %241, %242 : vector<1x256xi32>
    %c1_i32_93 = arith.constant 1 : i32
    %244 = vector.broadcast %c1_i32_93 : i32 to vector<1x256xi32>
    %245 = arith.addi %0, %244 : vector<1x256xi32>
    %c16_i32_94 = arith.constant 16 : i32
    %246 = vector.broadcast %c16_i32_94 : i32 to vector<1x256xi32>
    %247 = arith.cmpi slt, %245, %246 : vector<1x256xi32>
    %248 = arith.andi %243, %247 : vector<1x256xi1>
    %c1_i32_95 = arith.constant 1 : i32
    %249 = vector.broadcast %c1_i32_95 : i32 to vector<1x256xi32>
    %250 = arith.addi %1, %249 : vector<1x256xi32>
    %c0_i32_96 = arith.constant 0 : i32
    %251 = vector.broadcast %c0_i32_96 : i32 to vector<1x256xi32>
    %252 = arith.cmpi sge, %250, %251 : vector<1x256xi32>
    %253 = arith.andi %248, %252 : vector<1x256xi1>
    %c1_i32_97 = arith.constant 1 : i32
    %254 = vector.broadcast %c1_i32_97 : i32 to vector<1x256xi32>
    %255 = arith.addi %1, %254 : vector<1x256xi32>
    %c16_i32_98 = arith.constant 16 : i32
    %256 = vector.broadcast %c16_i32_98 : i32 to vector<1x256xi32>
    %257 = arith.cmpi slt, %255, %256 : vector<1x256xi32>
    %258 = arith.andi %253, %257 : vector<1x256xi1>
    %cst_99 = arith.constant 0.000000e+00 : f32
    %259 = vector.shape_cast %258 : vector<1x256xi1> to vector<1x256xi1>
    %260 = vector.broadcast %259 : vector<1x256xi1> to vector<2x256xi1>
    %261 = vector.broadcast %cst_99 : f32 to vector<2x256xf32>
    %262 = arith.select %260, %239, %261 : vector<2x256xi1>, vector<2x256xf32>
    %263 = vector.extract_strided_slice %12 {offsets = [0, 8], sizes = [2, 1], strides = [1, 1]} : vector<2x9xf32> to vector<2x1xf32>
    %264 = vector.broadcast %263 : vector<2x1xf32> to vector<2x256xf32>
    %265 = arith.mulf %262, %264 : vector<2x256xf32>
    %266 = arith.addf %238, %265 : vector<2x256xf32>
    %267 = vector.broadcast %14 : vector<2x1xf32> to vector<2x256xf32>
    %268 = arith.addf %266, %267 : vector<2x256xf32>
    %c0_100 = arith.constant 0 : index
    %c0_101 = arith.constant 0 : index
    %c0_102 = arith.constant 0 : index
    %269 = vector.load %arg10[%c0_100, %c0_101, %c0_102] : memref<4x8x2xbf16, #tpu.memory_space<vmem>>, vector<1x8x2xbf16>
    %270 = vector.shape_cast %269 : vector<1x8x2xbf16> to vector<8x2xbf16>
    %271 = arith.truncf %268 : vector<2x256xf32> to vector<2x256xbf16>
    %cst_103 = arith.constant dense<0.000000e+00> : vector<8x256xf32>
    %272 = tpu.matmul %270, %271, %cst_103 {dimension_numbers = #tpu.dot_dimension_numbers<[1], [0], [0], [1], [0, 0, 1, 1], [], []>} : vector<8x2xbf16>, vector<2x256xbf16>, vector<8x256xf32> -> vector<8x256xf32>
    %c1 = arith.constant 1 : index
    %c0_104 = arith.constant 0 : index
    %c0_105 = arith.constant 0 : index
    %273 = vector.load %arg8[%c1, %c0_104, %c0_105] : memref<4x2x9xf32, #tpu.memory_space<vmem>>, vector<1x2x9xf32>
    %274 = vector.shape_cast %273 : vector<1x2x9xf32> to vector<2x9xf32>
    %c1_106 = arith.constant 1 : index
    %c0_107 = arith.constant 0 : index
    %c0_108 = arith.constant 0 : index
    %275 = vector.load %arg9[%c1_106, %c0_107, %c0_108] : memref<4x2x1xf32, #tpu.memory_space<vmem>>, vector<1x2x1xf32>
    %276 = vector.shape_cast %275 : vector<1x2x1xf32> to vector<2x1xf32>
    %cst_109 = arith.constant 0.000000e+00 : f32
    %277 = vector.broadcast %cst_109 : f32 to vector<2x256xf32>
    %c68_i32 = arith.constant 68 : i32
    %278 = tpu.dynamic_rotate %6 by %c68_i32 dim 1 : vector<2x256xf32>, i32 -> vector<2x256xf32>
    %c-4_i32 = arith.constant -4 : i32
    %279 = vector.broadcast %c-4_i32 : i32 to vector<1x256xi32>
    %280 = arith.addi %0, %279 : vector<1x256xi32>
    %c0_i32_110 = arith.constant 0 : i32
    %281 = vector.broadcast %c0_i32_110 : i32 to vector<1x256xi32>
    %282 = arith.cmpi sge, %280, %281 : vector<1x256xi32>
    %c-4_i32_111 = arith.constant -4 : i32
    %283 = vector.broadcast %c-4_i32_111 : i32 to vector<1x256xi32>
    %284 = arith.addi %0, %283 : vector<1x256xi32>
    %c16_i32_112 = arith.constant 16 : i32
    %285 = vector.broadcast %c16_i32_112 : i32 to vector<1x256xi32>
    %286 = arith.cmpi slt, %284, %285 : vector<1x256xi32>
    %287 = arith.andi %282, %286 : vector<1x256xi1>
    %c-4_i32_113 = arith.constant -4 : i32
    %288 = vector.broadcast %c-4_i32_113 : i32 to vector<1x256xi32>
    %289 = arith.addi %1, %288 : vector<1x256xi32>
    %c0_i32_114 = arith.constant 0 : i32
    %290 = vector.broadcast %c0_i32_114 : i32 to vector<1x256xi32>
    %291 = arith.cmpi sge, %289, %290 : vector<1x256xi32>
    %292 = arith.andi %287, %291 : vector<1x256xi1>
    %c-4_i32_115 = arith.constant -4 : i32
    %293 = vector.broadcast %c-4_i32_115 : i32 to vector<1x256xi32>
    %294 = arith.addi %1, %293 : vector<1x256xi32>
    %c16_i32_116 = arith.constant 16 : i32
    %295 = vector.broadcast %c16_i32_116 : i32 to vector<1x256xi32>
    %296 = arith.cmpi slt, %294, %295 : vector<1x256xi32>
    %297 = arith.andi %292, %296 : vector<1x256xi1>
    %cst_117 = arith.constant 0.000000e+00 : f32
    %298 = vector.shape_cast %297 : vector<1x256xi1> to vector<1x256xi1>
    %299 = vector.broadcast %298 : vector<1x256xi1> to vector<2x256xi1>
    %300 = vector.broadcast %cst_117 : f32 to vector<2x256xf32>
    %301 = arith.select %299, %278, %300 : vector<2x256xi1>, vector<2x256xf32>
    %302 = vector.extract_strided_slice %274 {offsets = [0, 0], sizes = [2, 1], strides = [1, 1]} : vector<2x9xf32> to vector<2x1xf32>
    %303 = vector.broadcast %302 : vector<2x1xf32> to vector<2x256xf32>
    %304 = arith.mulf %301, %303 : vector<2x256xf32>
    %305 = arith.addf %277, %304 : vector<2x256xf32>
    %c64_i32 = arith.constant 64 : i32
    %306 = tpu.dynamic_rotate %6 by %c64_i32 dim 1 : vector<2x256xf32>, i32 -> vector<2x256xf32>
    %c-4_i32_118 = arith.constant -4 : i32
    %307 = vector.broadcast %c-4_i32_118 : i32 to vector<1x256xi32>
    %308 = arith.addi %0, %307 : vector<1x256xi32>
    %c0_i32_119 = arith.constant 0 : i32
    %309 = vector.broadcast %c0_i32_119 : i32 to vector<1x256xi32>
    %310 = arith.cmpi sge, %308, %309 : vector<1x256xi32>
    %c-4_i32_120 = arith.constant -4 : i32
    %311 = vector.broadcast %c-4_i32_120 : i32 to vector<1x256xi32>
    %312 = arith.addi %0, %311 : vector<1x256xi32>
    %c16_i32_121 = arith.constant 16 : i32
    %313 = vector.broadcast %c16_i32_121 : i32 to vector<1x256xi32>
    %314 = arith.cmpi slt, %312, %313 : vector<1x256xi32>
    %315 = arith.andi %310, %314 : vector<1x256xi1>
    %c0_i32_122 = arith.constant 0 : i32
    %316 = vector.broadcast %c0_i32_122 : i32 to vector<1x256xi32>
    %317 = arith.addi %1, %316 : vector<1x256xi32>
    %c0_i32_123 = arith.constant 0 : i32
    %318 = vector.broadcast %c0_i32_123 : i32 to vector<1x256xi32>
    %319 = arith.cmpi sge, %317, %318 : vector<1x256xi32>
    %320 = arith.andi %315, %319 : vector<1x256xi1>
    %c0_i32_124 = arith.constant 0 : i32
    %321 = vector.broadcast %c0_i32_124 : i32 to vector<1x256xi32>
    %322 = arith.addi %1, %321 : vector<1x256xi32>
    %c16_i32_125 = arith.constant 16 : i32
    %323 = vector.broadcast %c16_i32_125 : i32 to vector<1x256xi32>
    %324 = arith.cmpi slt, %322, %323 : vector<1x256xi32>
    %325 = arith.andi %320, %324 : vector<1x256xi1>
    %cst_126 = arith.constant 0.000000e+00 : f32
    %326 = vector.shape_cast %325 : vector<1x256xi1> to vector<1x256xi1>
    %327 = vector.broadcast %326 : vector<1x256xi1> to vector<2x256xi1>
    %328 = vector.broadcast %cst_126 : f32 to vector<2x256xf32>
    %329 = arith.select %327, %306, %328 : vector<2x256xi1>, vector<2x256xf32>
    %330 = vector.extract_strided_slice %274 {offsets = [0, 1], sizes = [2, 1], strides = [1, 1]} : vector<2x9xf32> to vector<2x1xf32>
    %331 = vector.broadcast %330 : vector<2x1xf32> to vector<2x256xf32>
    %332 = arith.mulf %329, %331 : vector<2x256xf32>
    %333 = arith.addf %305, %332 : vector<2x256xf32>
    %c60_i32 = arith.constant 60 : i32
    %334 = tpu.dynamic_rotate %6 by %c60_i32 dim 1 : vector<2x256xf32>, i32 -> vector<2x256xf32>
    %c-4_i32_127 = arith.constant -4 : i32
    %335 = vector.broadcast %c-4_i32_127 : i32 to vector<1x256xi32>
    %336 = arith.addi %0, %335 : vector<1x256xi32>
    %c0_i32_128 = arith.constant 0 : i32
    %337 = vector.broadcast %c0_i32_128 : i32 to vector<1x256xi32>
    %338 = arith.cmpi sge, %336, %337 : vector<1x256xi32>
    %c-4_i32_129 = arith.constant -4 : i32
    %339 = vector.broadcast %c-4_i32_129 : i32 to vector<1x256xi32>
    %340 = arith.addi %0, %339 : vector<1x256xi32>
    %c16_i32_130 = arith.constant 16 : i32
    %341 = vector.broadcast %c16_i32_130 : i32 to vector<1x256xi32>
    %342 = arith.cmpi slt, %340, %341 : vector<1x256xi32>
    %343 = arith.andi %338, %342 : vector<1x256xi1>
    %c4_i32 = arith.constant 4 : i32
    %344 = vector.broadcast %c4_i32 : i32 to vector<1x256xi32>
    %345 = arith.addi %1, %344 : vector<1x256xi32>
    %c0_i32_131 = arith.constant 0 : i32
    %346 = vector.broadcast %c0_i32_131 : i32 to vector<1x256xi32>
    %347 = arith.cmpi sge, %345, %346 : vector<1x256xi32>
    %348 = arith.andi %343, %347 : vector<1x256xi1>
    %c4_i32_132 = arith.constant 4 : i32
    %349 = vector.broadcast %c4_i32_132 : i32 to vector<1x256xi32>
    %350 = arith.addi %1, %349 : vector<1x256xi32>
    %c16_i32_133 = arith.constant 16 : i32
    %351 = vector.broadcast %c16_i32_133 : i32 to vector<1x256xi32>
    %352 = arith.cmpi slt, %350, %351 : vector<1x256xi32>
    %353 = arith.andi %348, %352 : vector<1x256xi1>
    %cst_134 = arith.constant 0.000000e+00 : f32
    %354 = vector.shape_cast %353 : vector<1x256xi1> to vector<1x256xi1>
    %355 = vector.broadcast %354 : vector<1x256xi1> to vector<2x256xi1>
    %356 = vector.broadcast %cst_134 : f32 to vector<2x256xf32>
    %357 = arith.select %355, %334, %356 : vector<2x256xi1>, vector<2x256xf32>
    %358 = vector.extract_strided_slice %274 {offsets = [0, 2], sizes = [2, 1], strides = [1, 1]} : vector<2x9xf32> to vector<2x1xf32>
    %359 = vector.broadcast %358 : vector<2x1xf32> to vector<2x256xf32>
    %360 = arith.mulf %357, %359 : vector<2x256xf32>
    %361 = arith.addf %333, %360 : vector<2x256xf32>
    %c4_i32_135 = arith.constant 4 : i32
    %362 = tpu.dynamic_rotate %6 by %c4_i32_135 dim 1 : vector<2x256xf32>, i32 -> vector<2x256xf32>
    %c0_i32_136 = arith.constant 0 : i32
    %363 = vector.broadcast %c0_i32_136 : i32 to vector<1x256xi32>
    %364 = arith.addi %0, %363 : vector<1x256xi32>
    %c0_i32_137 = arith.constant 0 : i32
    %365 = vector.broadcast %c0_i32_137 : i32 to vector<1x256xi32>
    %366 = arith.cmpi sge, %364, %365 : vector<1x256xi32>
    %c0_i32_138 = arith.constant 0 : i32
    %367 = vector.broadcast %c0_i32_138 : i32 to vector<1x256xi32>
    %368 = arith.addi %0, %367 : vector<1x256xi32>
    %c16_i32_139 = arith.constant 16 : i32
    %369 = vector.broadcast %c16_i32_139 : i32 to vector<1x256xi32>
    %370 = arith.cmpi slt, %368, %369 : vector<1x256xi32>
    %371 = arith.andi %366, %370 : vector<1x256xi1>
    %c-4_i32_140 = arith.constant -4 : i32
    %372 = vector.broadcast %c-4_i32_140 : i32 to vector<1x256xi32>
    %373 = arith.addi %1, %372 : vector<1x256xi32>
    %c0_i32_141 = arith.constant 0 : i32
    %374 = vector.broadcast %c0_i32_141 : i32 to vector<1x256xi32>
    %375 = arith.cmpi sge, %373, %374 : vector<1x256xi32>
    %376 = arith.andi %371, %375 : vector<1x256xi1>
    %c-4_i32_142 = arith.constant -4 : i32
    %377 = vector.broadcast %c-4_i32_142 : i32 to vector<1x256xi32>
    %378 = arith.addi %1, %377 : vector<1x256xi32>
    %c16_i32_143 = arith.constant 16 : i32
    %379 = vector.broadcast %c16_i32_143 : i32 to vector<1x256xi32>
    %380 = arith.cmpi slt, %378, %379 : vector<1x256xi32>
    %381 = arith.andi %376, %380 : vector<1x256xi1>
    %cst_144 = arith.constant 0.000000e+00 : f32
    %382 = vector.shape_cast %381 : vector<1x256xi1> to vector<1x256xi1>
    %383 = vector.broadcast %382 : vector<1x256xi1> to vector<2x256xi1>
    %384 = vector.broadcast %cst_144 : f32 to vector<2x256xf32>
    %385 = arith.select %383, %362, %384 : vector<2x256xi1>, vector<2x256xf32>
    %386 = vector.extract_strided_slice %274 {offsets = [0, 3], sizes = [2, 1], strides = [1, 1]} : vector<2x9xf32> to vector<2x1xf32>
    %387 = vector.broadcast %386 : vector<2x1xf32> to vector<2x256xf32>
    %388 = arith.mulf %385, %387 : vector<2x256xf32>
    %389 = arith.addf %361, %388 : vector<2x256xf32>
    %c0_i32_145 = arith.constant 0 : i32
    %390 = vector.broadcast %c0_i32_145 : i32 to vector<1x256xi32>
    %391 = arith.addi %0, %390 : vector<1x256xi32>
    %c0_i32_146 = arith.constant 0 : i32
    %392 = vector.broadcast %c0_i32_146 : i32 to vector<1x256xi32>
    %393 = arith.cmpi sge, %391, %392 : vector<1x256xi32>
    %c0_i32_147 = arith.constant 0 : i32
    %394 = vector.broadcast %c0_i32_147 : i32 to vector<1x256xi32>
    %395 = arith.addi %0, %394 : vector<1x256xi32>
    %c16_i32_148 = arith.constant 16 : i32
    %396 = vector.broadcast %c16_i32_148 : i32 to vector<1x256xi32>
    %397 = arith.cmpi slt, %395, %396 : vector<1x256xi32>
    %398 = arith.andi %393, %397 : vector<1x256xi1>
    %c0_i32_149 = arith.constant 0 : i32
    %399 = vector.broadcast %c0_i32_149 : i32 to vector<1x256xi32>
    %400 = arith.addi %1, %399 : vector<1x256xi32>
    %c0_i32_150 = arith.constant 0 : i32
    %401 = vector.broadcast %c0_i32_150 : i32 to vector<1x256xi32>
    %402 = arith.cmpi sge, %400, %401 : vector<1x256xi32>
    %403 = arith.andi %398, %402 : vector<1x256xi1>
    %c0_i32_151 = arith.constant 0 : i32
    %404 = vector.broadcast %c0_i32_151 : i32 to vector<1x256xi32>
    %405 = arith.addi %1, %404 : vector<1x256xi32>
    %c16_i32_152 = arith.constant 16 : i32
    %406 = vector.broadcast %c16_i32_152 : i32 to vector<1x256xi32>
    %407 = arith.cmpi slt, %405, %406 : vector<1x256xi32>
    %408 = arith.andi %403, %407 : vector<1x256xi1>
    %cst_153 = arith.constant 0.000000e+00 : f32
    %409 = vector.shape_cast %408 : vector<1x256xi1> to vector<1x256xi1>
    %410 = vector.broadcast %409 : vector<1x256xi1> to vector<2x256xi1>
    %411 = vector.broadcast %cst_153 : f32 to vector<2x256xf32>
    %412 = arith.select %410, %6, %411 : vector<2x256xi1>, vector<2x256xf32>
    %413 = vector.extract_strided_slice %274 {offsets = [0, 4], sizes = [2, 1], strides = [1, 1]} : vector<2x9xf32> to vector<2x1xf32>
    %414 = vector.broadcast %413 : vector<2x1xf32> to vector<2x256xf32>
    %415 = arith.mulf %412, %414 : vector<2x256xf32>
    %416 = arith.addf %389, %415 : vector<2x256xf32>
    %c252_i32 = arith.constant 252 : i32
    %417 = tpu.dynamic_rotate %6 by %c252_i32 dim 1 : vector<2x256xf32>, i32 -> vector<2x256xf32>
    %c0_i32_154 = arith.constant 0 : i32
    %418 = vector.broadcast %c0_i32_154 : i32 to vector<1x256xi32>
    %419 = arith.addi %0, %418 : vector<1x256xi32>
    %c0_i32_155 = arith.constant 0 : i32
    %420 = vector.broadcast %c0_i32_155 : i32 to vector<1x256xi32>
    %421 = arith.cmpi sge, %419, %420 : vector<1x256xi32>
    %c0_i32_156 = arith.constant 0 : i32
    %422 = vector.broadcast %c0_i32_156 : i32 to vector<1x256xi32>
    %423 = arith.addi %0, %422 : vector<1x256xi32>
    %c16_i32_157 = arith.constant 16 : i32
    %424 = vector.broadcast %c16_i32_157 : i32 to vector<1x256xi32>
    %425 = arith.cmpi slt, %423, %424 : vector<1x256xi32>
    %426 = arith.andi %421, %425 : vector<1x256xi1>
    %c4_i32_158 = arith.constant 4 : i32
    %427 = vector.broadcast %c4_i32_158 : i32 to vector<1x256xi32>
    %428 = arith.addi %1, %427 : vector<1x256xi32>
    %c0_i32_159 = arith.constant 0 : i32
    %429 = vector.broadcast %c0_i32_159 : i32 to vector<1x256xi32>
    %430 = arith.cmpi sge, %428, %429 : vector<1x256xi32>
    %431 = arith.andi %426, %430 : vector<1x256xi1>
    %c4_i32_160 = arith.constant 4 : i32
    %432 = vector.broadcast %c4_i32_160 : i32 to vector<1x256xi32>
    %433 = arith.addi %1, %432 : vector<1x256xi32>
    %c16_i32_161 = arith.constant 16 : i32
    %434 = vector.broadcast %c16_i32_161 : i32 to vector<1x256xi32>
    %435 = arith.cmpi slt, %433, %434 : vector<1x256xi32>
    %436 = arith.andi %431, %435 : vector<1x256xi1>
    %cst_162 = arith.constant 0.000000e+00 : f32
    %437 = vector.shape_cast %436 : vector<1x256xi1> to vector<1x256xi1>
    %438 = vector.broadcast %437 : vector<1x256xi1> to vector<2x256xi1>
    %439 = vector.broadcast %cst_162 : f32 to vector<2x256xf32>
    %440 = arith.select %438, %417, %439 : vector<2x256xi1>, vector<2x256xf32>
    %441 = vector.extract_strided_slice %274 {offsets = [0, 5], sizes = [2, 1], strides = [1, 1]} : vector<2x9xf32> to vector<2x1xf32>
    %442 = vector.broadcast %441 : vector<2x1xf32> to vector<2x256xf32>
    %443 = arith.mulf %440, %442 : vector<2x256xf32>
    %444 = arith.addf %416, %443 : vector<2x256xf32>
    %c196_i32 = arith.constant 196 : i32
    %445 = tpu.dynamic_rotate %6 by %c196_i32 dim 1 : vector<2x256xf32>, i32 -> vector<2x256xf32>
    %c4_i32_163 = arith.constant 4 : i32
    %446 = vector.broadcast %c4_i32_163 : i32 to vector<1x256xi32>
    %447 = arith.addi %0, %446 : vector<1x256xi32>
    %c0_i32_164 = arith.constant 0 : i32
    %448 = vector.broadcast %c0_i32_164 : i32 to vector<1x256xi32>
    %449 = arith.cmpi sge, %447, %448 : vector<1x256xi32>
    %c4_i32_165 = arith.constant 4 : i32
    %450 = vector.broadcast %c4_i32_165 : i32 to vector<1x256xi32>
    %451 = arith.addi %0, %450 : vector<1x256xi32>
    %c16_i32_166 = arith.constant 16 : i32
    %452 = vector.broadcast %c16_i32_166 : i32 to vector<1x256xi32>
    %453 = arith.cmpi slt, %451, %452 : vector<1x256xi32>
    %454 = arith.andi %449, %453 : vector<1x256xi1>
    %c-4_i32_167 = arith.constant -4 : i32
    %455 = vector.broadcast %c-4_i32_167 : i32 to vector<1x256xi32>
    %456 = arith.addi %1, %455 : vector<1x256xi32>
    %c0_i32_168 = arith.constant 0 : i32
    %457 = vector.broadcast %c0_i32_168 : i32 to vector<1x256xi32>
    %458 = arith.cmpi sge, %456, %457 : vector<1x256xi32>
    %459 = arith.andi %454, %458 : vector<1x256xi1>
    %c-4_i32_169 = arith.constant -4 : i32
    %460 = vector.broadcast %c-4_i32_169 : i32 to vector<1x256xi32>
    %461 = arith.addi %1, %460 : vector<1x256xi32>
    %c16_i32_170 = arith.constant 16 : i32
    %462 = vector.broadcast %c16_i32_170 : i32 to vector<1x256xi32>
    %463 = arith.cmpi slt, %461, %462 : vector<1x256xi32>
    %464 = arith.andi %459, %463 : vector<1x256xi1>
    %cst_171 = arith.constant 0.000000e+00 : f32
    %465 = vector.shape_cast %464 : vector<1x256xi1> to vector<1x256xi1>
    %466 = vector.broadcast %465 : vector<1x256xi1> to vector<2x256xi1>
    %467 = vector.broadcast %cst_171 : f32 to vector<2x256xf32>
    %468 = arith.select %466, %445, %467 : vector<2x256xi1>, vector<2x256xf32>
    %469 = vector.extract_strided_slice %274 {offsets = [0, 6], sizes = [2, 1], strides = [1, 1]} : vector<2x9xf32> to vector<2x1xf32>
    %470 = vector.broadcast %469 : vector<2x1xf32> to vector<2x256xf32>
    %471 = arith.mulf %468, %470 : vector<2x256xf32>
    %472 = arith.addf %444, %471 : vector<2x256xf32>
    %c192_i32 = arith.constant 192 : i32
    %473 = tpu.dynamic_rotate %6 by %c192_i32 dim 1 : vector<2x256xf32>, i32 -> vector<2x256xf32>
    %c4_i32_172 = arith.constant 4 : i32
    %474 = vector.broadcast %c4_i32_172 : i32 to vector<1x256xi32>
    %475 = arith.addi %0, %474 : vector<1x256xi32>
    %c0_i32_173 = arith.constant 0 : i32
    %476 = vector.broadcast %c0_i32_173 : i32 to vector<1x256xi32>
    %477 = arith.cmpi sge, %475, %476 : vector<1x256xi32>
    %c4_i32_174 = arith.constant 4 : i32
    %478 = vector.broadcast %c4_i32_174 : i32 to vector<1x256xi32>
    %479 = arith.addi %0, %478 : vector<1x256xi32>
    %c16_i32_175 = arith.constant 16 : i32
    %480 = vector.broadcast %c16_i32_175 : i32 to vector<1x256xi32>
    %481 = arith.cmpi slt, %479, %480 : vector<1x256xi32>
    %482 = arith.andi %477, %481 : vector<1x256xi1>
    %c0_i32_176 = arith.constant 0 : i32
    %483 = vector.broadcast %c0_i32_176 : i32 to vector<1x256xi32>
    %484 = arith.addi %1, %483 : vector<1x256xi32>
    %c0_i32_177 = arith.constant 0 : i32
    %485 = vector.broadcast %c0_i32_177 : i32 to vector<1x256xi32>
    %486 = arith.cmpi sge, %484, %485 : vector<1x256xi32>
    %487 = arith.andi %482, %486 : vector<1x256xi1>
    %c0_i32_178 = arith.constant 0 : i32
    %488 = vector.broadcast %c0_i32_178 : i32 to vector<1x256xi32>
    %489 = arith.addi %1, %488 : vector<1x256xi32>
    %c16_i32_179 = arith.constant 16 : i32
    %490 = vector.broadcast %c16_i32_179 : i32 to vector<1x256xi32>
    %491 = arith.cmpi slt, %489, %490 : vector<1x256xi32>
    %492 = arith.andi %487, %491 : vector<1x256xi1>
    %cst_180 = arith.constant 0.000000e+00 : f32
    %493 = vector.shape_cast %492 : vector<1x256xi1> to vector<1x256xi1>
    %494 = vector.broadcast %493 : vector<1x256xi1> to vector<2x256xi1>
    %495 = vector.broadcast %cst_180 : f32 to vector<2x256xf32>
    %496 = arith.select %494, %473, %495 : vector<2x256xi1>, vector<2x256xf32>
    %497 = vector.extract_strided_slice %274 {offsets = [0, 7], sizes = [2, 1], strides = [1, 1]} : vector<2x9xf32> to vector<2x1xf32>
    %498 = vector.broadcast %497 : vector<2x1xf32> to vector<2x256xf32>
    %499 = arith.mulf %496, %498 : vector<2x256xf32>
    %500 = arith.addf %472, %499 : vector<2x256xf32>
    %c188_i32 = arith.constant 188 : i32
    %501 = tpu.dynamic_rotate %6 by %c188_i32 dim 1 : vector<2x256xf32>, i32 -> vector<2x256xf32>
    %c4_i32_181 = arith.constant 4 : i32
    %502 = vector.broadcast %c4_i32_181 : i32 to vector<1x256xi32>
    %503 = arith.addi %0, %502 : vector<1x256xi32>
    %c0_i32_182 = arith.constant 0 : i32
    %504 = vector.broadcast %c0_i32_182 : i32 to vector<1x256xi32>
    %505 = arith.cmpi sge, %503, %504 : vector<1x256xi32>
    %c4_i32_183 = arith.constant 4 : i32
    %506 = vector.broadcast %c4_i32_183 : i32 to vector<1x256xi32>
    %507 = arith.addi %0, %506 : vector<1x256xi32>
    %c16_i32_184 = arith.constant 16 : i32
    %508 = vector.broadcast %c16_i32_184 : i32 to vector<1x256xi32>
    %509 = arith.cmpi slt, %507, %508 : vector<1x256xi32>
    %510 = arith.andi %505, %509 : vector<1x256xi1>
    %c4_i32_185 = arith.constant 4 : i32
    %511 = vector.broadcast %c4_i32_185 : i32 to vector<1x256xi32>
    %512 = arith.addi %1, %511 : vector<1x256xi32>
    %c0_i32_186 = arith.constant 0 : i32
    %513 = vector.broadcast %c0_i32_186 : i32 to vector<1x256xi32>
    %514 = arith.cmpi sge, %512, %513 : vector<1x256xi32>
    %515 = arith.andi %510, %514 : vector<1x256xi1>
    %c4_i32_187 = arith.constant 4 : i32
    %516 = vector.broadcast %c4_i32_187 : i32 to vector<1x256xi32>
    %517 = arith.addi %1, %516 : vector<1x256xi32>
    %c16_i32_188 = arith.constant 16 : i32
    %518 = vector.broadcast %c16_i32_188 : i32 to vector<1x256xi32>
    %519 = arith.cmpi slt, %517, %518 : vector<1x256xi32>
    %520 = arith.andi %515, %519 : vector<1x256xi1>
    %cst_189 = arith.constant 0.000000e+00 : f32
    %521 = vector.shape_cast %520 : vector<1x256xi1> to vector<1x256xi1>
    %522 = vector.broadcast %521 : vector<1x256xi1> to vector<2x256xi1>
    %523 = vector.broadcast %cst_189 : f32 to vector<2x256xf32>
    %524 = arith.select %522, %501, %523 : vector<2x256xi1>, vector<2x256xf32>
    %525 = vector.extract_strided_slice %274 {offsets = [0, 8], sizes = [2, 1], strides = [1, 1]} : vector<2x9xf32> to vector<2x1xf32>
    %526 = vector.broadcast %525 : vector<2x1xf32> to vector<2x256xf32>
    %527 = arith.mulf %524, %526 : vector<2x256xf32>
    %528 = arith.addf %500, %527 : vector<2x256xf32>
    %529 = vector.broadcast %276 : vector<2x1xf32> to vector<2x256xf32>
    %530 = arith.addf %528, %529 : vector<2x256xf32>
    %c1_190 = arith.constant 1 : index
    %c0_191 = arith.constant 0 : index
    %c0_192 = arith.constant 0 : index
    %531 = vector.load %arg10[%c1_190, %c0_191, %c0_192] : memref<4x8x2xbf16, #tpu.memory_space<vmem>>, vector<1x8x2xbf16>
    %532 = vector.shape_cast %531 : vector<1x8x2xbf16> to vector<8x2xbf16>
    %533 = arith.truncf %530 : vector<2x256xf32> to vector<2x256xbf16>
    %cst_193 = arith.constant dense<0.000000e+00> : vector<8x256xf32>
    %534 = tpu.matmul %532, %533, %cst_193 {dimension_numbers = #tpu.dot_dimension_numbers<[1], [0], [0], [1], [0, 0, 1, 1], [], []>} : vector<8x2xbf16>, vector<2x256xbf16>, vector<8x256xf32> -> vector<8x256xf32>
    %535 = arith.addf %272, %534 : vector<8x256xf32>
    %c2 = arith.constant 2 : index
    %c0_194 = arith.constant 0 : index
    %c0_195 = arith.constant 0 : index
    %536 = vector.load %arg8[%c2, %c0_194, %c0_195] : memref<4x2x9xf32, #tpu.memory_space<vmem>>, vector<1x2x9xf32>
    %537 = vector.shape_cast %536 : vector<1x2x9xf32> to vector<2x9xf32>
    %c2_196 = arith.constant 2 : index
    %c0_197 = arith.constant 0 : index
    %c0_198 = arith.constant 0 : index
    %538 = vector.load %arg9[%c2_196, %c0_197, %c0_198] : memref<4x2x1xf32, #tpu.memory_space<vmem>>, vector<1x2x1xf32>
    %539 = vector.shape_cast %538 : vector<1x2x1xf32> to vector<2x1xf32>
    %cst_199 = arith.constant 0.000000e+00 : f32
    %540 = vector.broadcast %cst_199 : f32 to vector<2x256xf32>
    %c136_i32 = arith.constant 136 : i32
    %541 = tpu.dynamic_rotate %8 by %c136_i32 dim 1 : vector<2x256xf32>, i32 -> vector<2x256xf32>
    %c-8_i32 = arith.constant -8 : i32
    %542 = vector.broadcast %c-8_i32 : i32 to vector<1x256xi32>
    %543 = arith.addi %0, %542 : vector<1x256xi32>
    %c0_i32_200 = arith.constant 0 : i32
    %544 = vector.broadcast %c0_i32_200 : i32 to vector<1x256xi32>
    %545 = arith.cmpi sge, %543, %544 : vector<1x256xi32>
    %c-8_i32_201 = arith.constant -8 : i32
    %546 = vector.broadcast %c-8_i32_201 : i32 to vector<1x256xi32>
    %547 = arith.addi %0, %546 : vector<1x256xi32>
    %c16_i32_202 = arith.constant 16 : i32
    %548 = vector.broadcast %c16_i32_202 : i32 to vector<1x256xi32>
    %549 = arith.cmpi slt, %547, %548 : vector<1x256xi32>
    %550 = arith.andi %545, %549 : vector<1x256xi1>
    %c-8_i32_203 = arith.constant -8 : i32
    %551 = vector.broadcast %c-8_i32_203 : i32 to vector<1x256xi32>
    %552 = arith.addi %1, %551 : vector<1x256xi32>
    %c0_i32_204 = arith.constant 0 : i32
    %553 = vector.broadcast %c0_i32_204 : i32 to vector<1x256xi32>
    %554 = arith.cmpi sge, %552, %553 : vector<1x256xi32>
    %555 = arith.andi %550, %554 : vector<1x256xi1>
    %c-8_i32_205 = arith.constant -8 : i32
    %556 = vector.broadcast %c-8_i32_205 : i32 to vector<1x256xi32>
    %557 = arith.addi %1, %556 : vector<1x256xi32>
    %c16_i32_206 = arith.constant 16 : i32
    %558 = vector.broadcast %c16_i32_206 : i32 to vector<1x256xi32>
    %559 = arith.cmpi slt, %557, %558 : vector<1x256xi32>
    %560 = arith.andi %555, %559 : vector<1x256xi1>
    %cst_207 = arith.constant 0.000000e+00 : f32
    %561 = vector.shape_cast %560 : vector<1x256xi1> to vector<1x256xi1>
    %562 = vector.broadcast %561 : vector<1x256xi1> to vector<2x256xi1>
    %563 = vector.broadcast %cst_207 : f32 to vector<2x256xf32>
    %564 = arith.select %562, %541, %563 : vector<2x256xi1>, vector<2x256xf32>
    %565 = vector.extract_strided_slice %537 {offsets = [0, 0], sizes = [2, 1], strides = [1, 1]} : vector<2x9xf32> to vector<2x1xf32>
    %566 = vector.broadcast %565 : vector<2x1xf32> to vector<2x256xf32>
    %567 = arith.mulf %564, %566 : vector<2x256xf32>
    %568 = arith.addf %540, %567 : vector<2x256xf32>
    %c128_i32 = arith.constant 128 : i32
    %569 = tpu.dynamic_rotate %8 by %c128_i32 dim 1 : vector<2x256xf32>, i32 -> vector<2x256xf32>
    %c-8_i32_208 = arith.constant -8 : i32
    %570 = vector.broadcast %c-8_i32_208 : i32 to vector<1x256xi32>
    %571 = arith.addi %0, %570 : vector<1x256xi32>
    %c0_i32_209 = arith.constant 0 : i32
    %572 = vector.broadcast %c0_i32_209 : i32 to vector<1x256xi32>
    %573 = arith.cmpi sge, %571, %572 : vector<1x256xi32>
    %c-8_i32_210 = arith.constant -8 : i32
    %574 = vector.broadcast %c-8_i32_210 : i32 to vector<1x256xi32>
    %575 = arith.addi %0, %574 : vector<1x256xi32>
    %c16_i32_211 = arith.constant 16 : i32
    %576 = vector.broadcast %c16_i32_211 : i32 to vector<1x256xi32>
    %577 = arith.cmpi slt, %575, %576 : vector<1x256xi32>
    %578 = arith.andi %573, %577 : vector<1x256xi1>
    %c0_i32_212 = arith.constant 0 : i32
    %579 = vector.broadcast %c0_i32_212 : i32 to vector<1x256xi32>
    %580 = arith.addi %1, %579 : vector<1x256xi32>
    %c0_i32_213 = arith.constant 0 : i32
    %581 = vector.broadcast %c0_i32_213 : i32 to vector<1x256xi32>
    %582 = arith.cmpi sge, %580, %581 : vector<1x256xi32>
    %583 = arith.andi %578, %582 : vector<1x256xi1>
    %c0_i32_214 = arith.constant 0 : i32
    %584 = vector.broadcast %c0_i32_214 : i32 to vector<1x256xi32>
    %585 = arith.addi %1, %584 : vector<1x256xi32>
    %c16_i32_215 = arith.constant 16 : i32
    %586 = vector.broadcast %c16_i32_215 : i32 to vector<1x256xi32>
    %587 = arith.cmpi slt, %585, %586 : vector<1x256xi32>
    %588 = arith.andi %583, %587 : vector<1x256xi1>
    %cst_216 = arith.constant 0.000000e+00 : f32
    %589 = vector.shape_cast %588 : vector<1x256xi1> to vector<1x256xi1>
    %590 = vector.broadcast %589 : vector<1x256xi1> to vector<2x256xi1>
    %591 = vector.broadcast %cst_216 : f32 to vector<2x256xf32>
    %592 = arith.select %590, %569, %591 : vector<2x256xi1>, vector<2x256xf32>
    %593 = vector.extract_strided_slice %537 {offsets = [0, 1], sizes = [2, 1], strides = [1, 1]} : vector<2x9xf32> to vector<2x1xf32>
    %594 = vector.broadcast %593 : vector<2x1xf32> to vector<2x256xf32>
    %595 = arith.mulf %592, %594 : vector<2x256xf32>
    %596 = arith.addf %568, %595 : vector<2x256xf32>
    %c120_i32 = arith.constant 120 : i32
    %597 = tpu.dynamic_rotate %8 by %c120_i32 dim 1 : vector<2x256xf32>, i32 -> vector<2x256xf32>
    %c-8_i32_217 = arith.constant -8 : i32
    %598 = vector.broadcast %c-8_i32_217 : i32 to vector<1x256xi32>
    %599 = arith.addi %0, %598 : vector<1x256xi32>
    %c0_i32_218 = arith.constant 0 : i32
    %600 = vector.broadcast %c0_i32_218 : i32 to vector<1x256xi32>
    %601 = arith.cmpi sge, %599, %600 : vector<1x256xi32>
    %c-8_i32_219 = arith.constant -8 : i32
    %602 = vector.broadcast %c-8_i32_219 : i32 to vector<1x256xi32>
    %603 = arith.addi %0, %602 : vector<1x256xi32>
    %c16_i32_220 = arith.constant 16 : i32
    %604 = vector.broadcast %c16_i32_220 : i32 to vector<1x256xi32>
    %605 = arith.cmpi slt, %603, %604 : vector<1x256xi32>
    %606 = arith.andi %601, %605 : vector<1x256xi1>
    %c8_i32 = arith.constant 8 : i32
    %607 = vector.broadcast %c8_i32 : i32 to vector<1x256xi32>
    %608 = arith.addi %1, %607 : vector<1x256xi32>
    %c0_i32_221 = arith.constant 0 : i32
    %609 = vector.broadcast %c0_i32_221 : i32 to vector<1x256xi32>
    %610 = arith.cmpi sge, %608, %609 : vector<1x256xi32>
    %611 = arith.andi %606, %610 : vector<1x256xi1>
    %c8_i32_222 = arith.constant 8 : i32
    %612 = vector.broadcast %c8_i32_222 : i32 to vector<1x256xi32>
    %613 = arith.addi %1, %612 : vector<1x256xi32>
    %c16_i32_223 = arith.constant 16 : i32
    %614 = vector.broadcast %c16_i32_223 : i32 to vector<1x256xi32>
    %615 = arith.cmpi slt, %613, %614 : vector<1x256xi32>
    %616 = arith.andi %611, %615 : vector<1x256xi1>
    %cst_224 = arith.constant 0.000000e+00 : f32
    %617 = vector.shape_cast %616 : vector<1x256xi1> to vector<1x256xi1>
    %618 = vector.broadcast %617 : vector<1x256xi1> to vector<2x256xi1>
    %619 = vector.broadcast %cst_224 : f32 to vector<2x256xf32>
    %620 = arith.select %618, %597, %619 : vector<2x256xi1>, vector<2x256xf32>
    %621 = vector.extract_strided_slice %537 {offsets = [0, 2], sizes = [2, 1], strides = [1, 1]} : vector<2x9xf32> to vector<2x1xf32>
    %622 = vector.broadcast %621 : vector<2x1xf32> to vector<2x256xf32>
    %623 = arith.mulf %620, %622 : vector<2x256xf32>
    %624 = arith.addf %596, %623 : vector<2x256xf32>
    %c8_i32_225 = arith.constant 8 : i32
    %625 = tpu.dynamic_rotate %8 by %c8_i32_225 dim 1 : vector<2x256xf32>, i32 -> vector<2x256xf32>
    %c0_i32_226 = arith.constant 0 : i32
    %626 = vector.broadcast %c0_i32_226 : i32 to vector<1x256xi32>
    %627 = arith.addi %0, %626 : vector<1x256xi32>
    %c0_i32_227 = arith.constant 0 : i32
    %628 = vector.broadcast %c0_i32_227 : i32 to vector<1x256xi32>
    %629 = arith.cmpi sge, %627, %628 : vector<1x256xi32>
    %c0_i32_228 = arith.constant 0 : i32
    %630 = vector.broadcast %c0_i32_228 : i32 to vector<1x256xi32>
    %631 = arith.addi %0, %630 : vector<1x256xi32>
    %c16_i32_229 = arith.constant 16 : i32
    %632 = vector.broadcast %c16_i32_229 : i32 to vector<1x256xi32>
    %633 = arith.cmpi slt, %631, %632 : vector<1x256xi32>
    %634 = arith.andi %629, %633 : vector<1x256xi1>
    %c-8_i32_230 = arith.constant -8 : i32
    %635 = vector.broadcast %c-8_i32_230 : i32 to vector<1x256xi32>
    %636 = arith.addi %1, %635 : vector<1x256xi32>
    %c0_i32_231 = arith.constant 0 : i32
    %637 = vector.broadcast %c0_i32_231 : i32 to vector<1x256xi32>
    %638 = arith.cmpi sge, %636, %637 : vector<1x256xi32>
    %639 = arith.andi %634, %638 : vector<1x256xi1>
    %c-8_i32_232 = arith.constant -8 : i32
    %640 = vector.broadcast %c-8_i32_232 : i32 to vector<1x256xi32>
    %641 = arith.addi %1, %640 : vector<1x256xi32>
    %c16_i32_233 = arith.constant 16 : i32
    %642 = vector.broadcast %c16_i32_233 : i32 to vector<1x256xi32>
    %643 = arith.cmpi slt, %641, %642 : vector<1x256xi32>
    %644 = arith.andi %639, %643 : vector<1x256xi1>
    %cst_234 = arith.constant 0.000000e+00 : f32
    %645 = vector.shape_cast %644 : vector<1x256xi1> to vector<1x256xi1>
    %646 = vector.broadcast %645 : vector<1x256xi1> to vector<2x256xi1>
    %647 = vector.broadcast %cst_234 : f32 to vector<2x256xf32>
    %648 = arith.select %646, %625, %647 : vector<2x256xi1>, vector<2x256xf32>
    %649 = vector.extract_strided_slice %537 {offsets = [0, 3], sizes = [2, 1], strides = [1, 1]} : vector<2x9xf32> to vector<2x1xf32>
    %650 = vector.broadcast %649 : vector<2x1xf32> to vector<2x256xf32>
    %651 = arith.mulf %648, %650 : vector<2x256xf32>
    %652 = arith.addf %624, %651 : vector<2x256xf32>
    %c0_i32_235 = arith.constant 0 : i32
    %653 = vector.broadcast %c0_i32_235 : i32 to vector<1x256xi32>
    %654 = arith.addi %0, %653 : vector<1x256xi32>
    %c0_i32_236 = arith.constant 0 : i32
    %655 = vector.broadcast %c0_i32_236 : i32 to vector<1x256xi32>
    %656 = arith.cmpi sge, %654, %655 : vector<1x256xi32>
    %c0_i32_237 = arith.constant 0 : i32
    %657 = vector.broadcast %c0_i32_237 : i32 to vector<1x256xi32>
    %658 = arith.addi %0, %657 : vector<1x256xi32>
    %c16_i32_238 = arith.constant 16 : i32
    %659 = vector.broadcast %c16_i32_238 : i32 to vector<1x256xi32>
    %660 = arith.cmpi slt, %658, %659 : vector<1x256xi32>
    %661 = arith.andi %656, %660 : vector<1x256xi1>
    %c0_i32_239 = arith.constant 0 : i32
    %662 = vector.broadcast %c0_i32_239 : i32 to vector<1x256xi32>
    %663 = arith.addi %1, %662 : vector<1x256xi32>
    %c0_i32_240 = arith.constant 0 : i32
    %664 = vector.broadcast %c0_i32_240 : i32 to vector<1x256xi32>
    %665 = arith.cmpi sge, %663, %664 : vector<1x256xi32>
    %666 = arith.andi %661, %665 : vector<1x256xi1>
    %c0_i32_241 = arith.constant 0 : i32
    %667 = vector.broadcast %c0_i32_241 : i32 to vector<1x256xi32>
    %668 = arith.addi %1, %667 : vector<1x256xi32>
    %c16_i32_242 = arith.constant 16 : i32
    %669 = vector.broadcast %c16_i32_242 : i32 to vector<1x256xi32>
    %670 = arith.cmpi slt, %668, %669 : vector<1x256xi32>
    %671 = arith.andi %666, %670 : vector<1x256xi1>
    %cst_243 = arith.constant 0.000000e+00 : f32
    %672 = vector.shape_cast %671 : vector<1x256xi1> to vector<1x256xi1>
    %673 = vector.broadcast %672 : vector<1x256xi1> to vector<2x256xi1>
    %674 = vector.broadcast %cst_243 : f32 to vector<2x256xf32>
    %675 = arith.select %673, %8, %674 : vector<2x256xi1>, vector<2x256xf32>
    %676 = vector.extract_strided_slice %537 {offsets = [0, 4], sizes = [2, 1], strides = [1, 1]} : vector<2x9xf32> to vector<2x1xf32>
    %677 = vector.broadcast %676 : vector<2x1xf32> to vector<2x256xf32>
    %678 = arith.mulf %675, %677 : vector<2x256xf32>
    %679 = arith.addf %652, %678 : vector<2x256xf32>
    %c248_i32 = arith.constant 248 : i32
    %680 = tpu.dynamic_rotate %8 by %c248_i32 dim 1 : vector<2x256xf32>, i32 -> vector<2x256xf32>
    %c0_i32_244 = arith.constant 0 : i32
    %681 = vector.broadcast %c0_i32_244 : i32 to vector<1x256xi32>
    %682 = arith.addi %0, %681 : vector<1x256xi32>
    %c0_i32_245 = arith.constant 0 : i32
    %683 = vector.broadcast %c0_i32_245 : i32 to vector<1x256xi32>
    %684 = arith.cmpi sge, %682, %683 : vector<1x256xi32>
    %c0_i32_246 = arith.constant 0 : i32
    %685 = vector.broadcast %c0_i32_246 : i32 to vector<1x256xi32>
    %686 = arith.addi %0, %685 : vector<1x256xi32>
    %c16_i32_247 = arith.constant 16 : i32
    %687 = vector.broadcast %c16_i32_247 : i32 to vector<1x256xi32>
    %688 = arith.cmpi slt, %686, %687 : vector<1x256xi32>
    %689 = arith.andi %684, %688 : vector<1x256xi1>
    %c8_i32_248 = arith.constant 8 : i32
    %690 = vector.broadcast %c8_i32_248 : i32 to vector<1x256xi32>
    %691 = arith.addi %1, %690 : vector<1x256xi32>
    %c0_i32_249 = arith.constant 0 : i32
    %692 = vector.broadcast %c0_i32_249 : i32 to vector<1x256xi32>
    %693 = arith.cmpi sge, %691, %692 : vector<1x256xi32>
    %694 = arith.andi %689, %693 : vector<1x256xi1>
    %c8_i32_250 = arith.constant 8 : i32
    %695 = vector.broadcast %c8_i32_250 : i32 to vector<1x256xi32>
    %696 = arith.addi %1, %695 : vector<1x256xi32>
    %c16_i32_251 = arith.constant 16 : i32
    %697 = vector.broadcast %c16_i32_251 : i32 to vector<1x256xi32>
    %698 = arith.cmpi slt, %696, %697 : vector<1x256xi32>
    %699 = arith.andi %694, %698 : vector<1x256xi1>
    %cst_252 = arith.constant 0.000000e+00 : f32
    %700 = vector.shape_cast %699 : vector<1x256xi1> to vector<1x256xi1>
    %701 = vector.broadcast %700 : vector<1x256xi1> to vector<2x256xi1>
    %702 = vector.broadcast %cst_252 : f32 to vector<2x256xf32>
    %703 = arith.select %701, %680, %702 : vector<2x256xi1>, vector<2x256xf32>
    %704 = vector.extract_strided_slice %537 {offsets = [0, 5], sizes = [2, 1], strides = [1, 1]} : vector<2x9xf32> to vector<2x1xf32>
    %705 = vector.broadcast %704 : vector<2x1xf32> to vector<2x256xf32>
    %706 = arith.mulf %703, %705 : vector<2x256xf32>
    %707 = arith.addf %679, %706 : vector<2x256xf32>
    %c136_i32_253 = arith.constant 136 : i32
    %708 = tpu.dynamic_rotate %8 by %c136_i32_253 dim 1 : vector<2x256xf32>, i32 -> vector<2x256xf32>
    %c8_i32_254 = arith.constant 8 : i32
    %709 = vector.broadcast %c8_i32_254 : i32 to vector<1x256xi32>
    %710 = arith.addi %0, %709 : vector<1x256xi32>
    %c0_i32_255 = arith.constant 0 : i32
    %711 = vector.broadcast %c0_i32_255 : i32 to vector<1x256xi32>
    %712 = arith.cmpi sge, %710, %711 : vector<1x256xi32>
    %c8_i32_256 = arith.constant 8 : i32
    %713 = vector.broadcast %c8_i32_256 : i32 to vector<1x256xi32>
    %714 = arith.addi %0, %713 : vector<1x256xi32>
    %c16_i32_257 = arith.constant 16 : i32
    %715 = vector.broadcast %c16_i32_257 : i32 to vector<1x256xi32>
    %716 = arith.cmpi slt, %714, %715 : vector<1x256xi32>
    %717 = arith.andi %712, %716 : vector<1x256xi1>
    %c-8_i32_258 = arith.constant -8 : i32
    %718 = vector.broadcast %c-8_i32_258 : i32 to vector<1x256xi32>
    %719 = arith.addi %1, %718 : vector<1x256xi32>
    %c0_i32_259 = arith.constant 0 : i32
    %720 = vector.broadcast %c0_i32_259 : i32 to vector<1x256xi32>
    %721 = arith.cmpi sge, %719, %720 : vector<1x256xi32>
    %722 = arith.andi %717, %721 : vector<1x256xi1>
    %c-8_i32_260 = arith.constant -8 : i32
    %723 = vector.broadcast %c-8_i32_260 : i32 to vector<1x256xi32>
    %724 = arith.addi %1, %723 : vector<1x256xi32>
    %c16_i32_261 = arith.constant 16 : i32
    %725 = vector.broadcast %c16_i32_261 : i32 to vector<1x256xi32>
    %726 = arith.cmpi slt, %724, %725 : vector<1x256xi32>
    %727 = arith.andi %722, %726 : vector<1x256xi1>
    %cst_262 = arith.constant 0.000000e+00 : f32
    %728 = vector.shape_cast %727 : vector<1x256xi1> to vector<1x256xi1>
    %729 = vector.broadcast %728 : vector<1x256xi1> to vector<2x256xi1>
    %730 = vector.broadcast %cst_262 : f32 to vector<2x256xf32>
    %731 = arith.select %729, %708, %730 : vector<2x256xi1>, vector<2x256xf32>
    %732 = vector.extract_strided_slice %537 {offsets = [0, 6], sizes = [2, 1], strides = [1, 1]} : vector<2x9xf32> to vector<2x1xf32>
    %733 = vector.broadcast %732 : vector<2x1xf32> to vector<2x256xf32>
    %734 = arith.mulf %731, %733 : vector<2x256xf32>
    %735 = arith.addf %707, %734 : vector<2x256xf32>
    %c128_i32_263 = arith.constant 128 : i32
    %736 = tpu.dynamic_rotate %8 by %c128_i32_263 dim 1 : vector<2x256xf32>, i32 -> vector<2x256xf32>
    %c8_i32_264 = arith.constant 8 : i32
    %737 = vector.broadcast %c8_i32_264 : i32 to vector<1x256xi32>
    %738 = arith.addi %0, %737 : vector<1x256xi32>
    %c0_i32_265 = arith.constant 0 : i32
    %739 = vector.broadcast %c0_i32_265 : i32 to vector<1x256xi32>
    %740 = arith.cmpi sge, %738, %739 : vector<1x256xi32>
    %c8_i32_266 = arith.constant 8 : i32
    %741 = vector.broadcast %c8_i32_266 : i32 to vector<1x256xi32>
    %742 = arith.addi %0, %741 : vector<1x256xi32>
    %c16_i32_267 = arith.constant 16 : i32
    %743 = vector.broadcast %c16_i32_267 : i32 to vector<1x256xi32>
    %744 = arith.cmpi slt, %742, %743 : vector<1x256xi32>
    %745 = arith.andi %740, %744 : vector<1x256xi1>
    %c0_i32_268 = arith.constant 0 : i32
    %746 = vector.broadcast %c0_i32_268 : i32 to vector<1x256xi32>
    %747 = arith.addi %1, %746 : vector<1x256xi32>
    %c0_i32_269 = arith.constant 0 : i32
    %748 = vector.broadcast %c0_i32_269 : i32 to vector<1x256xi32>
    %749 = arith.cmpi sge, %747, %748 : vector<1x256xi32>
    %750 = arith.andi %745, %749 : vector<1x256xi1>
    %c0_i32_270 = arith.constant 0 : i32
    %751 = vector.broadcast %c0_i32_270 : i32 to vector<1x256xi32>
    %752 = arith.addi %1, %751 : vector<1x256xi32>
    %c16_i32_271 = arith.constant 16 : i32
    %753 = vector.broadcast %c16_i32_271 : i32 to vector<1x256xi32>
    %754 = arith.cmpi slt, %752, %753 : vector<1x256xi32>
    %755 = arith.andi %750, %754 : vector<1x256xi1>
    %cst_272 = arith.constant 0.000000e+00 : f32
    %756 = vector.shape_cast %755 : vector<1x256xi1> to vector<1x256xi1>
    %757 = vector.broadcast %756 : vector<1x256xi1> to vector<2x256xi1>
    %758 = vector.broadcast %cst_272 : f32 to vector<2x256xf32>
    %759 = arith.select %757, %736, %758 : vector<2x256xi1>, vector<2x256xf32>
    %760 = vector.extract_strided_slice %537 {offsets = [0, 7], sizes = [2, 1], strides = [1, 1]} : vector<2x9xf32> to vector<2x1xf32>
    %761 = vector.broadcast %760 : vector<2x1xf32> to vector<2x256xf32>
    %762 = arith.mulf %759, %761 : vector<2x256xf32>
    %763 = arith.addf %735, %762 : vector<2x256xf32>
    %c120_i32_273 = arith.constant 120 : i32
    %764 = tpu.dynamic_rotate %8 by %c120_i32_273 dim 1 : vector<2x256xf32>, i32 -> vector<2x256xf32>
    %c8_i32_274 = arith.constant 8 : i32
    %765 = vector.broadcast %c8_i32_274 : i32 to vector<1x256xi32>
    %766 = arith.addi %0, %765 : vector<1x256xi32>
    %c0_i32_275 = arith.constant 0 : i32
    %767 = vector.broadcast %c0_i32_275 : i32 to vector<1x256xi32>
    %768 = arith.cmpi sge, %766, %767 : vector<1x256xi32>
    %c8_i32_276 = arith.constant 8 : i32
    %769 = vector.broadcast %c8_i32_276 : i32 to vector<1x256xi32>
    %770 = arith.addi %0, %769 : vector<1x256xi32>
    %c16_i32_277 = arith.constant 16 : i32
    %771 = vector.broadcast %c16_i32_277 : i32 to vector<1x256xi32>
    %772 = arith.cmpi slt, %770, %771 : vector<1x256xi32>
    %773 = arith.andi %768, %772 : vector<1x256xi1>
    %c8_i32_278 = arith.constant 8 : i32
    %774 = vector.broadcast %c8_i32_278 : i32 to vector<1x256xi32>
    %775 = arith.addi %1, %774 : vector<1x256xi32>
    %c0_i32_279 = arith.constant 0 : i32
    %776 = vector.broadcast %c0_i32_279 : i32 to vector<1x256xi32>
    %777 = arith.cmpi sge, %775, %776 : vector<1x256xi32>
    %778 = arith.andi %773, %777 : vector<1x256xi1>
    %c8_i32_280 = arith.constant 8 : i32
    %779 = vector.broadcast %c8_i32_280 : i32 to vector<1x256xi32>
    %780 = arith.addi %1, %779 : vector<1x256xi32>
    %c16_i32_281 = arith.constant 16 : i32
    %781 = vector.broadcast %c16_i32_281 : i32 to vector<1x256xi32>
    %782 = arith.cmpi slt, %780, %781 : vector<1x256xi32>
    %783 = arith.andi %778, %782 : vector<1x256xi1>
    %cst_282 = arith.constant 0.000000e+00 : f32
    %784 = vector.shape_cast %783 : vector<1x256xi1> to vector<1x256xi1>
    %785 = vector.broadcast %784 : vector<1x256xi1> to vector<2x256xi1>
    %786 = vector.broadcast %cst_282 : f32 to vector<2x256xf32>
    %787 = arith.select %785, %764, %786 : vector<2x256xi1>, vector<2x256xf32>
    %788 = vector.extract_strided_slice %537 {offsets = [0, 8], sizes = [2, 1], strides = [1, 1]} : vector<2x9xf32> to vector<2x1xf32>
    %789 = vector.broadcast %788 : vector<2x1xf32> to vector<2x256xf32>
    %790 = arith.mulf %787, %789 : vector<2x256xf32>
    %791 = arith.addf %763, %790 : vector<2x256xf32>
    %792 = vector.broadcast %539 : vector<2x1xf32> to vector<2x256xf32>
    %793 = arith.addf %791, %792 : vector<2x256xf32>
    %c2_283 = arith.constant 2 : index
    %c0_284 = arith.constant 0 : index
    %c0_285 = arith.constant 0 : index
    %794 = vector.load %arg10[%c2_283, %c0_284, %c0_285] : memref<4x8x2xbf16, #tpu.memory_space<vmem>>, vector<1x8x2xbf16>
    %795 = vector.shape_cast %794 : vector<1x8x2xbf16> to vector<8x2xbf16>
    %796 = arith.truncf %793 : vector<2x256xf32> to vector<2x256xbf16>
    %cst_286 = arith.constant dense<0.000000e+00> : vector<8x256xf32>
    %797 = tpu.matmul %795, %796, %cst_286 {dimension_numbers = #tpu.dot_dimension_numbers<[1], [0], [0], [1], [0, 0, 1, 1], [], []>} : vector<8x2xbf16>, vector<2x256xbf16>, vector<8x256xf32> -> vector<8x256xf32>
    %798 = arith.addf %535, %797 : vector<8x256xf32>
    %c3 = arith.constant 3 : index
    %c0_287 = arith.constant 0 : index
    %c0_288 = arith.constant 0 : index
    %799 = vector.load %arg8[%c3, %c0_287, %c0_288] : memref<4x2x9xf32, #tpu.memory_space<vmem>>, vector<1x2x9xf32>
    %800 = vector.shape_cast %799 : vector<1x2x9xf32> to vector<2x9xf32>
    %c3_289 = arith.constant 3 : index
    %c0_290 = arith.constant 0 : index
    %c0_291 = arith.constant 0 : index
    %801 = vector.load %arg9[%c3_289, %c0_290, %c0_291] : memref<4x2x1xf32, #tpu.memory_space<vmem>>, vector<1x2x1xf32>
    %802 = vector.shape_cast %801 : vector<1x2x1xf32> to vector<2x1xf32>
    %cst_292 = arith.constant 0.000000e+00 : f32
    %803 = vector.broadcast %cst_292 : f32 to vector<2x256xf32>
    %c0_i32_293 = arith.constant 0 : i32
    %804 = vector.broadcast %c0_i32_293 : i32 to vector<1x256xi32>
    %805 = arith.addi %0, %804 : vector<1x256xi32>
    %c0_i32_294 = arith.constant 0 : i32
    %806 = vector.broadcast %c0_i32_294 : i32 to vector<1x256xi32>
    %807 = arith.cmpi sge, %805, %806 : vector<1x256xi32>
    %c0_i32_295 = arith.constant 0 : i32
    %808 = vector.broadcast %c0_i32_295 : i32 to vector<1x256xi32>
    %809 = arith.addi %0, %808 : vector<1x256xi32>
    %c16_i32_296 = arith.constant 16 : i32
    %810 = vector.broadcast %c16_i32_296 : i32 to vector<1x256xi32>
    %811 = arith.cmpi slt, %809, %810 : vector<1x256xi32>
    %812 = arith.andi %807, %811 : vector<1x256xi1>
    %c0_i32_297 = arith.constant 0 : i32
    %813 = vector.broadcast %c0_i32_297 : i32 to vector<1x256xi32>
    %814 = arith.addi %1, %813 : vector<1x256xi32>
    %c0_i32_298 = arith.constant 0 : i32
    %815 = vector.broadcast %c0_i32_298 : i32 to vector<1x256xi32>
    %816 = arith.cmpi sge, %814, %815 : vector<1x256xi32>
    %817 = arith.andi %812, %816 : vector<1x256xi1>
    %c0_i32_299 = arith.constant 0 : i32
    %818 = vector.broadcast %c0_i32_299 : i32 to vector<1x256xi32>
    %819 = arith.addi %1, %818 : vector<1x256xi32>
    %c16_i32_300 = arith.constant 16 : i32
    %820 = vector.broadcast %c16_i32_300 : i32 to vector<1x256xi32>
    %821 = arith.cmpi slt, %819, %820 : vector<1x256xi32>
    %822 = arith.andi %817, %821 : vector<1x256xi1>
    %cst_301 = arith.constant 0.000000e+00 : f32
    %823 = vector.shape_cast %822 : vector<1x256xi1> to vector<1x256xi1>
    %824 = vector.broadcast %823 : vector<1x256xi1> to vector<2x256xi1>
    %825 = vector.broadcast %cst_301 : f32 to vector<2x256xf32>
    %826 = arith.select %824, %10, %825 : vector<2x256xi1>, vector<2x256xf32>
    %827 = vector.extract_strided_slice %800 {offsets = [0, 4], sizes = [2, 1], strides = [1, 1]} : vector<2x9xf32> to vector<2x1xf32>
    %828 = vector.broadcast %827 : vector<2x1xf32> to vector<2x256xf32>
    %829 = arith.mulf %826, %828 : vector<2x256xf32>
    %830 = arith.addf %803, %829 : vector<2x256xf32>
    %831 = vector.broadcast %802 : vector<2x1xf32> to vector<2x256xf32>
    %832 = arith.addf %830, %831 : vector<2x256xf32>
    %c3_302 = arith.constant 3 : index
    %c0_303 = arith.constant 0 : index
    %c0_304 = arith.constant 0 : index
    %833 = vector.load %arg10[%c3_302, %c0_303, %c0_304] : memref<4x8x2xbf16, #tpu.memory_space<vmem>>, vector<1x8x2xbf16>
    %834 = vector.shape_cast %833 : vector<1x8x2xbf16> to vector<8x2xbf16>
    %835 = arith.truncf %832 : vector<2x256xf32> to vector<2x256xbf16>
    %cst_305 = arith.constant dense<0.000000e+00> : vector<8x256xf32>
    %836 = tpu.matmul %834, %835, %cst_305 {dimension_numbers = #tpu.dot_dimension_numbers<[1], [0], [0], [1], [0, 0, 1, 1], [], []>} : vector<8x2xbf16>, vector<2x256xbf16>, vector<8x256xf32> -> vector<8x256xf32>
    %837 = arith.addf %798, %836 : vector<8x256xf32>
    %c0_306 = arith.constant 0 : index
    %c0_307 = arith.constant 0 : index
    %838 = vector.load %arg11[%c0_306, %c0_307] : memref<8x1xf32, #tpu.memory_space<vmem>>, vector<8x1xf32>
    %839 = vector.broadcast %838 : vector<8x1xf32> to vector<8x256xf32>
    %840 = arith.addf %837, %839 : vector<8x256xf32>
    %cst_308 = arith.constant 5.000000e-01 : f32
    %841 = vector.broadcast %cst_308 : f32 to vector<8x256xf32>
    %842 = arith.mulf %841, %840 : vector<8x256xf32>
    %cst_309 = arith.constant 4.471500e-02 : f32
    %843 = vector.broadcast %cst_309 : f32 to vector<8x256xf32>
    %844 = arith.mulf %843, %840 : vector<8x256xf32>
    %845 = arith.mulf %844, %840 : vector<8x256xf32>
    %846 = arith.mulf %845, %840 : vector<8x256xf32>
    %847 = arith.addf %840, %846 : vector<8x256xf32>
    %cst_310 = arith.constant 0.797884583 : f32
    %848 = vector.broadcast %cst_310 : f32 to vector<8x256xf32>
    %849 = arith.mulf %848, %847 : vector<8x256xf32>
    %850 = math.tanh %849 : vector<8x256xf32>
    %cst_311 = arith.constant 1.000000e+00 : f32
    %851 = vector.broadcast %cst_311 : f32 to vector<8x256xf32>
    %852 = arith.addf %851, %850 : vector<8x256xf32>
    %853 = arith.mulf %842, %852 : vector<8x256xf32>
    %854 = arith.mulf %853, %3 : vector<8x256xf32>
    %c0_312 = arith.constant 0 : index
    %c0_313 = arith.constant 0 : index
    %c0_314 = arith.constant 0 : index
    %855 = vector.load %arg1[%c0_312, %c0_313, %c0_314] : memref<1x8x256xf32, #tpu.memory_space<vmem>>, vector<1x8x256xf32>
    %856 = vector.shape_cast %855 : vector<1x8x256xf32> to vector<8x256xf32>
    %857 = arith.addf %854, %856 : vector<8x256xf32>
    %cst_315 = arith.constant dense<0.000000e+00> : vector<256xf32>
    %858 = vector.multi_reduction <add>, %857, %cst_315 [0] : vector<8x256xf32> to vector<256xf32>
    %859 = vector.shape_cast %858 : vector<256xf32> to vector<1x256xf32>
    %cst_316 = arith.constant 8.000000e+00 : f32
    %860 = vector.broadcast %cst_316 : f32 to vector<1x256xf32>
    %861 = arith.divf %859, %860 : vector<1x256xf32>
    %862 = vector.broadcast %861 : vector<1x256xf32> to vector<8x256xf32>
    %863 = arith.subf %857, %862 : vector<8x256xf32>
    %864 = arith.mulf %863, %863 : vector<8x256xf32>
    %cst_317 = arith.constant dense<0.000000e+00> : vector<256xf32>
    %865 = vector.multi_reduction <add>, %864, %cst_317 [0] : vector<8x256xf32> to vector<256xf32>
    %866 = vector.shape_cast %865 : vector<256xf32> to vector<1x256xf32>
    %cst_318 = arith.constant 8.000000e+00 : f32
    %867 = vector.broadcast %cst_318 : f32 to vector<1x256xf32>
    %868 = arith.divf %866, %867 : vector<1x256xf32>
    %c0_319 = arith.constant 0 : index
    %c0_320 = arith.constant 0 : index
    %869 = vector.load %arg12[%c0_319, %c0_320] : memref<8x1xf32, #tpu.memory_space<vmem>>, vector<8x1xf32>
    %870 = vector.broadcast %861 : vector<1x256xf32> to vector<8x256xf32>
    %871 = arith.subf %857, %870 : vector<8x256xf32>
    %cst_321 = arith.constant 9.99999997E-7 : f32
    %872 = vector.broadcast %cst_321 : f32 to vector<1x256xf32>
    %873 = arith.addf %868, %872 : vector<1x256xf32>
    %874 = math.rsqrt %873 : vector<1x256xf32>
    %875 = vector.broadcast %874 : vector<1x256xf32> to vector<8x256xf32>
    %876 = arith.mulf %871, %875 : vector<8x256xf32>
    %877 = vector.broadcast %869 : vector<8x1xf32> to vector<8x256xf32>
    %878 = arith.mulf %877, %876 : vector<8x256xf32>
    %c0_322 = arith.constant 0 : index
    %c0_323 = arith.constant 0 : index
    %879 = vector.load %arg13[%c0_322, %c0_323] : memref<8x1xf32, #tpu.memory_space<vmem>>, vector<8x1xf32>
    %880 = vector.broadcast %879 : vector<8x1xf32> to vector<8x256xf32>
    %881 = arith.addf %878, %880 : vector<8x256xf32>
    %c0_324 = arith.constant 0 : index
    %c0_325 = arith.constant 0 : index
    %882 = vector.load %arg14[%c0_324, %c0_325] : memref<32x8xbf16, #tpu.memory_space<vmem>>, vector<32x8xbf16>
    %883 = arith.truncf %881 : vector<8x256xf32> to vector<8x256xbf16>
    %cst_326 = arith.constant dense<0.000000e+00> : vector<32x256xf32>
    %884 = tpu.matmul %882, %883, %cst_326 {dimension_numbers = #tpu.dot_dimension_numbers<[1], [0], [0], [1], [0, 0, 1, 1], [], []>} : vector<32x8xbf16>, vector<8x256xbf16>, vector<32x256xf32> -> vector<32x256xf32>
    %c0_327 = arith.constant 0 : index
    %c0_328 = arith.constant 0 : index
    %885 = vector.load %arg15[%c0_327, %c0_328] : memref<32x9xf32, #tpu.memory_space<vmem>>, vector<32x9xf32>
    %cst_329 = arith.constant 0.000000e+00 : f32
    %886 = vector.broadcast %cst_329 : f32 to vector<32x256xf32>
    %c17_i32_330 = arith.constant 17 : i32
    %887 = tpu.dynamic_rotate %884 by %c17_i32_330 dim 1 : vector<32x256xf32>, i32 -> vector<32x256xf32>
    %c-1_i32_331 = arith.constant -1 : i32
    %888 = vector.broadcast %c-1_i32_331 : i32 to vector<1x256xi32>
    %889 = arith.addi %0, %888 : vector<1x256xi32>
    %c0_i32_332 = arith.constant 0 : i32
    %890 = vector.broadcast %c0_i32_332 : i32 to vector<1x256xi32>
    %891 = arith.cmpi sge, %889, %890 : vector<1x256xi32>
    %c-1_i32_333 = arith.constant -1 : i32
    %892 = vector.broadcast %c-1_i32_333 : i32 to vector<1x256xi32>
    %893 = arith.addi %0, %892 : vector<1x256xi32>
    %c16_i32_334 = arith.constant 16 : i32
    %894 = vector.broadcast %c16_i32_334 : i32 to vector<1x256xi32>
    %895 = arith.cmpi slt, %893, %894 : vector<1x256xi32>
    %896 = arith.andi %891, %895 : vector<1x256xi1>
    %c-1_i32_335 = arith.constant -1 : i32
    %897 = vector.broadcast %c-1_i32_335 : i32 to vector<1x256xi32>
    %898 = arith.addi %1, %897 : vector<1x256xi32>
    %c0_i32_336 = arith.constant 0 : i32
    %899 = vector.broadcast %c0_i32_336 : i32 to vector<1x256xi32>
    %900 = arith.cmpi sge, %898, %899 : vector<1x256xi32>
    %901 = arith.andi %896, %900 : vector<1x256xi1>
    %c-1_i32_337 = arith.constant -1 : i32
    %902 = vector.broadcast %c-1_i32_337 : i32 to vector<1x256xi32>
    %903 = arith.addi %1, %902 : vector<1x256xi32>
    %c16_i32_338 = arith.constant 16 : i32
    %904 = vector.broadcast %c16_i32_338 : i32 to vector<1x256xi32>
    %905 = arith.cmpi slt, %903, %904 : vector<1x256xi32>
    %906 = arith.andi %901, %905 : vector<1x256xi1>
    %cst_339 = arith.constant 0.000000e+00 : f32
    %907 = vector.shape_cast %906 : vector<1x256xi1> to vector<1x256xi1>
    %908 = vector.broadcast %907 : vector<1x256xi1> to vector<32x256xi1>
    %909 = vector.broadcast %cst_339 : f32 to vector<32x256xf32>
    %910 = arith.select %908, %887, %909 : vector<32x256xi1>, vector<32x256xf32>
    %911 = vector.extract_strided_slice %885 {offsets = [0, 0], sizes = [32, 1], strides = [1, 1]} : vector<32x9xf32> to vector<32x1xf32>
    %912 = vector.broadcast %911 : vector<32x1xf32> to vector<32x256xf32>
    %913 = arith.mulf %910, %912 : vector<32x256xf32>
    %914 = arith.addf %886, %913 : vector<32x256xf32>
    %c16_i32_340 = arith.constant 16 : i32
    %915 = tpu.dynamic_rotate %884 by %c16_i32_340 dim 1 : vector<32x256xf32>, i32 -> vector<32x256xf32>
    %c-1_i32_341 = arith.constant -1 : i32
    %916 = vector.broadcast %c-1_i32_341 : i32 to vector<1x256xi32>
    %917 = arith.addi %0, %916 : vector<1x256xi32>
    %c0_i32_342 = arith.constant 0 : i32
    %918 = vector.broadcast %c0_i32_342 : i32 to vector<1x256xi32>
    %919 = arith.cmpi sge, %917, %918 : vector<1x256xi32>
    %c-1_i32_343 = arith.constant -1 : i32
    %920 = vector.broadcast %c-1_i32_343 : i32 to vector<1x256xi32>
    %921 = arith.addi %0, %920 : vector<1x256xi32>
    %c16_i32_344 = arith.constant 16 : i32
    %922 = vector.broadcast %c16_i32_344 : i32 to vector<1x256xi32>
    %923 = arith.cmpi slt, %921, %922 : vector<1x256xi32>
    %924 = arith.andi %919, %923 : vector<1x256xi1>
    %c0_i32_345 = arith.constant 0 : i32
    %925 = vector.broadcast %c0_i32_345 : i32 to vector<1x256xi32>
    %926 = arith.addi %1, %925 : vector<1x256xi32>
    %c0_i32_346 = arith.constant 0 : i32
    %927 = vector.broadcast %c0_i32_346 : i32 to vector<1x256xi32>
    %928 = arith.cmpi sge, %926, %927 : vector<1x256xi32>
    %929 = arith.andi %924, %928 : vector<1x256xi1>
    %c0_i32_347 = arith.constant 0 : i32
    %930 = vector.broadcast %c0_i32_347 : i32 to vector<1x256xi32>
    %931 = arith.addi %1, %930 : vector<1x256xi32>
    %c16_i32_348 = arith.constant 16 : i32
    %932 = vector.broadcast %c16_i32_348 : i32 to vector<1x256xi32>
    %933 = arith.cmpi slt, %931, %932 : vector<1x256xi32>
    %934 = arith.andi %929, %933 : vector<1x256xi1>
    %cst_349 = arith.constant 0.000000e+00 : f32
    %935 = vector.shape_cast %934 : vector<1x256xi1> to vector<1x256xi1>
    %936 = vector.broadcast %935 : vector<1x256xi1> to vector<32x256xi1>
    %937 = vector.broadcast %cst_349 : f32 to vector<32x256xf32>
    %938 = arith.select %936, %915, %937 : vector<32x256xi1>, vector<32x256xf32>
    %939 = vector.extract_strided_slice %885 {offsets = [0, 1], sizes = [32, 1], strides = [1, 1]} : vector<32x9xf32> to vector<32x1xf32>
    %940 = vector.broadcast %939 : vector<32x1xf32> to vector<32x256xf32>
    %941 = arith.mulf %938, %940 : vector<32x256xf32>
    %942 = arith.addf %914, %941 : vector<32x256xf32>
    %c15_i32_350 = arith.constant 15 : i32
    %943 = tpu.dynamic_rotate %884 by %c15_i32_350 dim 1 : vector<32x256xf32>, i32 -> vector<32x256xf32>
    %c-1_i32_351 = arith.constant -1 : i32
    %944 = vector.broadcast %c-1_i32_351 : i32 to vector<1x256xi32>
    %945 = arith.addi %0, %944 : vector<1x256xi32>
    %c0_i32_352 = arith.constant 0 : i32
    %946 = vector.broadcast %c0_i32_352 : i32 to vector<1x256xi32>
    %947 = arith.cmpi sge, %945, %946 : vector<1x256xi32>
    %c-1_i32_353 = arith.constant -1 : i32
    %948 = vector.broadcast %c-1_i32_353 : i32 to vector<1x256xi32>
    %949 = arith.addi %0, %948 : vector<1x256xi32>
    %c16_i32_354 = arith.constant 16 : i32
    %950 = vector.broadcast %c16_i32_354 : i32 to vector<1x256xi32>
    %951 = arith.cmpi slt, %949, %950 : vector<1x256xi32>
    %952 = arith.andi %947, %951 : vector<1x256xi1>
    %c1_i32_355 = arith.constant 1 : i32
    %953 = vector.broadcast %c1_i32_355 : i32 to vector<1x256xi32>
    %954 = arith.addi %1, %953 : vector<1x256xi32>
    %c0_i32_356 = arith.constant 0 : i32
    %955 = vector.broadcast %c0_i32_356 : i32 to vector<1x256xi32>
    %956 = arith.cmpi sge, %954, %955 : vector<1x256xi32>
    %957 = arith.andi %952, %956 : vector<1x256xi1>
    %c1_i32_357 = arith.constant 1 : i32
    %958 = vector.broadcast %c1_i32_357 : i32 to vector<1x256xi32>
    %959 = arith.addi %1, %958 : vector<1x256xi32>
    %c16_i32_358 = arith.constant 16 : i32
    %960 = vector.broadcast %c16_i32_358 : i32 to vector<1x256xi32>
    %961 = arith.cmpi slt, %959, %960 : vector<1x256xi32>
    %962 = arith.andi %957, %961 : vector<1x256xi1>
    %cst_359 = arith.constant 0.000000e+00 : f32
    %963 = vector.shape_cast %962 : vector<1x256xi1> to vector<1x256xi1>
    %964 = vector.broadcast %963 : vector<1x256xi1> to vector<32x256xi1>
    %965 = vector.broadcast %cst_359 : f32 to vector<32x256xf32>
    %966 = arith.select %964, %943, %965 : vector<32x256xi1>, vector<32x256xf32>
    %967 = vector.extract_strided_slice %885 {offsets = [0, 2], sizes = [32, 1], strides = [1, 1]} : vector<32x9xf32> to vector<32x1xf32>
    %968 = vector.broadcast %967 : vector<32x1xf32> to vector<32x256xf32>
    %969 = arith.mulf %966, %968 : vector<32x256xf32>
    %970 = arith.addf %942, %969 : vector<32x256xf32>
    %c1_i32_360 = arith.constant 1 : i32
    %971 = tpu.dynamic_rotate %884 by %c1_i32_360 dim 1 : vector<32x256xf32>, i32 -> vector<32x256xf32>
    %c0_i32_361 = arith.constant 0 : i32
    %972 = vector.broadcast %c0_i32_361 : i32 to vector<1x256xi32>
    %973 = arith.addi %0, %972 : vector<1x256xi32>
    %c0_i32_362 = arith.constant 0 : i32
    %974 = vector.broadcast %c0_i32_362 : i32 to vector<1x256xi32>
    %975 = arith.cmpi sge, %973, %974 : vector<1x256xi32>
    %c0_i32_363 = arith.constant 0 : i32
    %976 = vector.broadcast %c0_i32_363 : i32 to vector<1x256xi32>
    %977 = arith.addi %0, %976 : vector<1x256xi32>
    %c16_i32_364 = arith.constant 16 : i32
    %978 = vector.broadcast %c16_i32_364 : i32 to vector<1x256xi32>
    %979 = arith.cmpi slt, %977, %978 : vector<1x256xi32>
    %980 = arith.andi %975, %979 : vector<1x256xi1>
    %c-1_i32_365 = arith.constant -1 : i32
    %981 = vector.broadcast %c-1_i32_365 : i32 to vector<1x256xi32>
    %982 = arith.addi %1, %981 : vector<1x256xi32>
    %c0_i32_366 = arith.constant 0 : i32
    %983 = vector.broadcast %c0_i32_366 : i32 to vector<1x256xi32>
    %984 = arith.cmpi sge, %982, %983 : vector<1x256xi32>
    %985 = arith.andi %980, %984 : vector<1x256xi1>
    %c-1_i32_367 = arith.constant -1 : i32
    %986 = vector.broadcast %c-1_i32_367 : i32 to vector<1x256xi32>
    %987 = arith.addi %1, %986 : vector<1x256xi32>
    %c16_i32_368 = arith.constant 16 : i32
    %988 = vector.broadcast %c16_i32_368 : i32 to vector<1x256xi32>
    %989 = arith.cmpi slt, %987, %988 : vector<1x256xi32>
    %990 = arith.andi %985, %989 : vector<1x256xi1>
    %cst_369 = arith.constant 0.000000e+00 : f32
    %991 = vector.shape_cast %990 : vector<1x256xi1> to vector<1x256xi1>
    %992 = vector.broadcast %991 : vector<1x256xi1> to vector<32x256xi1>
    %993 = vector.broadcast %cst_369 : f32 to vector<32x256xf32>
    %994 = arith.select %992, %971, %993 : vector<32x256xi1>, vector<32x256xf32>
    %995 = vector.extract_strided_slice %885 {offsets = [0, 3], sizes = [32, 1], strides = [1, 1]} : vector<32x9xf32> to vector<32x1xf32>
    %996 = vector.broadcast %995 : vector<32x1xf32> to vector<32x256xf32>
    %997 = arith.mulf %994, %996 : vector<32x256xf32>
    %998 = arith.addf %970, %997 : vector<32x256xf32>
    %c0_i32_370 = arith.constant 0 : i32
    %999 = vector.broadcast %c0_i32_370 : i32 to vector<1x256xi32>
    %1000 = arith.addi %0, %999 : vector<1x256xi32>
    %c0_i32_371 = arith.constant 0 : i32
    %1001 = vector.broadcast %c0_i32_371 : i32 to vector<1x256xi32>
    %1002 = arith.cmpi sge, %1000, %1001 : vector<1x256xi32>
    %c0_i32_372 = arith.constant 0 : i32
    %1003 = vector.broadcast %c0_i32_372 : i32 to vector<1x256xi32>
    %1004 = arith.addi %0, %1003 : vector<1x256xi32>
    %c16_i32_373 = arith.constant 16 : i32
    %1005 = vector.broadcast %c16_i32_373 : i32 to vector<1x256xi32>
    %1006 = arith.cmpi slt, %1004, %1005 : vector<1x256xi32>
    %1007 = arith.andi %1002, %1006 : vector<1x256xi1>
    %c0_i32_374 = arith.constant 0 : i32
    %1008 = vector.broadcast %c0_i32_374 : i32 to vector<1x256xi32>
    %1009 = arith.addi %1, %1008 : vector<1x256xi32>
    %c0_i32_375 = arith.constant 0 : i32
    %1010 = vector.broadcast %c0_i32_375 : i32 to vector<1x256xi32>
    %1011 = arith.cmpi sge, %1009, %1010 : vector<1x256xi32>
    %1012 = arith.andi %1007, %1011 : vector<1x256xi1>
    %c0_i32_376 = arith.constant 0 : i32
    %1013 = vector.broadcast %c0_i32_376 : i32 to vector<1x256xi32>
    %1014 = arith.addi %1, %1013 : vector<1x256xi32>
    %c16_i32_377 = arith.constant 16 : i32
    %1015 = vector.broadcast %c16_i32_377 : i32 to vector<1x256xi32>
    %1016 = arith.cmpi slt, %1014, %1015 : vector<1x256xi32>
    %1017 = arith.andi %1012, %1016 : vector<1x256xi1>
    %cst_378 = arith.constant 0.000000e+00 : f32
    %1018 = vector.shape_cast %1017 : vector<1x256xi1> to vector<1x256xi1>
    %1019 = vector.broadcast %1018 : vector<1x256xi1> to vector<32x256xi1>
    %1020 = vector.broadcast %cst_378 : f32 to vector<32x256xf32>
    %1021 = arith.select %1019, %884, %1020 : vector<32x256xi1>, vector<32x256xf32>
    %1022 = vector.extract_strided_slice %885 {offsets = [0, 4], sizes = [32, 1], strides = [1, 1]} : vector<32x9xf32> to vector<32x1xf32>
    %1023 = vector.broadcast %1022 : vector<32x1xf32> to vector<32x256xf32>
    %1024 = arith.mulf %1021, %1023 : vector<32x256xf32>
    %1025 = arith.addf %998, %1024 : vector<32x256xf32>
    %c255_i32_379 = arith.constant 255 : i32
    %1026 = tpu.dynamic_rotate %884 by %c255_i32_379 dim 1 : vector<32x256xf32>, i32 -> vector<32x256xf32>
    %c0_i32_380 = arith.constant 0 : i32
    %1027 = vector.broadcast %c0_i32_380 : i32 to vector<1x256xi32>
    %1028 = arith.addi %0, %1027 : vector<1x256xi32>
    %c0_i32_381 = arith.constant 0 : i32
    %1029 = vector.broadcast %c0_i32_381 : i32 to vector<1x256xi32>
    %1030 = arith.cmpi sge, %1028, %1029 : vector<1x256xi32>
    %c0_i32_382 = arith.constant 0 : i32
    %1031 = vector.broadcast %c0_i32_382 : i32 to vector<1x256xi32>
    %1032 = arith.addi %0, %1031 : vector<1x256xi32>
    %c16_i32_383 = arith.constant 16 : i32
    %1033 = vector.broadcast %c16_i32_383 : i32 to vector<1x256xi32>
    %1034 = arith.cmpi slt, %1032, %1033 : vector<1x256xi32>
    %1035 = arith.andi %1030, %1034 : vector<1x256xi1>
    %c1_i32_384 = arith.constant 1 : i32
    %1036 = vector.broadcast %c1_i32_384 : i32 to vector<1x256xi32>
    %1037 = arith.addi %1, %1036 : vector<1x256xi32>
    %c0_i32_385 = arith.constant 0 : i32
    %1038 = vector.broadcast %c0_i32_385 : i32 to vector<1x256xi32>
    %1039 = arith.cmpi sge, %1037, %1038 : vector<1x256xi32>
    %1040 = arith.andi %1035, %1039 : vector<1x256xi1>
    %c1_i32_386 = arith.constant 1 : i32
    %1041 = vector.broadcast %c1_i32_386 : i32 to vector<1x256xi32>
    %1042 = arith.addi %1, %1041 : vector<1x256xi32>
    %c16_i32_387 = arith.constant 16 : i32
    %1043 = vector.broadcast %c16_i32_387 : i32 to vector<1x256xi32>
    %1044 = arith.cmpi slt, %1042, %1043 : vector<1x256xi32>
    %1045 = arith.andi %1040, %1044 : vector<1x256xi1>
    %cst_388 = arith.constant 0.000000e+00 : f32
    %1046 = vector.shape_cast %1045 : vector<1x256xi1> to vector<1x256xi1>
    %1047 = vector.broadcast %1046 : vector<1x256xi1> to vector<32x256xi1>
    %1048 = vector.broadcast %cst_388 : f32 to vector<32x256xf32>
    %1049 = arith.select %1047, %1026, %1048 : vector<32x256xi1>, vector<32x256xf32>
    %1050 = vector.extract_strided_slice %885 {offsets = [0, 5], sizes = [32, 1], strides = [1, 1]} : vector<32x9xf32> to vector<32x1xf32>
    %1051 = vector.broadcast %1050 : vector<32x1xf32> to vector<32x256xf32>
    %1052 = arith.mulf %1049, %1051 : vector<32x256xf32>
    %1053 = arith.addf %1025, %1052 : vector<32x256xf32>
    %c241_i32_389 = arith.constant 241 : i32
    %1054 = tpu.dynamic_rotate %884 by %c241_i32_389 dim 1 : vector<32x256xf32>, i32 -> vector<32x256xf32>
    %c1_i32_390 = arith.constant 1 : i32
    %1055 = vector.broadcast %c1_i32_390 : i32 to vector<1x256xi32>
    %1056 = arith.addi %0, %1055 : vector<1x256xi32>
    %c0_i32_391 = arith.constant 0 : i32
    %1057 = vector.broadcast %c0_i32_391 : i32 to vector<1x256xi32>
    %1058 = arith.cmpi sge, %1056, %1057 : vector<1x256xi32>
    %c1_i32_392 = arith.constant 1 : i32
    %1059 = vector.broadcast %c1_i32_392 : i32 to vector<1x256xi32>
    %1060 = arith.addi %0, %1059 : vector<1x256xi32>
    %c16_i32_393 = arith.constant 16 : i32
    %1061 = vector.broadcast %c16_i32_393 : i32 to vector<1x256xi32>
    %1062 = arith.cmpi slt, %1060, %1061 : vector<1x256xi32>
    %1063 = arith.andi %1058, %1062 : vector<1x256xi1>
    %c-1_i32_394 = arith.constant -1 : i32
    %1064 = vector.broadcast %c-1_i32_394 : i32 to vector<1x256xi32>
    %1065 = arith.addi %1, %1064 : vector<1x256xi32>
    %c0_i32_395 = arith.constant 0 : i32
    %1066 = vector.broadcast %c0_i32_395 : i32 to vector<1x256xi32>
    %1067 = arith.cmpi sge, %1065, %1066 : vector<1x256xi32>
    %1068 = arith.andi %1063, %1067 : vector<1x256xi1>
    %c-1_i32_396 = arith.constant -1 : i32
    %1069 = vector.broadcast %c-1_i32_396 : i32 to vector<1x256xi32>
    %1070 = arith.addi %1, %1069 : vector<1x256xi32>
    %c16_i32_397 = arith.constant 16 : i32
    %1071 = vector.broadcast %c16_i32_397 : i32 to vector<1x256xi32>
    %1072 = arith.cmpi slt, %1070, %1071 : vector<1x256xi32>
    %1073 = arith.andi %1068, %1072 : vector<1x256xi1>
    %cst_398 = arith.constant 0.000000e+00 : f32
    %1074 = vector.shape_cast %1073 : vector<1x256xi1> to vector<1x256xi1>
    %1075 = vector.broadcast %1074 : vector<1x256xi1> to vector<32x256xi1>
    %1076 = vector.broadcast %cst_398 : f32 to vector<32x256xf32>
    %1077 = arith.select %1075, %1054, %1076 : vector<32x256xi1>, vector<32x256xf32>
    %1078 = vector.extract_strided_slice %885 {offsets = [0, 6], sizes = [32, 1], strides = [1, 1]} : vector<32x9xf32> to vector<32x1xf32>
    %1079 = vector.broadcast %1078 : vector<32x1xf32> to vector<32x256xf32>
    %1080 = arith.mulf %1077, %1079 : vector<32x256xf32>
    %1081 = arith.addf %1053, %1080 : vector<32x256xf32>
    %c240_i32_399 = arith.constant 240 : i32
    %1082 = tpu.dynamic_rotate %884 by %c240_i32_399 dim 1 : vector<32x256xf32>, i32 -> vector<32x256xf32>
    %c1_i32_400 = arith.constant 1 : i32
    %1083 = vector.broadcast %c1_i32_400 : i32 to vector<1x256xi32>
    %1084 = arith.addi %0, %1083 : vector<1x256xi32>
    %c0_i32_401 = arith.constant 0 : i32
    %1085 = vector.broadcast %c0_i32_401 : i32 to vector<1x256xi32>
    %1086 = arith.cmpi sge, %1084, %1085 : vector<1x256xi32>
    %c1_i32_402 = arith.constant 1 : i32
    %1087 = vector.broadcast %c1_i32_402 : i32 to vector<1x256xi32>
    %1088 = arith.addi %0, %1087 : vector<1x256xi32>
    %c16_i32_403 = arith.constant 16 : i32
    %1089 = vector.broadcast %c16_i32_403 : i32 to vector<1x256xi32>
    %1090 = arith.cmpi slt, %1088, %1089 : vector<1x256xi32>
    %1091 = arith.andi %1086, %1090 : vector<1x256xi1>
    %c0_i32_404 = arith.constant 0 : i32
    %1092 = vector.broadcast %c0_i32_404 : i32 to vector<1x256xi32>
    %1093 = arith.addi %1, %1092 : vector<1x256xi32>
    %c0_i32_405 = arith.constant 0 : i32
    %1094 = vector.broadcast %c0_i32_405 : i32 to vector<1x256xi32>
    %1095 = arith.cmpi sge, %1093, %1094 : vector<1x256xi32>
    %1096 = arith.andi %1091, %1095 : vector<1x256xi1>
    %c0_i32_406 = arith.constant 0 : i32
    %1097 = vector.broadcast %c0_i32_406 : i32 to vector<1x256xi32>
    %1098 = arith.addi %1, %1097 : vector<1x256xi32>
    %c16_i32_407 = arith.constant 16 : i32
    %1099 = vector.broadcast %c16_i32_407 : i32 to vector<1x256xi32>
    %1100 = arith.cmpi slt, %1098, %1099 : vector<1x256xi32>
    %1101 = arith.andi %1096, %1100 : vector<1x256xi1>
    %cst_408 = arith.constant 0.000000e+00 : f32
    %1102 = vector.shape_cast %1101 : vector<1x256xi1> to vector<1x256xi1>
    %1103 = vector.broadcast %1102 : vector<1x256xi1> to vector<32x256xi1>
    %1104 = vector.broadcast %cst_408 : f32 to vector<32x256xf32>
    %1105 = arith.select %1103, %1082, %1104 : vector<32x256xi1>, vector<32x256xf32>
    %1106 = vector.extract_strided_slice %885 {offsets = [0, 7], sizes = [32, 1], strides = [1, 1]} : vector<32x9xf32> to vector<32x1xf32>
    %1107 = vector.broadcast %1106 : vector<32x1xf32> to vector<32x256xf32>
    %1108 = arith.mulf %1105, %1107 : vector<32x256xf32>
    %1109 = arith.addf %1081, %1108 : vector<32x256xf32>
    %c239_i32_409 = arith.constant 239 : i32
    %1110 = tpu.dynamic_rotate %884 by %c239_i32_409 dim 1 : vector<32x256xf32>, i32 -> vector<32x256xf32>
    %c1_i32_410 = arith.constant 1 : i32
    %1111 = vector.broadcast %c1_i32_410 : i32 to vector<1x256xi32>
    %1112 = arith.addi %0, %1111 : vector<1x256xi32>
    %c0_i32_411 = arith.constant 0 : i32
    %1113 = vector.broadcast %c0_i32_411 : i32 to vector<1x256xi32>
    %1114 = arith.cmpi sge, %1112, %1113 : vector<1x256xi32>
    %c1_i32_412 = arith.constant 1 : i32
    %1115 = vector.broadcast %c1_i32_412 : i32 to vector<1x256xi32>
    %1116 = arith.addi %0, %1115 : vector<1x256xi32>
    %c16_i32_413 = arith.constant 16 : i32
    %1117 = vector.broadcast %c16_i32_413 : i32 to vector<1x256xi32>
    %1118 = arith.cmpi slt, %1116, %1117 : vector<1x256xi32>
    %1119 = arith.andi %1114, %1118 : vector<1x256xi1>
    %c1_i32_414 = arith.constant 1 : i32
    %1120 = vector.broadcast %c1_i32_414 : i32 to vector<1x256xi32>
    %1121 = arith.addi %1, %1120 : vector<1x256xi32>
    %c0_i32_415 = arith.constant 0 : i32
    %1122 = vector.broadcast %c0_i32_415 : i32 to vector<1x256xi32>
    %1123 = arith.cmpi sge, %1121, %1122 : vector<1x256xi32>
    %1124 = arith.andi %1119, %1123 : vector<1x256xi1>
    %c1_i32_416 = arith.constant 1 : i32
    %1125 = vector.broadcast %c1_i32_416 : i32 to vector<1x256xi32>
    %1126 = arith.addi %1, %1125 : vector<1x256xi32>
    %c16_i32_417 = arith.constant 16 : i32
    %1127 = vector.broadcast %c16_i32_417 : i32 to vector<1x256xi32>
    %1128 = arith.cmpi slt, %1126, %1127 : vector<1x256xi32>
    %1129 = arith.andi %1124, %1128 : vector<1x256xi1>
    %cst_418 = arith.constant 0.000000e+00 : f32
    %1130 = vector.shape_cast %1129 : vector<1x256xi1> to vector<1x256xi1>
    %1131 = vector.broadcast %1130 : vector<1x256xi1> to vector<32x256xi1>
    %1132 = vector.broadcast %cst_418 : f32 to vector<32x256xf32>
    %1133 = arith.select %1131, %1110, %1132 : vector<32x256xi1>, vector<32x256xf32>
    %1134 = vector.extract_strided_slice %885 {offsets = [0, 8], sizes = [32, 1], strides = [1, 1]} : vector<32x9xf32> to vector<32x1xf32>
    %1135 = vector.broadcast %1134 : vector<32x1xf32> to vector<32x256xf32>
    %1136 = arith.mulf %1133, %1135 : vector<32x256xf32>
    %1137 = arith.addf %1109, %1136 : vector<32x256xf32>
    %1138 = vector.extract_strided_slice %1137 {offsets = [0, 0], sizes = [16, 256], strides = [1, 1]} : vector<32x256xf32> to vector<16x256xf32>
    %1139 = vector.extract_strided_slice %1137 {offsets = [16, 0], sizes = [16, 256], strides = [1, 1]} : vector<32x256xf32> to vector<16x256xf32>
    %1140 = arith.mulf %1138, %1139 : vector<16x256xf32>
    %c0_419 = arith.constant 0 : index
    %c0_420 = arith.constant 0 : index
    %1141 = vector.load %arg16[%c0_419, %c0_420] : memref<16x1xf32, #tpu.memory_space<vmem>>, vector<16x1xf32>
    %1142 = vector.broadcast %1141 : vector<16x1xf32> to vector<16x256xf32>
    %1143 = arith.mulf %1140, %1142 : vector<16x256xf32>
    %cst_421 = arith.constant dense<0.000000e+00> : vector<256xf32>
    %1144 = vector.multi_reduction <add>, %1143, %cst_421 [0] : vector<16x256xf32> to vector<256xf32>
    %1145 = vector.shape_cast %1144 : vector<256xf32> to vector<1x256xf32>
    %c0_422 = arith.constant 0 : index
    %c0_423 = arith.constant 0 : index
    %1146 = vector.load %arg17[%c0_422, %c0_423] : memref<1x1xf32, #tpu.memory_space<vmem>>, vector<1x1xf32>
    %1147 = vector.broadcast %1146 : vector<1x1xf32> to vector<1x256xf32>
    %1148 = arith.addf %1145, %1147 : vector<1x256xf32>
    %c0_424 = arith.constant 0 : index
    %c0_425 = arith.constant 0 : index
    %1149 = vector.load %arg18[%c0_424, %c0_425] : memref<16x1xf32, #tpu.memory_space<vmem>>, vector<16x1xf32>
    %cst_426 = arith.constant 5.000000e-01 : f32
    %1150 = vector.broadcast %cst_426 : f32 to vector<1x256xf32>
    %1151 = arith.mulf %1150, %1148 : vector<1x256xf32>
    %cst_427 = arith.constant 4.471500e-02 : f32
    %1152 = vector.broadcast %cst_427 : f32 to vector<1x256xf32>
    %1153 = arith.mulf %1152, %1148 : vector<1x256xf32>
    %1154 = arith.mulf %1153, %1148 : vector<1x256xf32>
    %1155 = arith.mulf %1154, %1148 : vector<1x256xf32>
    %1156 = arith.addf %1148, %1155 : vector<1x256xf32>
    %cst_428 = arith.constant 0.797884583 : f32
    %1157 = vector.broadcast %cst_428 : f32 to vector<1x256xf32>
    %1158 = arith.mulf %1157, %1156 : vector<1x256xf32>
    %1159 = math.tanh %1158 : vector<1x256xf32>
    %cst_429 = arith.constant 1.000000e+00 : f32
    %1160 = vector.broadcast %cst_429 : f32 to vector<1x256xf32>
    %1161 = arith.addf %1160, %1159 : vector<1x256xf32>
    %1162 = arith.mulf %1151, %1161 : vector<1x256xf32>
    %1163 = vector.broadcast %1162 : vector<1x256xf32> to vector<16x256xf32>
    %1164 = arith.subf %1140, %1163 : vector<16x256xf32>
    %1165 = vector.broadcast %1149 : vector<16x1xf32> to vector<16x256xf32>
    %1166 = arith.mulf %1165, %1164 : vector<16x256xf32>
    %1167 = arith.addf %1140, %1166 : vector<16x256xf32>
    %c0_430 = arith.constant 0 : index
    %c0_431 = arith.constant 0 : index
    %1168 = vector.load %arg19[%c0_430, %c0_431] : memref<8x16xbf16, #tpu.memory_space<vmem>>, vector<8x16xbf16>
    %1169 = arith.truncf %1167 : vector<16x256xf32> to vector<16x256xbf16>
    %cst_432 = arith.constant dense<0.000000e+00> : vector<8x256xf32>
    %1170 = tpu.matmul %1168, %1169, %cst_432 {dimension_numbers = #tpu.dot_dimension_numbers<[1], [0], [0], [1], [0, 0, 1, 1], [], []>} : vector<8x16xbf16>, vector<16x256xbf16>, vector<8x256xf32> -> vector<8x256xf32>
    %1171 = arith.addf %1170, %857 : vector<8x256xf32>
    %c0_433 = arith.constant 0 : index
    %c0_434 = arith.constant 0 : index
    %c0_435 = arith.constant 0 : index
    %1172 = vector.load %arg20[%c0_433, %c0_434, %c0_435] : memref<1x8x256xf32, #tpu.memory_space<vmem>>, vector<1x8x256xf32>
    %1173 = vector.shape_cast %1172 : vector<1x8x256xf32> to vector<8x256xf32>
    %1174 = vector.shape_cast %1171 : vector<8x256xf32> to vector<1x8x256xf32>
    tpu.vector_store %arg20[%c0_433, %c0_434, %c0_435], %1174 {strides = array<i32>} : memref<1x8x256xf32, #tpu.memory_space<vmem>>, vector<1x8x256xf32>,
    return
  }
  func.func @transform_0(%arg0: i32) -> (i32, i32, i32) {
    %c0_i32 = arith.constant 0 : i32
    %c0_i32_0 = arith.constant 0 : i32
    %c0_i32_1 = arith.constant 0 : i32
    return %arg0, %c0_i32, %c0_i32_0 : i32, i32, i32
  }
  func.func @transform_1(%arg0: i32) -> (i32, i32, i32) {
    %c0_i32 = arith.constant 0 : i32
    %c0_i32_0 = arith.constant 0 : i32
    %c0_i32_1 = arith.constant 0 : i32
    return %arg0, %c0_i32, %c0_i32_0 : i32, i32, i32
  }
  func.func @transform_2(%arg0: i32) -> (i32, i32, i32) {
    %c0_i32 = arith.constant 0 : i32
    %c0_i32_0 = arith.constant 0 : i32
    %c0_i32_1 = arith.constant 0 : i32
    return %arg0, %c0_i32, %c0_i32_0 : i32, i32, i32
  }
  func.func @transform_3(%arg0: i32) -> (i32, i32, i32) {
    %c0_i32 = arith.constant 0 : i32
    %c0_i32_0 = arith.constant 0 : i32
    %c0_i32_1 = arith.constant 0 : i32
    return %arg0, %c0_i32, %c0_i32_0 : i32, i32, i32
  }
  func.func @transform_4(%arg0: i32) -> (i32, i32, i32) {
    %c0_i32 = arith.constant 0 : i32
    %c0_i32_0 = arith.constant 0 : i32
    %c0_i32_1 = arith.constant 0 : i32
    return %arg0, %c0_i32, %c0_i32_0 : i32, i32, i32
  }
  func.func @transform_5(%arg0: i32) -> (i32, i32) {
    %c0_i32 = arith.constant 0 : i32
    %c0_i32_0 = arith.constant 0 : i32
    %c0_i32_1 = arith.constant 0 : i32
    return %c0_i32, %c0_i32_0 : i32, i32
  }
  func.func @transform_6(%arg0: i32) -> (i32, i32) {
    %c0_i32 = arith.constant 0 : i32
    %c0_i32_0 = arith.constant 0 : i32
    %c0_i32_1 = arith.constant 0 : i32
    return %c0_i32, %c0_i32_0 : i32, i32
  }
  func.func @transform_7(%arg0: i32) -> (i32, i32, i32) {
    %c0_i32 = arith.constant 0 : i32
    %c0_i32_0 = arith.constant 0 : i32
    %c0_i32_1 = arith.constant 0 : i32
    %c0_i32_2 = arith.constant 0 : i32
    return %c0_i32, %c0_i32_0, %c0_i32_1 : i32, i32, i32
  }
  func.func @transform_8(%arg0: i32) -> (i32, i32, i32) {
    %c0_i32 = arith.constant 0 : i32
    %c0_i32_0 = arith.constant 0 : i32
    %c0_i32_1 = arith.constant 0 : i32
    %c0_i32_2 = arith.constant 0 : i32
    return %c0_i32, %c0_i32_0, %c0_i32_1 : i32, i32, i32
  }
  func.func @transform_9(%arg0: i32) -> (i32, i32, i32) {
    %c0_i32 = arith.constant 0 : i32
    %c0_i32_0 = arith.constant 0 : i32
    %c0_i32_1 = arith.constant 0 : i32
    %c0_i32_2 = arith.constant 0 : i32
    return %c0_i32, %c0_i32_0, %c0_i32_1 : i32, i32, i32
  }
  func.func @transform_10(%arg0: i32) -> (i32, i32) {
    %c0_i32 = arith.constant 0 : i32
    %c0_i32_0 = arith.constant 0 : i32
    %c0_i32_1 = arith.constant 0 : i32
    return %c0_i32, %c0_i32_0 : i32, i32
  }
  func.func @transform_11(%arg0: i32) -> (i32, i32) {
    %c0_i32 = arith.constant 0 : i32
    %c0_i32_0 = arith.constant 0 : i32
    %c0_i32_1 = arith.constant 0 : i32
    return %c0_i32, %c0_i32_0 : i32, i32
  }
  func.func @transform_12(%arg0: i32) -> (i32, i32) {
    %c0_i32 = arith.constant 0 : i32
    %c0_i32_0 = arith.constant 0 : i32
    %c0_i32_1 = arith.constant 0 : i32
    return %c0_i32, %c0_i32_0 : i32, i32
  }
  func.func @transform_13(%arg0: i32) -> (i32, i32) {
    %c0_i32 = arith.constant 0 : i32
    %c0_i32_0 = arith.constant 0 : i32
    %c0_i32_1 = arith.constant 0 : i32
    return %c0_i32, %c0_i32_0 : i32, i32
  }
  func.func @transform_14(%arg0: i32) -> (i32, i32) {
    %c0_i32 = arith.constant 0 : i32
    %c0_i32_0 = arith.constant 0 : i32
    %c0_i32_1 = arith.constant 0 : i32
    return %c0_i32, %c0_i32_0 : i32, i32
  }
  func.func @transform_15(%arg0: i32) -> (i32, i32) {
    %c0_i32 = arith.constant 0 : i32
    %c0_i32_0 = arith.constant 0 : i32
    %c0_i32_1 = arith.constant 0 : i32
    return %c0_i32, %c0_i32_0 : i32, i32
  }
  func.func @transform_16(%arg0: i32) -> (i32, i32) {
    %c0_i32 = arith.constant 0 : i32
    %c0_i32_0 = arith.constant 0 : i32
    %c0_i32_1 = arith.constant 0 : i32
    return %c0_i32, %c0_i32_0 : i32, i32
  }
  func.func @transform_17(%arg0: i32) -> (i32, i32) {
    %c0_i32 = arith.constant 0 : i32
    %c0_i32_0 = arith.constant 0 : i32
    %c0_i32_1 = arith.constant 0 : i32
    return %c0_i32, %c0_i32_0 : i32, i32
  }
  func.func @transform_18(%arg0: i32) -> (i32, i32) {
    %c0_i32 = arith.constant 0 : i32
    %c0_i32_0 = arith.constant 0 : i32
    %c0_i32_1 = arith.constant 0 : i32
    return %c0_i32, %c0_i32_0 : i32, i32
  }
  func.func @transform_19(%arg0: i32) -> (i32, i32, i32) {
    %c0_i32 = arith.constant 0 : i32
    %c0_i32_0 = arith.constant 0 : i32
    %c0_i32_1 = arith.constant 0 : i32
    return %arg0, %c0_i32, %c0_i32_0 : i32, i32, i32
  }
}

</mosaic_0001>

<bundles_post_ra>
// kernel: att_block_forward.2
= control target key start
LH: loop header
LB: loop body
LE: loop exit
PB: predicated region body
PF: predicated region fallthrough
CT: control target
= control target key end

     0   :  { %s541_s21 = smov 0   ;;  %s580_s0 = inlined_call_operand.vmem [shape: f32[2,8,256], index: 0, kind: input, shape index: {}]   ;;  %s581_s1 = inlined_call_operand.vmem [shape: f32[8,1], index: 1, kind: input, shape index: {}]   ;;  %s582_s2 = inlined_call_operand.vmem [shape: f32[8,1], index: 2, kind: input, shape index: {}]   ;;  %s583_s3 = inlined_call_operand.vmem [shape: bf16[8,8], index: 3, kind: input, shape index: {}]   ;;  %s584_s4 = inlined_call_operand.vmem [shape: f32[8,1], index: 4, kind: input, shape index: {}]   ;;  %s585_s5 = inlined_call_operand.vmem [shape: f32[8,1], index: 5, kind: input, shape index: {}]   ;;  %s586_s6 = inlined_call_operand.vmem [shape: f32[2,8,256], index: 6, kind: output, shape index: {}]  }
   0x1 LB: > { %s463_s22 = sadd.s32 4294967295, %s503_s21   ;;  %p467_p0 = scmp.ge.s32.totalorder %s503_s21, 1  ;;  %s503_s21 = sphi %s541_s21, %s16_s21  }
   0x2   : > { %p212_p1 = scmp.lt.s32.totalorder %s503_s21, 3 }
   0x4   : > { %p213_p2 = pnand %p467_p0, %p212_p1 }
   0x5   : > { %v288_v0 = vld [vmem:[%s581_s1] sm:$0xff] (!%p213_p2)  ;;  %v505_v1 = vmov (!%p213_p2), 0   ;;  %p242_p3 = scmp.lt.s32.totalorder (!%p213_p2), %s463_s22, 1  ;;  %vm323_vm0 = vcmask (!%p213_p2), 1043456   ;;  %vm319_vm1 = vcmask (!%p213_p2), 64512  }
   0x6   : > { %216 = sbr.rel (%p213_p2) target bundleno = 541 (0x21d), region = 44  ;;  %487 = vset.pattern.permute.xlu0 (!%p213_p2), %v505_v1  ;;  %362 = vmatprep.mubr.bf16.mxu0 (!%p213_p2), %v505_v1  ;;  %v302_v2 = vld [vmem:[%s582_s2] sm:$0xff] (!%p213_p2) }
   0x7   : > { %297 = vperm.xlu0 (!%p213_p2), %487, %v288_v0   ;;  %488 = vset.pattern.permute.xlu1 (!%p213_p2), %v505_v1  ;;  %v376_v3 = vld [vmem:[%s585_s5] sm:$0xff] (!%p213_p2) }
   0x8   : > { %v313_v4 = vld [vmem:[%s584_s4] sm:$0xff] (!%p213_p2) }
   0x9   : > { %316 = vperm.xlu1 (!%p213_p2), %488, %v313_v4   ;;  %v310_v54 = vld [vmem:[%s583_s3] sm:$0xf] (!%p213_p2) }
   0xb   : > { %305 = vperm.xlu0 (!%p213_p2), %487, %v302_v2  }
   0xd   : > { %s588_s22 = smov (!%p242_p3, %s463_s22), 1 }
   0xe   : > { %s476_s7 = sshll.u32 %s588_s22, 4 }
   0xf   : > { %381 = vperm.xlu0 %487, %v376_v3   ;;  %s246_s10 = scalar_lea.vmem %s580_s0, %s476_s7  ;;  %s251_s15 = scalar_lea.vmem %s586_s6, %s476_s7 }
  0x10   : > { %v253_v5 = vld [vmem:[%s246_s10] sm:$0xff]  ;;  %v254_v6 = vld [vmem:[%s246_s10 + $0x8] sm:$0xff] }
  0x11   : > { %v255_v7 = vrot.slane %v253_v5, 4  ;;  %v261_v8 = vrot.slane %v254_v6, 4 }
  0x13   : > { %v256_v9 = vadd.f32 %v255_v7, %v253_v5  ;;  %v262_v10 = vadd.f32 %v261_v8, %v254_v6 }
  0x15   : > { %v257_v11 = vrot.slane %v256_v9, 2  ;;  %v263_v12 = vrot.slane %v262_v10, 2 }
  0x17   : > { %v258_v13 = vadd.f32 %v257_v11, %v256_v9  ;;  %v264_v14 = vadd.f32 %v263_v12, %v262_v10 }
  0x19   : > { %v259_v15 = vrot.slane %v258_v13, 1  ;;  %v265_v16 = vrot.slane %v264_v14, 1 }
  0x1b   : > { %v260_v17 = vadd.f32 %v259_v15, %v258_v13  ;;  %v266_v18 = vadd.f32 %v265_v16, %v264_v14 }
  0x1d   : > { %v268_v19 = vmul.f32 0.125, %v260_v17  ;;  %v269_v20 = vmul.f32 0.125, %v266_v18 }
  0x1f   : > { %v270_v21 = vsub.f32 %v253_v5, %v268_v19  ;;  %v271_v22 = vsub.f32 %v254_v6, %v269_v20 }
  0x21   : > { %v272_v23 = vmul.f32 %v270_v21, %v270_v21  ;;  %v273_v24 = vmul.f32 %v271_v22, %v271_v22 }
  0x23   : > { %v274_v25 = vrot.slane %v272_v23, 4  ;;  %v280_v26 = vrot.slane %v273_v24, 4 }
  0x25   : > { %v275_v27 = vadd.f32 %v274_v25, %v272_v23  ;;  %v281_v28 = vadd.f32 %v280_v26, %v273_v24 }
  0x27   : > { %v276_v29 = vrot.slane %v275_v27, 2  ;;  %v282_v30 = vrot.slane %v281_v28, 2 }
  0x29   : > { %v277_v31 = vadd.f32 %v276_v29, %v275_v27  ;;  %v283_v32 = vadd.f32 %v282_v30, %v281_v28 }
  0x2b   : > { %v278_v33 = vrot.slane %v277_v31, 1  ;;  %v284_v34 = vrot.slane %v283_v32, 1 }
  0x2d   : > { %v279_v35 = vadd.f32 %v278_v33, %v277_v31  ;;  %v285_v36 = vadd.f32 %v284_v34, %v283_v32 }
  0x2f   : > { %v286_v37 = vmul.f32 0.125, %v279_v35  ;;  %v287_v38 = vmul.f32 0.125, %v285_v36 }
  0x31   : > { %v289_v39 = vadd.f32 1e-06, %v286_v37  ;;  %v290_v40 = vadd.f32 1e-06, %v287_v38 }
  0x33   : > { %489 = vrsqrt.f32 %v289_v39 }
  0x34   : > { %491 = vrsqrt.f32 %v290_v40 }
  0x3d   : > { %v490_v41 = vpop.eup %489 }
  0x3e   : > { %v492_v42 = vpop.eup %491  ;;  %v293_v43 = vmul.f32 %v490_v41, %v270_v21 }
  0x3f   : > { %v294_v44 = vmul.f32 %v492_v42, %v271_v22 }
  0x86   : > { %v298_v45 = vpop.permute.xlu0 %297 }
  0x87   : > { %v300_v46 = vmul.f32 %v298_v45, %v293_v43  ;;  %v301_v47 = vmul.f32 %v298_v45, %v294_v44 }
  0x88   : > { %v317_v55 = vpop.permute.xlu1 %316 }
  0x8a   : > { %v306_v48 = vpop.permute.xlu0 %305 }
  0x8b   : > { %v308_v49 = vadd.f32 %v306_v48, %v300_v46  ;;  %v309_v50 = vadd.f32 %v306_v48, %v301_v47 }
  0x8d   : > { %v311_v51 = vpack.c.bf16 %v308_v49, %v308_v49  ;;  %v312_v52 = vpack.c.bf16 %v309_v50, %v309_v50 }
  0x8e   : > { %v382_v3 = vpop.permute.xlu0 %381 }
  0x8f   : > { %472 = vmatprep.subr.msk.bf16.mxu0 %vm323_vm0, %v312_v52  ;;  %v325_v53 = vsel %vm323_vm0, %v311_v51, 0 }
  0x90   : > { %331 = vmatpush1.bf16.msra.mxu0 %v325_v53 }
  0x93   : > { %473 = vmatmul.mubr.msk.bf16.vlgmr.msra.gmra.mrb[0].mxu0 %vm319_vm1, %v310_v54 }
 0x166   : > { %v364_v56 = vpop.f32.mrb[0].mxu0 }
 0x167   : > { %v365_v57 = vadd.f32 %v364_v56, %v317_v55  ;;  %v366_v58 = vpop.f32.mrb[1].mxu0 }
 0x168   : > { %v367_v59 = vadd.f32 %v366_v58, %v317_v55  ;;  %v368_v60 = vpop.f32.mrb[2].mxu0 }
 0x169   : > { %v369_v61 = vpop.f32.mrb[3].mxu0 }
 0x16a   : > { %v371_v62 = vadd.f32 %v367_v59, %v365_v57 }
 0x16c   : > { %372 = vadd.xlane.f32.xlu1 %v371_v62 }
 0x1f9   : > { %v373_v63 = vpop.xlane.xlu1 %372 }
 0x1fa   : > { %v375_v0 = vmul.f32 0.00390625, %v373_v63 }
 0x1fc   : > { %v377_v1 = vsub.f32 %v365_v57, %v375_v0  ;;  %v378_v2 = vsub.f32 %v367_v59, %v375_v0 }
 0x1fe   : > { %v384_v4 = vmul.f32 %v382_v3, %v377_v1  ;;  %v385_v5 = vmul.f32 %v382_v3, %v378_v2 }
 0x200   : > { %v386_v6 = vadd.f32 %v384_v4, %v365_v57  ;;  %v387_v7 = vadd.f32 %v385_v5, %v367_v59 }
 0x202   : > { %v390_v8 = vmul.f32 0.044715, %v386_v6  ;;  %v391_v9 = vmul.f32 0.044715, %v387_v7  ;;  %v388_v20 = vmul.f32 0.5, %v386_v6  ;;  %v389_v22 = vmul.f32 0.5, %v387_v7 }
 0x204   : > { %v392_v10 = vmul.f32 %v390_v8, %v386_v6  ;;  %v393_v11 = vmul.f32 %v391_v9, %v387_v7 }
 0x206   : > { %v394_v12 = vmul.f32 %v392_v10, %v386_v6  ;;  %v395_v13 = vmul.f32 %v393_v11, %v387_v7 }
 0x208   : > { %v396_v14 = vadd.f32 %v394_v12, %v386_v6  ;;  %v397_v15 = vadd.f32 %v395_v13, %v387_v7 }
 0x20a   : > { %v398_v16 = vmul.f32 0.7978846, %v396_v14  ;;  %v399_v17 = vmul.f32 0.7978846, %v397_v15 }
 0x20c   : > { %493 = vtanh.f32 %v398_v16 }
 0x20d   : > { %495 = vtanh.f32 %v399_v17 }
 0x216   : > { %v494_v18 = vpop.eup %493 }
 0x217   : > { %v496_v19 = vpop.eup %495  ;;  %v402_v21 = vadd.f32 1.0, %v494_v18 }
 0x218   : > { %v403_v23 = vadd.f32 1.0, %v496_v19 }
 0x219   : > { %v404_v24 = vmul.f32 %v402_v21, %v388_v20 }
 0x21a   : > { %v405_v25 = vmul.f32 %v403_v23, %v389_v22 }
 0x21b   : > { %406 = vst [vmem:[%s251_s15] sm:$0xff] %v404_v24 }
 0x21c   : > { %407 = vst [vmem:[%s251_s15 + $0x8] sm:$0xff] %v405_v25 }
 0x21d PF: > { %s16_s21 = sadd.s32 1, %s503_s21  }
 0x21e   : > { %p13_p4 = scmp.ge.s32.totalorder %s16_s21, 4  }
 0x220   :  { %15 = sbr.rel (!%p13_p4) target bundleno = 1 (0x1), region = 74 }

// kernel: att_block_forward.3
= control target key start
LH: loop header
LB: loop body
LE: loop exit
PB: predicated region body
PF: predicated region fallthrough
CT: control target
= control target key end

     0   :  { %s3004_s20 = smov 0   ;;  %s5190_s0 = inlined_call_operand.vmem [shape: f32[2,8,256], index: 0, kind: input, shape index: {}]   ;;  %s5191_s1 = inlined_call_operand.vmem [shape: f32[2,8,256], index: 1, kind: input, shape index: {}]   ;;  %s5192_s2 = inlined_call_operand.vmem [shape: f32[2,2,256], index: 2, kind: input, shape index: {}]   ;;  %s5193_s3 = inlined_call_operand.vmem [shape: f32[2,2,256], index: 3, kind: input, shape index: {}]   ;;  %s5194_s4 = inlined_call_operand.vmem [shape: f32[2,2,256], index: 4, kind: input, shape index: {}]   ;;  %s5195_s5 = inlined_call_operand.vmem [shape: s32[1,256], index: 5, kind: input, shape index: {}]   ;;  %s5196_s6 = inlined_call_operand.vmem [shape: s32[1,256], index: 6, kind: input, shape index: {}]   ;;  %s5197_s7 = inlined_call_operand.vmem [shape: f32[4,2,9], index: 7, kind: input, shape index: {}]   ;;  %s5198_s8 = inlined_call_operand.vmem [shape: f32[4,2,1], index: 8, kind: input, shape index: {}]   ;;  %s5199_s9 = inlined_call_operand.vmem [shape: bf16[4,8,2], index: 9, kind: input, shape index: {}]   ;;  %s5200_s10 = inlined_call_operand.vmem [shape: f32[8,1], index: 10, kind: input, shape index: {}]   ;;  %s5201_s11 = inlined_call_operand.vmem [shape: f32[8,1], index: 11, kind: input, shape index: {}]   ;;  %s5202_s12 = inlined_call_operand.vmem [shape: f32[8,1], index: 12, kind: input, shape index: {}]   ;;  %s5203_s13 = inlined_call_operand.vmem [shape: bf16[32,8], index: 13, kind: input, shape index: {}]   ;;  %s5204_s14 = inlined_call_operand.vmem [shape: f32[32,9], index: 14, kind: input, shape index: {}]   ;;  %s5205_s15 = inlined_call_operand.vmem [shape: f32[16,1], index: 15, kind: input, shape index: {}]   ;;  %s5206_s16 = inlined_call_operand.<no memory space> [shape: f32[1,1], index: 16, kind: input, shape index: {}]   ;;  %s5207_s17 = inlined_call_operand.vmem [shape: f32[16,1], index: 17, kind: input, shape index: {}]   ;;  %s5208_s18 = inlined_call_operand.vmem [shape: bf16[8,16], index: 18, kind: input, shape index: {}]   ;;  %s5209_s19 = inlined_call_operand.vmem [shape: f32[2,8,256], index: 19, kind: output, shape index: {}]  }
   0x1   :  { %5317 = sst [smem:[#allocation31_spill]] %s5190_s0  ;;  %v24_v0 = vstv %s5206_s16 }
   0x2   :  { %5318 = sst [smem:[#allocation32_spill]] %s5191_s1  ;;  %25 = vst [vmem:[#allocation2] sm:$0x1] %v24_v0 }
   0x3   :  { %5319 = sst [smem:[#allocation33_spill]] %s5192_s2 }
   0x4   :  { %5320 = sst [smem:[#allocation34_spill]] %s5193_s3 }
   0x5 LB: > { %s2723_s21 = sadd.s32 4294967295, %s2875_s20   ;;  %p2727_p0 = scmp.ge.s32.totalorder %s2875_s20, 1  ;;  %s2875_s20 = sphi %s3004_s20, %s31_s20  }
   0x6   : > { %p579_p1 = scmp.lt.s32.totalorder %s2875_s20, 3 }
   0x8   : > { %p580_p2 = pnand %p2727_p0, %p579_p1 }
   0xa   : > { %583 = sbr.rel (%p580_p2) target bundleno = 1371 (0x55b), region = 96 }
  0x11   : > { %v3015_v1 = vld [vmem:[%s5197_s7 + $0x2] sm:$0x3]  ;;  %v3020_v2 = vld [vmem:[%s5197_s7] sm:$0x3]  ;;  %v2877_v3 = vmov 1   ;;  %v5233_v4 = vmov 0   ;;  %v699_v59 = vlaneseq }
  0x12   : > { %2806 = vset.pattern.permute.xlu0 %v2877_v3  ;;  %2807 = vset.pattern.permute.xlu1 %v5233_v4  ;;  %p655_p3 = scmp.lt.s32.totalorder %s2723_s21, 1  ;;  %v5231_v5 = vmov 2   ;;  %s5321_s3 = sld [smem:[#allocation33_spill]]  ;;  %v5226_v8 = vmov 4   ;;  %v5229_v9 = vmov 3   ;;  %v5224_v12 = vmov 5  }
  0x13   : > { %1066 = vperm.xlu0 %2806, %v3015_v1   ;;  %728 = vperm.xlu1 %2807, %v3020_v2   ;;  %s2880_s27 = smov 68   ;;  %s2882_s29 = smov 64   ;;  %v5222_v13 = vmov 6   ;;  %v5218_v15 = vmov 8   ;;  %v2748_v16 = vld [vmem:[%s5197_s7 + $0x4] sm:$0x3] }
  0x14   : > { %s5783_s21 = smov (!%p655_p3, %s2723_s21), 1  ;;  %1303 = vmatprep.mubr.bf16.mxu0 %v5233_v4  ;;  %1353 = vmatprep.mubr.bf16.mxu1 %v5233_v4  ;;  %s5322_s1 = sld [smem:[#allocation32_spill]]  ;;  %v2741_v18 = vld [vmem:[%s5198_s8 + $0x2] sm:$0x3]  ;;  %v5220_v19 = vmov 7   ;;  %v1924_v54 = vld [vmem:[%s5204_s14 + $0x10] sm:$0xff] }
  0x15   : > { %s3028_s23 = sshll.u32 %s5783_s21, 2  ;;  %s3048_s28 = sshll.u32 %s5783_s21, 4  ;;  %v2755_v20 = vld [vmem:[%s5198_s8 + $0x6] sm:$0x3]  ;;  %v694_v24 = vld [vmem:[%s5198_s8] sm:$0x3] }
  0x16   : > { %s2884_s21 = smov 16   ;;  %s2885_s16 = smov 60   ;;  %v1831_v21 = vld [vmem:[%s5202_s12] sm:$0xff]  ;;  %v5331_v57 = vmov 0  ;;  %v5343_v62 = vmov 0 }
  0x17   : > { %2810 = vset.pattern.permute.xlu0 %v5231_v5  ;;  %2808 = vset.pattern.permute.xlu1 %v2877_v3  ;;  %s2886_s2 = smov 17   ;;  %s2888_s24 = smov 15   ;;  %v2749_v30 = vld [vmem:[%s5198_s8 + $0x4] sm:$0x3]  ;;  %v2754_v33 = vld [vmem:[%s5197_s7 + $0x6] sm:$0x3] }
  0x18   : > { %s669_s26 = scalar_lea.vmem %s5321_s3, %s3028_s23  ;;  %793 = vperm.xlu0 %2810, %v3020_v2   ;;  %760 = vperm.xlu1 %2808, %v3020_v2   ;;  %s2890_s25 = smov 4   ;;  %v1752_v42 = vld [vmem:[%s5200_s10] sm:$0xff] }
  0x19   : > { %v3038_v6 = vld.sshfl [vmem:[%s669_s26] sm:$0x33 pattern:$0x76325410]  ;;  %s5214_s0 = smov 1   ;;  %s2893_s30 = smov 124  }
  0x1a   : > { %v3042_v7 = vcombine.high %v3038_v6, %v3038_v6  ;;  %s3057_s22 = scalar_lea.vmem %s5322_s1, %s3048_s28  ;;  %s2894_s3 = smov 8   ;;  %v1817_v44 = vld [vmem:[%s5201_s11] sm:$0xff] }
  0x1b   : > { %v3061_v10 = vld [vmem:[%s3057_s22] sm:$0xff]  ;;  %v3071_v11 = vld [vmem:[%s3057_s22 + $0x8] sm:$0xff]  ;;  %s5210_s26 = smov 127   ;;  %s5216_s1 = smov 112  }
  0x1c   : > { %2809 = vset.pattern.permute.xlu1 %v5231_v5  ;;  %1007 = vrot.lane.b32.xlu0 %v3042_v7, %s2880_s27  ;;  %v3224_v46 = vld [vmem:[%s5195_s5] sm:$0x3] }
  0x1d   : > { %1099 = vperm.xlu1 %2809, %v3015_v1   ;;  %2812 = vset.pattern.permute.xlu0 %v5226_v8  ;;  %v1922_v48 = vld [vmem:[%s5204_s14] sm:$0xff]  ;;  %v1176_v51 = vadd.s32 4, %v3224_v46  ;;  %vm807_vm0 = vcmp.ge.s32.totalorder %v3224_v46, 0  ;;  %vm808_vm1 = vcmp.lt.s32.totalorder %v3224_v46, 16  ;;  %v1012_v53 = vadd.s32 4294967292, %v3224_v46 }
  0x1e   : > { %v3236_v50 = vld [vmem:[%s5196_s6] sm:$0x3]  ;;  %vm3252_vm4 = vmand %vm807_vm0, %vm808_vm1 }
  0x1f   : > { %v3248_v55 = vadd.s32 4294967292, %v3236_v50  ;;  %vm1177_vm2 = vcmp.ge.s32.totalorder %v1176_v51, 0  ;;  %vm1178_vm3 = vcmp.lt.s32.totalorder %v1176_v51, 16  ;;  %v5332_v57 = vsel %vm3252_vm4, 4294967295, %v5331_v57 }
  0x20   : > { %1045 = vrot.lane.b32.xlu0 %v3042_v7, %s2882_s29  ;;  %vm1013_vm5 = vcmp.ge.s32.totalorder %v1012_v53, 0  ;;  %vm1014_vm6 = vcmp.lt.s32.totalorder %v1012_v53, 16  ;;  %vm5228_vm7 = vcmp.ge.s32.totalorder %v3236_v50, 0  ;;  %vm3260_vm9 = vmand %vm1177_vm2, %vm1178_vm3  ;;  %vm5237_vm12 = vcmp.lt.s32.totalorder %v3236_v50, 16 }
  0x21   : > { %2811 = vset.pattern.permute.xlu1 %v5229_v9  ;;  %vm1017_vm8 = vcmp.ge.s32.totalorder %v3248_v55, 0  ;;  %vm833_vm10 = vmand %vm3252_vm4, %vm5228_vm7  ;;  %v3281_v63 = vadd.s32 4, %v3236_v50  ;;  %vm1019_vm15 = vcmp.lt.s32.totalorder %v3248_v55, 16  ;;  %v704_v51 = vadd.s32 4294967295, %v3224_v46 }
  0x22   : > { %1129 = vperm.xlu1 %2811, %v3015_v1   ;;  %vm3270_vm11 = vmand %vm1013_vm5, %vm1014_vm6 }
  0x23   : > { %vm1180_vm13 = vmand %vm3260_vm9, %vm1017_vm8  ;;  %vm1081_vm3 = vcmp.ge.s32.totalorder %v3281_v63, 0 }
  0x24   : > { %1139 = vperm.xlu0 %2812, %v3015_v1   ;;  %vm834_vm14 = vmand %vm833_vm10, %vm5237_vm12 }
  0x25   : > { %vm1050_vm0 = vmand %vm3270_vm11, %vm5228_vm7 }
  0x26   : > { %1005 = vrot.lane.b32.xlu1 %v3038_v6, %s2880_s27  ;;  %s5323_s27 = sld [smem:[#allocation34_spill]]  ;;  %vm1018_vm1 = vmand %vm3270_vm11, %vm1017_vm8 }
  0x27   : > { %vm3301_vm2 = vmand %vm1180_vm13, %vm1019_vm15  ;;  %vm5238_vm13 = vcmp.lt.s32.totalorder %v3281_v63, 16 }
  0x28   : > { %735 = vrot.lane.b32.xlu0 %v3061_v10, %s2884_s21  ;;  %vm1051_vm5 = vmand %vm1050_vm0, %vm5237_vm12 }
  0x29   : > { %vm1020_vm6 = vmand %vm1018_vm1, %vm1019_vm15 }
  0x2a   : > { %1043 = vrot.lane.b32.xlu1 %v3038_v6, %s2882_s29  ;;  %vm1082_vm10 = vmand %vm3270_vm11, %vm1081_vm3 }
  0x2b   : > { %vm1084_vm11 = vmand %vm1082_vm10, %vm5238_vm13  ;;  %vm706_vm10 = vcmp.lt.s32.totalorder %v704_v51, 16 }
  0x2c   : > { %1073 = vrot.lane.b32.xlu0 %v3038_v6, %s2885_s16  ;;  %s674_s29 = scalar_lea.vmem %s5323_s27, %s3028_s23  ;;  %s2896_s27 = smov 120  }
  0x2d   : > { %v3092_v14 = vld.sshfl [vmem:[%s674_s29] sm:$0x33 pattern:$0x76325410]  ;;  %s2899_s29 = smov 113  }
  0x2e   : > { %826 = vperm.xlu1 %2811, %v3020_v2   ;;  %v3103_v17 = vcombine.high %v3092_v14, %v3092_v14 }
  0x30   : > { %849 = vperm.xlu0 %2812, %v3020_v2  }
  0x32   : > { %695 = vrot.lane.b32.xlu1 %v3061_v10, %s2886_s2 }
  0x33   : > { %2813 = vset.pattern.permute.xlu1 %v5224_v12 }
  0x34   : > { %769 = vrot.lane.b32.xlu0 %v3071_v11, %s2888_s24 }
  0x35   : > { %2816 = vset.pattern.permute.xlu0 %v5222_v13 }
  0x36   : > { %697 = vrot.lane.b32.xlu1 %v3071_v11, %s2886_s2 }
  0x38   : > { %1108 = vrot.lane.b32.xlu0 %v3042_v7, %s2890_s25 }
  0x3a   : > { %737 = vrot.lane.b32.xlu1 %v3071_v11, %s2884_s21 }
  0x3c   : > { %1196 = vperm.xlu0 %2816, %v3015_v1  }
  0x3e   : > { %1075 = vrot.lane.b32.xlu1 %v3042_v7, %s2885_s16  ;;  %s5212_s16 = smov 111  }
  0x40   : > { %802 = vrot.lane.b32.xlu0 %v3071_v11, %s5214_s0 }
  0x41   : > { %2821 = vset.pattern.permute.xlu0 %v5218_v15 }
  0x42   : > { %1169 = vperm.xlu1 %2813, %v3015_v1  }
  0x44   : > { %1148 = vrot.lane.b32.xlu0 %v3042_v7, %s2893_s30 }
  0x46   : > { %2814 = vset.pattern.permute.xlu1 %v2877_v3 }
  0x47   : > { %1431 = vperm.xlu1 %2814, %v2748_v16  }
  0x48   : > { %1379 = vrot.lane.b32.xlu0 %v3103_v17, %s2894_s3 }
  0x4b   : > { %767 = vrot.lane.b32.xlu1 %v3061_v10, %s2888_s24 }
  0x4c   : > { %1242 = vperm.xlu0 %2821, %v3015_v1   ;;  %2815 = vset.pattern.permute.xlu1 %v5224_v12 }
  0x4f   : > { %1106 = vrot.lane.b32.xlu1 %v3038_v6, %s2890_s25 }
  0x50   : > { %858 = vrot.lane.b32.xlu0 %v3071_v11, %s5210_s26 }
  0x51   : > { %2824 = vset.pattern.permute.xlu0 %v5224_v12  ;;  %v1085_v12 = vsel %vm1084_vm11, 1, %v5233_v4 }
  0x53   : > { %879 = vperm.xlu1 %2815, %v3020_v2  }
  0x54   : > { %1440 = vrot.lane.b32.xlu0 %v3103_v17, %s2896_s27 }
  0x57   : > { %2817 = vset.pattern.permute.xlu1 %v5231_v5 }
  0x58   : > { %1520 = vperm.xlu0 %2824, %v2748_v16   ;;  %1464 = vperm.xlu1 %2817, %v2748_v16  }
  0x5c   : > { %2825 = vset.pattern.permute.xlu0 %v5233_v4  ;;  %800 = vrot.lane.b32.xlu1 %v3061_v10, %s5214_s0 }
  0x5d   : > { %1036 = vperm.xlu0 %2825, %v3015_v1   ;;  %2818 = vset.pattern.permute.xlu1 %v5222_v13 }
  0x60   : > { %913 = vperm.xlu1 %2818, %v3020_v2  }
  0x61   : > { %1408 = vperm.xlu0 %2825, %v2748_v16  }
  0x64   : > { %2819 = vset.pattern.permute.xlu1 %v5229_v9 }
  0x65   : > { %1251 = vperm.xlu0 %2825, %v2741_v18   ;;  %1487 = vperm.xlu1 %2819, %v2748_v16  }
  0x69   : > { %2826 = vset.pattern.permute.xlu0 %v5220_v19  ;;  %1146 = vrot.lane.b32.xlu1 %v3038_v6, %s2893_s30  ;;  %s5635_s30 = sld [smem:[#allocation31_spill]] }
  0x6a   : > { %1219 = vperm.xlu0 %2826, %v3015_v1   ;;  %2820 = vset.pattern.permute.xlu1 %v5220_v19  ;;  %v715_v1 = vshrl.u32 %v699_v59, 7 }
  0x6d   : > { %1377 = vrot.lane.b32.xlu1 %v3092_v14, %s2894_s3  ;;  %s679_s3 = scalar_lea.vmem %s5194_s4, %s3028_s23 }
  0x6e   : > { %922 = vrot.lane.b32.xlu0 %v3071_v11, %s5216_s1 }
  0x71   : > { %943 = vperm.xlu1 %2820, %v3020_v2  }
  0x72   : > { %1570 = vperm.xlu0 %2826, %v2748_v16  }
  0x75   : > { %2822 = vset.pattern.permute.xlu1 %v5226_v8 }
  0x76   : > { %1497 = vperm.xlu1 %2822, %v2748_v16   ;;  %2829 = vset.pattern.permute.xlu0 %v5218_v15 }
  0x77   : > { %1593 = vperm.xlu0 %2829, %v2748_v16  }
  0x7a   : > { %856 = vrot.lane.b32.xlu1 %v3061_v10, %s5210_s26  ;;  %s5642_s26 = smov 112  }
  0x7b   : > { %2823 = vset.pattern.permute.xlu1 %v5218_v15  ;;  %2831 = vset.pattern.permute.xlu0 %v5233_v4  ;;  %v3365_v15 = vadd.s32 4294967295, %v3236_v50 }
  0x7c   : > { %1691 = vperm.xlu0 %2831, %v2755_v20   ;;  %v3308_v20 = vsub.s32 0, %v715_v1 }
  0x7e   : > { %1438 = vrot.lane.b32.xlu1 %v3092_v14, %s2896_s27  ;;  %5341 = vst [vmem:[#allocation12_spill] sm:$0xff] %v3308_v20  ;;  %s5647_s27 = smov 127  }
  0x80   : > { %1834 = vperm.xlu0 %2831, %v1831_v21  }
  0x82   : > { %973 = vperm.xlu1 %2823, %v3020_v2  }
  0x84   : > { %2834 = vset.pattern.permute.xlu0 %v2877_v3 }
  0x86   : > { %886 = vrot.lane.b32.xlu1 %v3061_v10, %s2899_s29 }
  0x87   : > { %2827 = vset.pattern.permute.xlu1 %v5222_v13 }
  0x8a   : > { %888 = vrot.lane.b32.xlu1 %v3071_v11, %s2899_s29 }
  0x8e   : > { %1547 = vperm.xlu1 %2827, %v2748_v16   ;;  %v5347_v16 = vmov 0 }
  0x92   : > { %v3159_v22 = vpop.permute.xlu1 %728  ;;  %920 = vrot.lane.b32.xlu1 %v3061_v10, %s5216_s1  ;;  %v3163_v23 = vpop.permute.xlu0 %1066  ;;  %s5643_s1 = smov 1  }
  0x93   : > { %5324 = vst [vmem:[#allocation3_spill] sm:$0xff] %v3159_v22  ;;  %2828 = vset.pattern.permute.xlu1 %v5233_v4 }
  0x96   : > { %982 = vperm.xlu1 %2828, %v694_v24   ;;  %v3314_v24 = vsub.s32 1, %v715_v1 }
  0x97   : > { %v3169_v25 = vpop.permute.xlu0 %793  ;;  %v3171_v26 = vpop.permute.xlu1 %760 }
  0x98   : > { %5325 = vst [vmem:[#allocation4_spill] sm:$0xff] %v3169_v25  ;;  %5326 = vst [vmem:[#allocation5_spill] sm:$0xff] %v3171_v26 }
  0x9a   : > { %950 = vrot.lane.b32.xlu1 %v3061_v10, %s5212_s16 }
  0x9b   : > { %v3175_v27 = vpop.permute.xlu0 %1007 }
  0x9c   : > { %v3177_v28 = vpop.permute.xlu1 %1099 }
  0x9e   : > { %952 = vrot.lane.b32.xlu1 %v3071_v11, %s5212_s16  ;;  %s5646_s16 = smov 111  }
  0x9f   : > { %v3181_v29 = vpop.permute.xlu0 %1045 }
  0xa1   : > { %v3186_v31 = vpop.permute.xlu1 %1129 }
  0xa2   : > { %1602 = vperm.xlu1 %2828, %v2749_v30  }
  0xa3   : > { %v3188_v32 = vpop.permute.xlu0 %1139 }
  0xa5   : > { %v3193_v34 = vpop.permute.xlu1 %1005 }
  0xa6   : > { %2830 = vset.pattern.permute.xlu1 %v5226_v8 }
  0xa7   : > { %v3196_v35 = vpop.permute.xlu0 %735  ;;  %1682 = vperm.xlu1 %2830, %v2754_v33   ;;  %v3319_v33 = vand.u32 127, %v699_v59  ;;  %v3341_v59 = vsel %vm3301_vm2, 1, %v5233_v4 }
  0xa9   : > { %v3198_v36 = vpop.permute.xlu1 %1043  ;;  %vm1009_vm1 = vcmp.lt.s32.totalorder %v3319_v33, 68 }
  0xab   : > { %v3200_v37 = vpop.permute.xlu0 %1073  ;;  %2832 = vset.pattern.permute.xlu1 %v5233_v4 }
  0xac   : > { %1755 = vperm.xlu1 %2832, %v1752_v42  }
  0xad   : > { %v3203_v38 = vpop.permute.xlu1 %826 }
  0xae   : > { %5327 = vst [vmem:[#allocation6_spill] sm:$0xff] %v3203_v38 }
  0xaf   : > { %v3205_v39 = vpop.permute.xlu0 %849 }
  0xb0   : > { %5328 = vst [vmem:[#allocation7_spill] sm:$0xff] %v3205_v39  ;;  %1826 = vperm.xlu1 %2832, %v1817_v44   ;;  %v1052_v44 = vsel %vm1051_vm5, 1, %v5233_v4  ;;  %vm3355_vm5 = vmand %vm3252_vm4, %vm1017_vm8  ;;  %vm705_vm8 = vcmp.ge.s32.totalorder %v704_v51, 0  ;;  %v1093_v51 = vrot.slane %v1085_v12, %v3314_v24 }
  0xb1   : > { %v3207_v40 = vpop.permute.xlu1 %695  ;;  %v1056_v1 = vrot.slane %v1052_v44, %v3308_v20 }
  0xb3   : > { %v3209_v41 = vpop.permute.xlu0 %769  ;;  %vm3391_vm11 = vcmp.eq.s32.totalorder %v1056_v1, 1  ;;  %v1089_v1 = vrot.slane %v1085_v12, %v3308_v20  ;;  %v3440_v12 = vsel %vm1009_vm1, %v3193_v34, %v3175_v27 }
  0xb4   : > { %5329 = vst [vmem:[#allocation8_spill] sm:$0xff] %v3209_v41  ;;  %1960 = vperm.xlu1 %2832, %v1922_v48  }
  0xb5   : > { %v3214_v43 = vpop.permute.xlu1 %697 }
  0xb7   : > { %v3219_v45 = vpop.permute.xlu0 %1108 }
  0xb8   : > { %1970 = vperm.xlu1 %2832, %v1924_v54  }
  0xb9   : > { %v3226_v47 = vpop.permute.xlu1 %737 }
  0xbb   : > { %v3231_v49 = vpop.permute.xlu0 %1196 }
  0xbc   : > { %2833 = vset.pattern.permute.xlu1 %v2877_v3  ;;  %v835_v3 = vsel %vm834_vm14, 1, %v5233_v4  ;;  %vm1203_vm14 = vmand %vm3260_vm9, %vm5228_vm7  ;;  %vm1047_vm7 = vcmp.lt.s32.totalorder %v3319_v33, 64 }
  0xbd   : > { %v3239_v52 = vpop.permute.xlu1 %1075  ;;  %2027 = vperm.xlu1 %2833, %v1922_v48   ;;  %v839_v30 = vrot.slane %v835_v3, %v3308_v20  ;;  %v843_v42 = vrot.slane %v835_v3, %v3314_v24 }
  0xbf   : > { %v3250_v56 = vpop.permute.xlu0 %802  ;;  %vm3345_vm0 = vcmp.eq.s32.totalorder %v839_v30, 1  ;;  %vm3359_vm2 = vcmp.eq.s32.totalorder %v843_v42, 1  ;;  %v1060_v30 = vrot.slane %v1052_v44, %v3314_v24  ;;  %v1384_v44 = vadd.s32 4294967288, %v3224_v46 }
  0xc0   : > { %5330 = vst [vmem:[#allocation9_spill] sm:$0xff] %v3250_v56  ;;  %v5344_v62 = vsel %vm3345_vm0, 4294967295, %v5343_v62  ;;  %v5348_v16 = vsel %vm3359_vm2, 4294967295, %v5347_v16  ;;  %v3416_v42 = vsel %vm1047_vm7, %v3198_v36, %v3181_v29  ;;  %v3507_v56 = vadd.s32 1, %v3236_v50 }
  0xc1   : > { %v3256_v58 = vpop.permute.xlu1 %1169  ;;  %2035 = vperm.xlu1 %2833, %v1924_v54   ;;  %v1021_v54 = vsel %vm1020_vm6, 1, %v5233_v4  ;;  %vm1204_vm6 = vmand %vm1203_vm14, %vm5237_vm12  ;;  %vm3399_vm12 = vcmp.eq.s32.totalorder %v1060_v30, 1  ;;  %v3420_v30 = vsel %vm1047_vm7, %v3181_v29, %v3198_v36  ;;  %v3446_v36 = vsel %vm1009_vm1, %v3175_v27, %v3193_v34 }
  0xc2   : > { %v1025_v13 = vrot.slane %v1021_v54, %v3308_v20  ;;  %vm1114_vm14 = vmand %vm3355_vm5, %vm1019_vm15  ;;  %v1029_v5 = vrot.slane %v1021_v54, %v3314_v24  ;;  %vm5244_vm5 = vcmp.ge.s32.totalorder %v3365_v15, 0  ;;  %v1064_v25 = vsel %vm3399_vm12, %v3416_v42, 0.0 }
  0xc3   : > { %v3264_v61 = vpop.permute.xlu0 %1148  ;;  %vm3404_vm15 = vmand %vm705_vm8, %vm706_vm10  ;;  %vm1077_vm8 = vcmp.lt.s32.totalorder %v3319_v33, 60 }
  0xc4   : > { %vm3410_vm13 = vcmp.eq.s32.totalorder %v1025_v13, 1  ;;  %vm3430_vm10 = vcmp.eq.s32.totalorder %v1029_v5, 1  ;;  %vm3452_vm7 = vmand %vm3404_vm15, %vm5244_vm5  ;;  %vm3472_vm5 = vcmp.eq.s32.totalorder %v1089_v1, 1  ;;  %v3490_v55 = vsel %vm1077_vm8, %v3239_v52, %v3200_v37 }
  0xc5   : > { %vm3468_vm1 = vmand %vm3252_vm4, %vm1081_vm3  ;;  %v1096_v3 = vsel %vm3472_vm5, %v3490_v55, 0.0  ;;  %vm5386_vm5 = vcmp.ge.s32.totalorder %v3236_v50, 0 }
  0xc6   : > { %v3283_v0 = vpop.permute.xlu1 %1431  ;;  %vm3496_vm12 = vmand %vm3260_vm9, %vm1081_vm3  ;;  %vm5376_vm9 = vcmp.lt.s32.totalorder %v3281_v63, 16 }
  0xc7   : > { %5337 = vst [vmem:[#allocation10_spill] sm:$0xff] %v3283_v0  ;;  %v3288_v2 = vpop.permute.xlu0 %1379  ;;  %vm3522_vm3 = vmand %vm3468_vm1, %vm5376_vm9  ;;  %v5399_v0 = vrot.slane %v3341_v59, %v3314_v24 }
  0xca   : > { %v3306_v18 = vpop.permute.xlu1 %767 }
  0xcb   : > { %5340 = vst [vmem:[#allocation11_spill] sm:$0xff] %v3306_v18  ;;  %v3312_v21 = vpop.permute.xlu0 %1242  ;;  %v1070_v18 = vmul.f32 %v3163_v23, %v1064_v25 }
  0xce   : > { %v3328_v48 = vpop.permute.xlu1 %1106 }
  0xcf   : > { %v3331_v53 = vpop.permute.xlu0 %858 }
  0xd0   : > { %5342 = vst [vmem:[#allocation13_spill] sm:$0xff] %v3331_v53 }
  0xd2   : > { %v3367_v19 = vpop.permute.xlu1 %879 }
  0xd3   : > { %5349 = vst [vmem:[#allocation14_spill] sm:$0xff] %v3367_v19  ;;  %v3375_v8 = vpop.permute.xlu0 %1440  ;;  %v5352_v19 = vmov 0  }
  0xd4   : > { %v3397_v53 = vsel %vm1204_vm6, 1, %v5352_v19  ;;  %v1115_v9 = vsel %vm1114_vm14, 1, %v5352_v19  ;;  %vm1385_vm14 = vcmp.ge.s32.totalorder %v1384_v44, 0  ;;  %vm1386_vm6 = vcmp.lt.s32.totalorder %v1384_v44, 16 }
  0xd5   : > { %v1209_v29 = vrot.slane %v3397_v53, %v3308_v20  ;;  %v1119_v27 = vrot.slane %v1115_v9, %v3308_v20  ;;  %v1123_v34 = vrot.slane %v1115_v9, %v3314_v24  ;;  %v3484_v9 = vsel %vm1077_vm8, %v3200_v37, %v3239_v52  ;;  %vm3502_vm4 = vmand %vm1385_vm14, %vm1386_vm6 }
  0xd6   : > { %vm1110_vm8 = vcmp.lt.s32.totalorder %v3319_v33, 4  ;;  %v1032_v37 = vsel %vm3410_vm13, %v3446_v36, 0.0  ;;  %v1033_v52 = vsel %vm3430_vm10, %v3440_v12, 0.0  ;;  %vm5379_vm13 = vmmov %vm5376_vm9 }
  0xd7   : > { %v3424_v38 = vpop.permute.xlu1 %1464  ;;  %v3426_v39 = vpop.permute.xlu0 %1520  ;;  %vm3536_vm6 = vmand %vm3496_vm12, %vm5379_vm13  ;;  %vm3540_vm10 = vcmp.eq.s32.totalorder %v1119_v27, 1  ;;  %vm3544_vm14 = vcmp.eq.s32.totalorder %v1123_v34, 1  ;;  %v1111_v13 = vsel %vm1110_vm8, %v3328_v48, %v3219_v45  ;;  %v1112_v27 = vsel %vm1110_vm8, %v3219_v45, %v3328_v48 }
  0xd8   : > { %5359 = vst [vmem:[#allocation15_spill] sm:$0xff] %v3424_v38  ;;  %5360 = vst [vmem:[#allocation16_spill] sm:$0xff] %v3426_v39  ;;  %v1063_v39 = vsel %vm3391_vm11, %v3420_v30, 0.0  ;;  %vm3476_vm11 = vcmp.eq.s32.totalorder %v1093_v51, 1  ;;  %v1213_v45 = vrot.slane %v3397_v53, %v3314_v24  ;;  %v5396_v48 = vrot.slane %v3341_v59, %v3308_v20 }
  0xd9   : > { %vm3552_vm1 = vmand %vm3502_vm4, %vm5386_vm5  ;;  %vm5255_vm13 = vcmp.ge.s32.totalorder %v3507_v56, 0 }
  0xda   : > { %vm5393_vm8 = vmmov %vm5386_vm5  ;;  %vm5402_vm5 = vcmp.lt.s32.totalorder %v3236_v50, 16 }
  0xdb   : > { %v3500_v51 = vpop.permute.xlu1 %800  ;;  %vm3591_vm9 = vmand %vm3404_vm15, %vm5393_vm8 }
  0xdc   : > { %5373 = vst [vmem:[#allocation17_spill] sm:$0xff] %v3500_v51  ;;  %v1037_v60 = vpop.permute.xlu0 %1036  ;;  %v1069_v51 = vmul.f32 %v3163_v23, %v1063_v39  ;;  %v1097_v39 = vsel %vm3476_vm11, %v3484_v9, 0.0  ;;  %vm5390_vm11 = vcmp.lt.s32.totalorder %v3365_v15, 16 }
  0xdd   : > { %v1039_v41 = vmul.f32 %v1037_v60, %v1032_v37  ;;  %v1040_v38 = vmul.f32 %v1037_v60, %v1033_v52  ;;  %vm3576_vm12 = vmand %vm3452_vm7, %vm5390_vm11  ;;  %vm3598_vm7 = vcmp.eq.s32.totalorder %v5396_v48, 1  ;;  %v1103_v60 = vmul.f32 %v3177_v28, %v1097_v39 }
  0xde   : > { %v1228_v48 = vsel %vm3536_vm6, 1, %v5352_v19  ;;  %vm3619_vm11 = vmand %vm3552_vm1, %vm5402_vm5  ;;  %v1527_v39 = vadd.s32 8, %v3224_v46  ;;  %vm3633_vm6 = vcmp.eq.s32.totalorder %v1209_v29, 1  ;;  %v3640_v22 = vsel %vm3576_vm12, 1, %v5352_v19 }
  0xdf   : > { %v1071_v34 = vadd.f32 %v1069_v51, %v1039_v41  ;;  %v1072_v44 = vadd.f32 %v1070_v18, %v1040_v38  ;;  %v3564_v4 = vpop.permute.xlu1 %913  ;;  %v1155_v38 = vsel %vm3522_vm3, 1, %v5352_v19  ;;  %vm3605_vm3 = vcmp.eq.s32.totalorder %v5399_v0, 1  ;;  %vm3665_vm12 = vmand %vm3404_vm15, %vm5255_vm13 }
  0xe0   : > { %5389 = vst [vmem:[#allocation18_spill] sm:$0xff] %v3564_v4  ;;  %v3580_v41 = vpop.permute.xlu0 %1408  ;;  %v1102_v51 = vmul.f32 %v3177_v28, %v1096_v3  ;;  %v1126_v0 = vsel %vm3540_vm10, %v1112_v27, 0.0  ;;  %v1127_v28 = vsel %vm3544_vm14, %v1111_v13, 0.0  ;;  %v3628_v3 = vadd.s32 4294967288, %v3236_v50  ;;  %vm5407_vm10 = vmmov %vm5402_vm5 }
  0xe1   : > { %v1105_v1 = vadd.f32 %v1103_v60, %v1072_v44  ;;  %v1159_v37 = vrot.slane %v1155_v38, %v3308_v20  ;;  %v1163_v63 = vrot.slane %v1155_v38, %v3314_v24  ;;  %v5405_v4 = vmov 0  ;;  %vm3646_vm14 = vmand %vm3591_vm9, %vm5407_vm10 }
  0xe2   : > { %v1104_v23 = vadd.f32 %v1102_v51, %v1071_v34  ;;  %v5406_v4 = vsel %vm3633_vm6, 4294967295, %v5405_v4  ;;  %v1232_v13 = vrot.slane %v1228_v48, %v3308_v20  ;;  %v1236_v29 = vrot.slane %v1228_v48, %v3314_v24 }
  0xe3   : > { %vm3654_vm1 = vcmp.eq.s32.totalorder %v1213_v45, 1  ;;  %v5410_v34 = vmov 0  ;;  %v1417_v44 = vsel %vm3619_vm11, 1, %v5352_v19  ;;  %v1132_v38 = vmul.f32 %v3186_v31, %v1126_v0 }
  0xe4   : > { %v3652_v27 = vpop.permute.xlu1 %1487  ;;  %v5411_v34 = vsel %vm3654_vm1, 4294967295, %v5410_v34  ;;  %v1133_v45 = vmul.f32 %v3186_v31, %v1127_v28  ;;  %v3672_v18 = vpop.permute.xlu0 %1251  ;;  %vm1150_vm9 = vcmp.lt.s32.totalorder %v3319_v33, 124  ;;  %vm5414_vm1 = vcmp.ge.s32.totalorder %v3365_v15, 0 }
  0xe5   : > { %vm5415_vm15 = vnez %v5332_v57  ;;  %v1134_v51 = vadd.f32 %v1132_v38, %v1104_v23  ;;  %vm3684_vm8 = vcmp.eq.s32.totalorder %v1159_v37, 1  ;;  %vm3688_vm6 = vcmp.eq.s32.totalorder %v1163_v63, 1 }
  0xe6   : > { %vm3680_vm13 = vmand %vm5415_vm15, %vm5414_vm1  ;;  %v1135_v60 = vadd.f32 %v1133_v45, %v1105_v1  ;;  %v3695_v59 = vsel %vm3646_vm14, 1, %v5352_v19  ;;  %v1421_v0 = vrot.slane %v1417_v44, %v3308_v20  ;;  %vm5422_vm1 = vcmp.lt.s32.totalorder %v3507_v56, 16 }
  0xe7   : > { %vm3702_vm5 = vmand %vm3665_vm12, %vm5422_vm1  ;;  %vm3706_vm11 = vcmp.eq.s32.totalorder %v1232_v13, 1  ;;  %vm3710_vm10 = vcmp.eq.s32.totalorder %v1236_v29, 1  ;;  %v5429_v63 = vsel %vm3345_vm0, %v3038_v6, 0.0  ;;  %v5430_v52 = vsel %vm3359_vm2, %v3042_v7, 0.0 }
  0xe8   : > { %v1147_v23 = vpop.permute.xlu1 %1146  ;;  %v1142_v25 = vmul.f32 %v3188_v32, %v5429_v63  ;;  %v1143_v13 = vmul.f32 %v3188_v32, %v5430_v52  ;;  %vm5431_vm14 = vcmp.lt.s32.totalorder %v1527_v39, 16  ;;  %vm5432_vm12 = vcmp.ge.s32.totalorder %v1527_v39, 0 }
  0xe9   : > { %v1151_v29 = vsel %vm1150_vm9, %v1147_v23, %v3264_v61  ;;  %v1152_v38 = vsel %vm1150_vm9, %v3264_v61, %v1147_v23  ;;  %vm3732_vm1 = vmand %vm5432_vm12, %vm5431_vm14  ;;  %vm5435_vm0 = vcmp.lt.s32.totalorder %v3365_v15, 16  ;;  %vm5438_vm9 = vcmp.ge.s32.totalorder %v3628_v3, 0 }
  0xea   : > { %vm3740_vm2 = vmand %vm3680_vm13, %vm5435_vm0  ;;  %v1166_v32 = vsel %vm3684_vm8, %v1151_v29, 0.0  ;;  %v1167_v61 = vsel %vm3688_vm6, %v1152_v38, 0.0  ;;  %vm1391_vm12 = vcmp.lt.s32.totalorder %v3628_v3, 16  ;;  %v3758_v45 = vadd.s32 8, %v3236_v50 }
  0xeb   : > { %vm3752_vm14 = vmand %vm3502_vm4, %vm5438_vm9  ;;  %v1144_v54 = vadd.f32 %v1142_v25, %v1134_v51  ;;  %v1145_v23 = vadd.f32 %v1143_v13, %v1135_v60  ;;  %v1172_v31 = vmul.f32 %v3256_v58, %v1166_v32  ;;  %v1173_v48 = vmul.f32 %v3256_v58, %v1167_v61  ;;  %v1220_v25 = vpop.permute.xlu0 %1219 }
  0xec   : > { %vm5441_vm0 = vmmov %vm5438_vm9  ;;  %v1193_v52 = vsel %vm3598_vm7, %v3440_v12, 0.0  ;;  %v1194_v51 = vsel %vm3605_vm3, %v3446_v36, 0.0  ;;  %v1425_v60 = vrot.slane %v1417_v44, %v3314_v24  ;;  %vm3777_vm6 = vcmp.eq.s32.totalorder %v1421_v0, 1  ;;  %v3781_v13 = vpop.permute.xlu1 %1377 }
  0xed   : > { %vm3766_vm13 = vmand %vm5415_vm15, %vm5441_vm0  ;;  %v1199_v12 = vmul.f32 %v3231_v49, %v1193_v52  ;;  %v1200_v36 = vmul.f32 %v3231_v49, %v1194_v51  ;;  %v1174_v53 = vadd.f32 %v1172_v31, %v1144_v54  ;;  %v1175_v44 = vadd.f32 %v1173_v48, %v1145_v23 }
  0xee   : > { %vm5446_vm8 = vmmov %vm5441_vm0  ;;  %vm5451_vm3 = vnez %v5406_v4  ;;  %vm5452_vm0 = vnez %v5411_v34  ;;  %v893_v32 = vadd.s32 1, %v3224_v46  ;;  %v1239_v46 = vsel %vm3706_vm11, %v3484_v9, 0.0  ;;  %v5550_v34 = vld [vmem:[#allocation11_spill] sm:$0xff] }
  0xef   : > { %vm3787_vm9 = vmand %vm3732_vm1, %vm5446_vm8  ;;  %v1216_v29 = vsel %vm5451_vm3, %v3416_v42, 0.0  ;;  %v1217_v38 = vsel %vm5452_vm0, %v3420_v30, 0.0  ;;  %v1201_v61 = vadd.f32 %v1199_v12, %v1174_v53  ;;  %v1202_v39 = vadd.f32 %v1200_v36, %v1175_v44  ;;  %v2743_v30 = vld [vmem:[%s5199_s9 + $0x4] sm:$0xf] }
  0xf0   : > { %vm3797_vm7 = vmand %vm3752_vm14, %vm1391_vm12  ;;  %vm5260_vm14 = vcmp.ge.s32.totalorder %v3758_v45, 0  ;;  %v1222_v4 = vmul.f32 %v1220_v25, %v1216_v29  ;;  %v1223_v42 = vmul.f32 %v1220_v25, %v1217_v38  ;;  %v1240_v54 = vsel %vm3710_vm10, %v3490_v55, 0.0  ;;  %v3835_v23 = vpop.permute.xlu1 %943 }
  0xf1   : > { %vm3811_vm8 = vmand %vm3766_vm13, %vm1391_vm12  ;;  %vm3825_vm13 = vcmp.eq.s32.totalorder %v1425_v60, 1  ;;  %vm5459_vm0 = vcmp.ge.s32.totalorder %v3507_v56, 0  ;;  %v1245_v3 = vmul.f32 %v3312_v21, %v1239_v46  ;;  %v1246_v31 = vmul.f32 %v3312_v21, %v1240_v54 }
  0xf2   : > { %vm3821_vm3 = vmand %vm3787_vm9, %vm1391_vm12  ;;  %v1224_v48 = vadd.f32 %v1222_v4, %v1201_v61  ;;  %v1225_v37 = vadd.f32 %v1223_v42, %v1202_v39  ;;  %v717_v55 = vrot.slane %v3640_v22, %v3308_v20  ;;  %v721_v28 = vrot.slane %v3640_v22, %v3314_v24 }
  0xf3   : > { %vm863_vm12 = vmand %vm5415_vm15, %vm5459_vm0  ;;  %v3859_v21 = vsel %vm3702_vm5, 1, %v5352_v19  ;;  %v1393_v63 = vsel %vm3797_vm7, 1, %v5352_v19  ;;  %vm5465_vm0 = vcmp.lt.s32.totalorder %v3507_v56, 16  ;;  %vm894_vm5 = vcmp.ge.s32.totalorder %v893_v32, 0 }
  0xf4   : > { %vm3848_vm11 = vmand %vm3502_vm4, %vm5260_vm14  ;;  %vm5462_vm4 = vcmp.ge.s32.totalorder %v3236_v50, 0  ;;  %v1248_v52 = vadd.f32 %v1246_v31, %v1225_v37  ;;  %v1247_v1 = vadd.f32 %v1245_v3, %v1224_v48  ;;  %vm895_vm9 = vcmp.lt.s32.totalorder %v893_v32, 16 }
  0xf5   : > { %vm3868_vm10 = vmand %vm3732_vm1, %vm5462_vm4  ;;  %v750_v51 = vrot.slane %v3695_v59, %v3308_v20  ;;  %v754_v60 = vrot.slane %v3695_v59, %v3314_v24  ;;  %v1428_v25 = vsel %vm3777_vm6, %v3103_v17, 0.0  ;;  %v1429_v5 = vsel %vm3825_vm13, %v3092_v14, 0.0  ;;  %v3899_v36 = vpop.permute.xlu1 %1497 }
  0xf6   : > { %vm3874_vm14 = vmand %vm863_vm12, %vm5465_vm0  ;;  %vm5468_vm7 = vcmp.lt.s32.totalorder %v3758_v45, 16  ;;  %v783_v12 = vrot.slane %v3859_v21, %v3308_v20  ;;  %v3897_v59 = vsel %vm3740_vm2, 1, %v5352_v19  ;;  %v1255_v53 = vadd.f32 %v3672_v18, %v1248_v52 }
  0xf7   : > { %vm1449_vm12 = vmand %vm3848_vm11, %vm5468_vm7  ;;  %v1254_v44 = vadd.f32 %v3672_v18, %v1247_v1  ;;  %vm5469_vm4 = vcmp.lt.s32.totalorder %v3236_v50, 16  ;;  %v787_v0 = vrot.slane %v3859_v21, %v3314_v24  ;;  %v1397_v29 = vrot.slane %v1393_v63, %v3308_v20 }
  0xf8   : > { %vm1555_vm0 = vmand %vm3868_vm10, %vm5469_vm4  ;;  %v1473_v7 = vsel %vm3811_vm8, 1, %v5352_v19  ;;  %vm5261_vm2 = vcmask 1040384   ;;  %v1401_v18 = vrot.slane %v1393_v63, %v3314_v24  ;;  %v1259_v61 = vpack.c.bf16 %v1255_v53, %v1255_v53 }
  0xf9   : > { %vm3915_vm11 = vmand %vm894_vm5, %vm895_vm9  ;;  %v1258_v39 = vpack.c.bf16 %v1254_v44, %v1254_v44  ;;  %v1450_v4 = vsel %vm1449_vm12, 1, %v5352_v19  ;;  %vm5472_vm10 = vcmp.ge.s32.totalorder %v3758_v45, 0  ;;  %v816_v32 = vrot.slane %v3897_v59, %v3308_v20  ;;  %v3948_v31 = vpop.permute.xlu1 %856 }
  0xfa   : > { %vm3925_vm7 = vmand %vm5415_vm15, %vm5472_vm10  ;;  %v820_v42 = vrot.slane %v3897_v59, %v3314_v24  ;;  %v1556_v46 = vsel %vm1555_vm0, 1, %v5352_v19  ;;  %v1477_v54 = vrot.slane %v1473_v7, %v3308_v20  ;;  %v1481_v3 = vrot.slane %v1473_v7, %v3314_v24  ;;  %2744 = vmatprep.subr.msk.bf16.mxu0 %vm5261_vm2, %v1259_v61 }
  0xfb   : > { %vm5475_vm9 = vmmov %vm5472_vm10  ;;  %v1266_v48 = vsel %vm5261_vm2, %v1258_v39, 0  ;;  %vm5478_vm4 = vcmp.ge.s32.totalorder %v3365_v15, 0  ;;  %v3962_v37 = vsel %vm3821_vm3, 1, %v5352_v19  ;;  %v3967_v9 = vsel %vm3874_vm14, 1, %v5352_v19 }
  0xfc   : > { %vm3939_vm5 = vmand %vm3732_vm1, %vm5475_vm9  ;;  %1272 = vmatpush1.bf16.msra.mxu0 %v1266_v48  ;;  %v1454_v21 = vrot.slane %v1450_v4, %v3308_v20  ;;  %v1458_v63 = vrot.slane %v1450_v4, %v3314_v24  ;;  %vm5481_vm0 = vcmp.lt.s32.totalorder %v3758_v45, 16  ;;  %vm3983_vm9 = vcmp.eq.s32.totalorder %v1397_v29, 1 }
  0xfd   : > { %vm3955_vm1 = vmand %vm3915_vm11, %vm5478_vm4  ;;  %vm3987_vm4 = vcmp.eq.s32.totalorder %v1401_v18, 1  ;;  %v1560_v1 = vrot.slane %v1556_v46, %v3308_v20  ;;  %v1564_v53 = vrot.slane %v1556_v46, %v3314_v24  ;;  %vm4001_vm2 = vcmp.eq.s32.totalorder %v717_v55, 1  ;;  %v1439_v57 = vpop.permute.xlu1 %1438 }
  0xfe   : > { %vm3975_vm10 = vmand %vm3925_vm7, %vm5481_vm0  ;;  %v5491_v29 = vmov 0  ;;  %vm4005_vm14 = vcmp.eq.s32.totalorder %v721_v28, 1  ;;  %v5493_v7 = vmov 0  ;;  %vm5497_vm3 = vcmp.lt.s32.totalorder %v3365_v15, 16 }
  0xff   : > { %vm5488_vm7 = vmmov %vm5481_vm0  ;;  %v5492_v29 = vsel %vm4001_vm2, 4294967295, %v5491_v29  ;;  %v5494_v7 = vsel %vm4005_vm14, 4294967295, %v5493_v7  ;;  %v1537_v55 = vrot.slane %v3962_v37, %v3308_v20  ;;  %v5500_v61 = vmov 0 }
 0x100   : > { %vm3997_vm0 = vmand %vm3939_vm5, %vm5488_vm7  ;;  %5495 = vst [vmem:[#allocation19_spill] sm:$0xff] %v5494_v7  ;;  %vm4025_vm7 = vcmp.eq.s32.totalorder %v750_v51, 1  ;;  %vm4029_vm8 = vcmp.eq.s32.totalorder %v754_v60, 1  ;;  %v5503_v39 = vmov 0  ;;  %vm4033_vm15 = vcmp.eq.s32.totalorder %v1477_v54, 1 }
 0x101   : > { %vm4017_vm5 = vmand %vm3955_vm1, %vm5497_vm3  ;;  %v5501_v61 = vsel %vm4025_vm7, 4294967295, %v5500_v61  ;;  %v5504_v39 = vsel %vm4029_vm8, 4294967295, %v5503_v39  ;;  %v5506_v15 = vmov 0  ;;  %vm4037_vm1 = vcmp.eq.s32.totalorder %v1481_v3, 1  ;;  %v4134_v49 = vpop.permute.xlu1 %973 }
 0x102   : > { %5502 = vst [vmem:[#allocation20_spill] sm:$0xff] %v5501_v61  ;;  %5505 = vst [vmem:[#allocation21_spill] sm:$0xff] %v5504_v39  ;;  %v5507_v15 = vsel %vm4033_vm15, 4294967295, %v5506_v15  ;;  %v5508_v4 = vmov 0  ;;  %vm5510_vm3 = vcmp.lt.s32.totalorder %v3319_v33, 8  ;;  %vm5516_vm15 = vcmask 15360  }
 0x103   : > { %v5509_v4 = vsel %vm4037_vm1, 4294967295, %v5508_v4  ;;  %v4045_v51 = vsel %vm5510_vm3, %v3781_v13, %v3288_v2  ;;  %vm5511_vm12 = vmmov %vm5510_vm3  ;;  %vm5513_vm1 = vcmp.ge.s32.totalorder %v3236_v50, 0  ;;  %2745 = vmatmul.mubr.msk.bf16.vlgmr.msra.gmra.mrb[0].mxu0 %vm5516_vm15, %v2743_v30  ;;  %vm4071_vm7 = vcmp.eq.s32.totalorder %v787_v0, 1 }
 0x104   : > { %v4051_v60 = vsel %vm5511_vm12, %v3288_v2, %v3781_v13  ;;  %vm4062_vm3 = vmand %vm3915_vm11, %vm5513_vm1  ;;  %vm4067_vm12 = vcmp.eq.s32.totalorder %v783_v12, 1  ;;  %v5517_v2 = vmov 0  ;;  %v5519_v13 = vmov 0  ;;  %1652 = vmatprep.mubr.bf16.mxu0 %v5352_v19 }
 0x105   : > { %v5518_v2 = vsel %vm4067_vm12, 4294967295, %v5517_v2  ;;  %v5520_v13 = vsel %vm4071_vm7, 4294967295, %v5519_v13  ;;  %vm4075_vm8 = vcmp.eq.s32.totalorder %v1454_v21, 1  ;;  %vm4079_vm14 = vcmp.eq.s32.totalorder %v1458_v63, 1  ;;  %v4211_v46 = vpop.permute.xlu1 %886 }
 0x106   : > { %v1506_v6 = vsel %vm3975_vm10, 1, %v5352_v19  ;;  %v4089_v12 = vsel %vm3997_vm0, 1, %v5352_v19  ;;  %vm4093_vm1 = vcmp.eq.s32.totalorder %v1560_v1, 1  ;;  %vm4097_vm7 = vcmp.eq.s32.totalorder %v1564_v53, 1 }
 0x107   : > { %vm5529_vm10 = vcmp.lt.s32.totalorder %v3319_v33, 120  ;;  %v1404_v30 = vsel %vm3983_vm9, %v4045_v51, 0.0  ;;  %v1405_v1 = vsel %vm3987_vm4, %v4051_v60, 0.0  ;;  %v873_v53 = vrot.slane %v3967_v9, %v3314_v24 }
 0x108   : > { %v4104_v63 = vsel %vm5529_vm10, %v1439_v57, %v3375_v8  ;;  %vm5530_vm0 = vmmov %vm5529_vm10  ;;  %v4122_v44 = vsel %vm4017_vm5, 1, %v5352_v19  ;;  %vm5531_vm10 = vcmp.lt.s32.totalorder %v3236_v50, 16  ;;  %v1514_v52 = vrot.slane %v1506_v6, %v3314_v24 }
 0x109   : > { %v4109_v26 = vsel %vm5530_vm0, %v3375_v8, %v1439_v57  ;;  %vm928_vm0 = vmand %vm4062_vm3, %vm5531_vm10  ;;  %v1510_v8 = vrot.slane %v1506_v6, %v3308_v20  ;;  %vm4139_vm9 = vcmp.eq.s32.totalorder %v816_v32, 1  ;;  %v5532_v50 = vmov 0 }
 0x10a   : > { %v5533_v50 = vsel %vm4139_vm9, 4294967295, %v5532_v50  ;;  %vm4146_vm4 = vcmp.eq.s32.totalorder %v820_v42, 1  ;;  %v5534_v45 = vmov 0  ;;  %v1461_v32 = vsel %vm4075_vm8, %v4109_v26, 0.0 }
 0x10b   : > { %v5535_v45 = vsel %vm4146_vm4, 4294967295, %v5534_v45  ;;  %v1462_v59 = vsel %vm4079_vm14, %v4104_v63, 0.0  ;;  %v1411_v42 = vmul.f32 %v3580_v41, %v1404_v30  ;;  %v1412_v57 = vmul.f32 %v3580_v41, %v1405_v1  ;;  %v5548_v1 = vld [vmem:[#allocation15_spill] sm:$0xff] }
 0x10c   : > { %v903_v22 = vrot.slane %v4122_v44, %v3308_v20  ;;  %v929_v54 = vsel %vm928_vm0, 1, %v5352_v19  ;;  %vm5536_vm5 = vcmp.lt.s32.totalorder %v3319_v33, 17  ;;  %vm5538_vm14 = vcmp.lt.s32.totalorder %v3319_v33, 16 }
 0x10d   : > { %v702_v6 = vsel %vm5536_vm5, %v3207_v40, %v3214_v43  ;;  %vm5537_vm8 = vmmov %vm5536_vm5  ;;  %v740_v41 = vsel %vm5538_vm14, %v3196_v35, %v3226_v47  ;;  %vm5540_vm10 = vcmp.ge.s32.totalorder %v3507_v56, 0  ;;  %vm4201_vm5 = vcmp.eq.s32.totalorder %v1510_v8, 1 }
 0x10e   : > { %v703_v3 = vsel %vm5537_vm8, %v3214_v43, %v3207_v40  ;;  %vm5539_vm3 = vmmov %vm5538_vm14  ;;  %v5543_v40 = vld [vmem:[#allocation10_spill] sm:$0xff]  ;;  %v1467_v58 = vmul.f32 %v5548_v1, %v1461_v32  ;;  %v1468_v18 = vmul.f32 %v5548_v1, %v1462_v59  ;;  %vm5551_vm6 = vcmp.lt.s32.totalorder %v3319_v33, 15 }
 0x10f   : > { %v741_v48 = vsel %vm5539_vm3, %v3226_v47, %v3196_v35  ;;  %vm4187_vm0 = vmand %vm3915_vm11, %vm5540_vm10  ;;  %v1434_v43 = vmul.f32 %v5543_v40, %v1428_v25  ;;  %v1435_v35 = vmul.f32 %v5543_v40, %v1429_v5  ;;  %vm4205_vm11 = vcmp.eq.s32.totalorder %v1514_v52, 1  ;;  %v5549_v25 = vld [vmem:[#allocation8_spill] sm:$0xff] }
 0x110   : > { %v772_v28 = vsel %vm5551_vm6, %v5550_v34, %v5549_v25  ;;  %vm5552_vm13 = vmmov %vm5551_vm6  ;;  %v907_v8 = vrot.slane %v4122_v44, %v3314_v24  ;;  %v933_v52 = vrot.slane %v929_v54, %v3308_v20  ;;  %v724_v32 = vsel %vm4001_vm2, %v703_v3, 0.0 }
 0x111   : > { %v773_v5 = vsel %vm5552_vm13, %v5549_v25, %v5550_v34  ;;  %vm5553_vm8 = vnez %v5494_v7  ;;  %v1436_v40 = vadd.f32 %v1434_v43, %v1411_v42  ;;  %v1437_v1 = vadd.f32 %v1435_v35, %v1412_v57  ;;  %v5568_v35 = vld [vmem:[#allocation17_spill] sm:$0xff] }
 0x112   : > { %v725_v59 = vsel %vm5553_vm8, %v702_v6, 0.0  ;;  %vm4232_vm3 = vcmp.eq.s32.totalorder %v1537_v55, 1  ;;  %v5556_v44 = vrot.slane %v3962_v37, %v3314_v24  ;;  %vm5559_vm6 = vcmp.lt.s32.totalorder %v3507_v56, 16 }
 0x113   : > { %vm4247_vm13 = vmand %vm4187_vm0, %vm5559_vm6  ;;  %vm5562_vm14 = vnez %v5501_v61  ;;  %vm5563_vm15 = vnez %v5504_v39  ;;  %vm5564_vm8 = vnez %v5507_v15  ;;  %vm5565_vm2 = vnez %v5509_v4 }
 0x114   : > { %vm4239_vm10 = vcmp.eq.s32.totalorder %v5556_v44, 1  ;;  %v757_v55 = vsel %vm5562_vm14, %v741_v48, 0.0  ;;  %v758_v6 = vsel %vm5563_vm15, %v740_v41, 0.0  ;;  %v1484_v37 = vsel %vm5564_vm8, %v4051_v60, 0.0  ;;  %v889_v48 = vpop.permute.xlu1 %888  ;;  %v5567_v41 = vld [vmem:[#allocation9_spill] sm:$0xff] }
 0x115   : > { %v1485_v56 = vsel %vm5565_vm2, %v4045_v51, 0.0  ;;  %v790_v42 = vsel %vm4067_vm12, %v773_v5, 0.0  ;;  %vm5566_vm0 = vnez %v5520_v13  ;;  %v1469_v30 = vadd.f32 %v1467_v58, %v1436_v40 }
 0x116   : > { %v791_v3 = vsel %vm5566_vm0, %v772_v28, 0.0  ;;  %v1470_v43 = vadd.f32 %v1468_v18, %v1437_v1  ;;  %vm5569_vm15 = vcmp.lt.s32.totalorder %v3319_v33, 1  ;;  %v5571_v5 = vrot.slane %v3967_v9, %v3308_v20  ;;  %v5576_v1 = vld [vmem:[#allocation5_spill] sm:$0xff] }
 0x117   : > { %v805_v15 = vsel %vm5569_vm15, %v5568_v35, %v5567_v41  ;;  %vm5570_vm2 = vmmov %vm5569_vm15  ;;  %vm4281_vm14 = vcmp.eq.s32.totalorder %v873_v53, 1  ;;  %v937_v58 = vrot.slane %v929_v54, %v3314_v24  ;;  %v4289_v40 = vsel %vm4247_vm13, 1, %v5352_v19  ;;  %v5577_v53 = vld [vmem:[#allocation3_spill] sm:$0xff]  ;;  %v5578_v54 = vld [vmem:[#allocation4_spill] sm:$0xff] }
 0x118   : > { %v806_v4 = vsel %vm5570_vm2, %v5567_v41, %v5568_v35  ;;  %vm4277_vm8 = vcmp.eq.s32.totalorder %v5571_v5, 1  ;;  %v763_v44 = vmul.f32 %v5576_v1, %v757_v55  ;;  %v764_v41 = vmul.f32 %v5576_v1, %v758_v6  ;;  %v923_v1 = vpop.permute.xlu0 %922 }
 0x119   : > { %v1490_v9 = vmul.f32 %v3652_v27, %v1484_v37  ;;  %v1491_v35 = vmul.f32 %v3652_v27, %v1485_v56  ;;  %v731_v5 = vmul.f32 %v5577_v53, %v724_v32  ;;  %v732_v39 = vmul.f32 %v5577_v53, %v725_v59  ;;  %v1548_v37 = vpop.permute.xlu1 %1547  ;;  %v5585_v56 = vld [vmem:[#allocation7_spill] sm:$0xff] }
 0x11a   : > { %v796_v61 = vmul.f32 %v5578_v54, %v790_v42  ;;  %v797_v57 = vmul.f32 %v5578_v54, %v791_v3  ;;  %vm4300_vm13 = vcmp.eq.s32.totalorder %v903_v22, 1  ;;  %vm4304_vm2 = vcmp.eq.s32.totalorder %v907_v8, 1 }
 0x11b   : > { %v823_v27 = vsel %vm4139_vm9, %v806_v4, 0.0  ;;  %v824_v32 = vsel %vm4146_vm4, %v805_v15, 0.0  ;;  %v1492_v6 = vadd.f32 %v1490_v9, %v1469_v30  ;;  %v1493_v59 = vadd.f32 %v1491_v35, %v1470_v43 }
 0x11c   : > { %vm5583_vm15 = vnez %v5344_v62  ;;  %vm5586_vm6 = vnez %v5348_v16  ;;  %vm4322_vm9 = vcmp.eq.s32.totalorder %v933_v52, 1  ;;  %v5588_v4 = vmov 0 }
 0x11d   : > { %v5584_v22 = vsel %vm5583_vm15, %v3061_v10, 0.0  ;;  %v5587_v8 = vsel %vm5586_vm6, %v3071_v11, 0.0  ;;  %v5589_v4 = vsel %vm4322_vm9, 4294967295, %v5588_v4  ;;  %vm4326_vm4 = vcmp.eq.s32.totalorder %v937_v58, 1 }
 0x11e   : > { %v852_v42 = vmul.f32 %v5585_v56, %v5584_v22  ;;  %v853_v3 = vmul.f32 %v5585_v56, %v5587_v8  ;;  %v5590_v30 = vmov 0  ;;  %v963_v10 = vrot.slane %v4289_v40, %v3308_v20 }
 0x11f   : > { %v5591_v30 = vsel %vm4326_vm4, 4294967295, %v5590_v30  ;;  %v967_v43 = vrot.slane %v4289_v40, %v3314_v24  ;;  %v765_v15 = vadd.f32 %v763_v44, %v731_v5  ;;  %v766_v9 = vadd.f32 %v764_v41, %v732_v39  ;;  %v5600_v44 = vld [vmem:[#allocation6_spill] sm:$0xff] }
 0x120   : > { %v5592_v11 = vsel %vm5583_vm15, %v3092_v14, 0.0  ;;  %v5593_v58 = vsel %vm5586_vm6, %v3103_v17, 0.0  ;;  %v5594_v53 = vrot.slane %v4089_v12, %v3308_v20  ;;  %v5597_v39 = vrot.slane %v4089_v12, %v3314_v24  ;;  %v921_v12 = vpop.permute.xlu1 %920 }
 0x121   : > { %v1500_v52 = vmul.f32 %v3899_v36, %v5592_v11  ;;  %v1501_v35 = vmul.f32 %v3899_v36, %v5593_v58  ;;  %v829_v41 = vmul.f32 %v5600_v44, %v823_v27  ;;  %v830_v5 = vmul.f32 %v5600_v44, %v824_v32  ;;  %v5601_v58 = vld [vmem:[#allocation13_spill] sm:$0xff] }
 0x122   : > { %vm4347_vm0 = vcmp.eq.s32.totalorder %v5594_v53, 1  ;;  %vm4354_vm12 = vcmp.eq.s32.totalorder %v5597_v39, 1  ;;  %v1517_v36 = vsel %vm4201_vm5, %v4104_v63, 0.0  ;;  %v1518_v22 = vsel %vm4205_vm11, %v4109_v26, 0.0 }
 0x123   : > { %v798_v56 = vadd.f32 %v796_v61, %v765_v15  ;;  %v799_v8 = vadd.f32 %v797_v57, %v766_v9  ;;  %v1502_v11 = vadd.f32 %v1500_v52, %v1492_v6  ;;  %v1503_v24 = vadd.f32 %v1501_v35, %v1493_v59  ;;  %v5604_v57 = vld [vmem:[#allocation16_spill] sm:$0xff]  ;;  %v1571_v35 = vpop.permute.xlu0 %1570 }
 0x124   : > { %vm5602_vm6 = vcmp.lt.s32.totalorder %v3319_v33, 127  ;;  %v1544_v38 = vsel %vm4232_vm3, %v4045_v51, 0.0  ;;  %v1545_v61 = vsel %vm4239_vm10, %v4051_v60, 0.0  ;;  %v1523_v32 = vmul.f32 %v5604_v57, %v1517_v36  ;;  %v983_v53 = vpop.permute.xlu1 %982 }
 0x125   : > { %v861_v27 = vsel %vm5602_vm6, %v3948_v31, %v5601_v58  ;;  %vm5603_vm15 = vmmov %vm5602_vm6  ;;  %v1524_v6 = vmul.f32 %v5604_v57, %v1518_v22  ;;  %v1550_v59 = vmul.f32 %v1548_v37, %v1544_v38  ;;  %v1551_v15 = vmul.f32 %v1548_v37, %v1545_v61  ;;  %v5612_v38 = vld [vmem:[#allocation18_spill] sm:$0xff] }
 0x126   : > { %v862_v47 = vsel %vm5603_vm15, %v5601_v58, %v3948_v31  ;;  %v831_v9 = vadd.f32 %v829_v41, %v798_v56  ;;  %v832_v52 = vadd.f32 %v830_v5, %v799_v8  ;;  %vm5605_vm5 = vcmp.lt.s32.totalorder %v3319_v33, 113 }
 0x127   : > { %v891_v31 = vsel %vm5605_vm5, %v4211_v46, %v889_v48  ;;  %vm5606_vm11 = vmmov %vm5605_vm5  ;;  %v876_v60 = vsel %vm4277_vm8, %v861_v27, 0.0  ;;  %v877_v25 = vsel %vm4281_vm14, %v862_v47, 0.0  ;;  %v1525_v34 = vadd.f32 %v1523_v32, %v1502_v11  ;;  %v1594_v58 = vpop.permute.xlu0 %1593 }
 0x128   : > { %v892_v51 = vsel %vm5606_vm11, %v889_v48, %v4211_v46  ;;  %v1526_v37 = vadd.f32 %v1524_v6, %v1503_v24  ;;  %v5607_v39 = vsel %vm4093_vm1, %v3103_v17, 0.0  ;;  %v5608_v41 = vsel %vm4097_vm7, %v3092_v14, 0.0  ;;  %v5611_v14 = vld [vmem:[#allocation14_spill] sm:$0xff] }
 0x129   : > { %v1573_v44 = vmul.f32 %v1571_v35, %v5607_v39  ;;  %v1574_v5 = vmul.f32 %v1571_v35, %v5608_v41  ;;  %vm5609_vm3 = vcmp.lt.s32.totalorder %v3319_v33, 112  ;;  %v910_v36 = vsel %vm4300_vm13, %v891_v31, 0.0 }
 0x12a   : > { %v925_v46 = vsel %vm5609_vm3, %v921_v12, %v923_v1  ;;  %vm5610_vm10 = vmmov %vm5609_vm3  ;;  %v911_v0 = vsel %vm4304_vm2, %v892_v51, 0.0  ;;  %v1552_v22 = vadd.f32 %v1550_v59, %v1525_v34  ;;  %v1553_v17 = vadd.f32 %v1551_v15, %v1526_v37 }
 0x12b   : > { %v926_v48 = vsel %vm5610_vm10, %v923_v1, %v921_v12  ;;  %v882_v21 = vmul.f32 %v5611_v14, %v876_v60  ;;  %v883_v56 = vmul.f32 %v5611_v14, %v877_v25  ;;  %vm5299_vm7 = vcmp.lt.s32.totalorder %v3319_v33, 111  ;;  %v951_v12 = vpop.permute.xlu1 %950 }
 0x12c   : > { %v855_v8 = vadd.f32 %v853_v3, %v832_v52  ;;  %v854_v1 = vadd.f32 %v852_v42, %v831_v9  ;;  %v940_v11 = vsel %vm4322_vm9, %v925_v46, 0.0  ;;  %v941_v24 = vsel %vm4326_vm4, %v926_v48, 0.0  ;;  %v2756_v3 = vld.sshfl [vmem:[%s679_s3] sm:$0x33 pattern:$0x76325410]  ;;  %s659_s3 = scalar_lea.vmem %s5635_s30, %s3048_s28 }
 0x12d   : > { %v1590_v27 = vsel %vm4347_vm0, %v4109_v26, 0.0  ;;  %v1591_v47 = vsel %vm4354_vm12, %v4104_v63, 0.0  ;;  %v916_v61 = vmul.f32 %v5612_v38, %v910_v36  ;;  %v917_v42 = vmul.f32 %v5612_v38, %v911_v0 }
 0x12e   : > { %vm4427_vm1 = vcmp.eq.s32.totalorder %v963_v10, 1  ;;  %v5613_v57 = vmov 0  ;;  %vm4431_vm6 = vcmp.eq.s32.totalorder %v967_v43, 1  ;;  %v5615_v32 = vmov 0 }
 0x12f   : > { %v5614_v57 = vsel %vm4427_vm1, 4294967295, %v5613_v57  ;;  %v5616_v32 = vsel %vm4431_vm6, 4294967295, %v5615_v32  ;;  %v1575_v6 = vadd.f32 %v1573_v44, %v1552_v22  ;;  %v1576_v54 = vadd.f32 %v1574_v5, %v1553_v17  ;;  %v953_v52 = vpop.permute.xlu1 %952 }
 0x130   : > { %v884_v26 = vadd.f32 %v882_v21, %v854_v1  ;;  %v885_v59 = vadd.f32 %v883_v56, %v855_v8  ;;  %v946_v40 = vmul.f32 %v3835_v23, %v940_v11  ;;  %v947_v63 = vmul.f32 %v3835_v23, %v941_v24 }
 0x131   : > { %v1596_v15 = vmul.f32 %v1594_v58, %v1590_v27  ;;  %v1597_v9 = vmul.f32 %v1594_v58, %v1591_v47  ;;  %v1675_v35 = vcombine.high %v2756_v3, %v2756_v3  ;;  %v955_v43 = vsel %vm5299_vm7, %v951_v12, %v953_v52  ;;  %v2751_v27 = vld [vmem:[%s5199_s9 + $0x8] sm:$0xf]  ;;  %v1692_v47 = vpop.permute.xlu0 %1691 }
 0x132   : > { %v918_v10 = vadd.f32 %v916_v61, %v884_v26  ;;  %v919_v31 = vadd.f32 %v917_v42, %v885_v59  ;;  %v956_v51 = vsel %vm5299_vm7, %v953_v52, %v951_v12  ;;  %v970_v60 = vsel %vm4427_vm1, %v955_v43, 0.0  ;;  %v987_v42 = vld [vmem:[%s5199_s9] sm:$0xf]  ;;  %v2757_v26 = vld [vmem:[%s5199_s9 + $0xc] sm:$0xf] }
 0x133   : > { %v971_v25 = vsel %vm4431_vm6, %v956_v51, 0.0  ;;  %v1598_v34 = vadd.f32 %v1596_v15, %v1575_v6  ;;  %v1599_v23 = vadd.f32 %v1597_v9, %v1576_v54  ;;  %v976_v37 = vmul.f32 %v4134_v49, %v970_v60  ;;  %v1603_v5 = vpop.permute.xlu1 %1602  ;;  %v4475_v9 = vld [vmem:[%s5204_s14 + $0x18] sm:$0xff] }
 0x134   : > { %v977_v39 = vmul.f32 %v4134_v49, %v971_v25  ;;  %v949_v44 = vadd.f32 %v947_v63, %v919_v31  ;;  %v948_v41 = vadd.f32 %v946_v40, %v918_v10  ;;  %vm5617_vm12 = vnez %v5344_v62  ;;  %2039 = vperm.xlu1 %2833, %v4475_v9   ;;  %v4489_v10 = vld [vmem:[%s5204_s14 + $0x10] sm:$0xff]  ;;  %v4496_v31 = vld [vmem:[%s5204_s14] sm:$0xff] }
 0x135   : > { %v1605_v46 = vadd.f32 %v1603_v5, %v1598_v34  ;;  %v1606_v48 = vadd.f32 %v1603_v5, %v1599_v23  ;;  %v1678_v22 = vsel %vm5617_vm12, %v2756_v3, 0.0  ;;  %vm5618_vm0 = vnez %v5348_v16 }
 0x136   : > { %v979_v36 = vadd.f32 %v977_v39, %v949_v44  ;;  %v978_v0 = vadd.f32 %v976_v37, %v948_v41  ;;  %v1679_v17 = vsel %vm5618_vm0, %v1675_v35, 0.0  ;;  %vm5619_vm15 = vcmask 1040384   ;;  %v4482_v35 = vld [vmem:[%s5204_s14 + $0x8] sm:$0xff] }
 0x137   : > { %v1609_v14 = vpack.c.bf16 %v1605_v46, %v1605_v46  ;;  %v1610_v21 = vpack.c.bf16 %v1606_v48, %v1606_v48  ;;  %vm5620_vm5 = vmmov %vm5619_vm15  ;;  %v1683_v11 = vpop.permute.xlu1 %1682  ;;  %vm5623_vm10 = vcmask 15360   ;;  %v5628_v52 = vmov 2   ;;  %2031 = vperm.xlu0 %2834, %v4482_v35  }
 0x138   : > { %v986_v56 = vadd.f32 %v983_v53, %v979_v36  ;;  %v985_v8 = vadd.f32 %v983_v53, %v978_v0  ;;  %v1685_v12 = vmul.f32 %v1683_v11, %v1678_v22  ;;  %v1686_v58 = vmul.f32 %v1683_v11, %v1679_v17  ;;  %vm5621_vm11 = vmmov %vm5620_vm5  ;;  %2836 = vset.pattern.permute.xlu1 %v5628_v52 }
 0x139   : > { %2752 = vmatprep.subr.msk.bf16.mxu0 %vm5619_vm15, %v1610_v21  ;;  %v1615_v49 = vsel %vm5620_vm5, %v1609_v14, 0  ;;  %vm5622_vm3 = vmmov %vm5620_vm5  ;;  %2095 = vperm.xlu1 %2836, %v4482_v35   ;;  %v5629_v43 = vmov 3   ;;  %v5630_v25 = vmov 4   ;;  %v5631_v22 = vmov 5  }
 0x13a   : > { %v989_v1 = vpack.c.bf16 %v986_v56, %v986_v56  ;;  %v988_v24 = vpack.c.bf16 %v985_v8, %v985_v8  ;;  %1621 = vmatpush1.bf16.msra.mxu0 %v1615_v49  ;;  %v1694_v53 = vadd.f32 %v1692_v47, %v1685_v12  ;;  %v1695_v61 = vadd.f32 %v1692_v47, %v1686_v58  ;;  %vm5624_vm15 = vmmov %vm5623_vm10 }
 0x13b   : > { %vm5625_vm5 = vmmov %vm5622_vm3  ;;  %2835 = vset.pattern.permute.xlu0 %v5628_v52  ;;  %v1756_v21 = vpop.permute.xlu1 %1755  ;;  %v5632_v12 = vmov 6   ;;  %vm5675_vm6 = vcmp.lt.s32.totalorder %v3319_v33, 16 }
 0x13c   : > { %2746 = vmatprep.subr.msk.bf16.mxu1 %vm5621_vm11, %v989_v1  ;;  %v1316_v38 = vsel %vm5622_vm3, %v988_v24, 0  ;;  %v1699_v3 = vpack.c.bf16 %v1695_v61, %v1695_v61  ;;  %v1698_v6 = vpack.c.bf16 %v1694_v53, %v1694_v53  ;;  %vm5626_vm11 = vmmov %vm5622_vm3  ;;  %2091 = vperm.xlu0 %2835, %v4496_v31  }
 0x13d   : > { %1322 = vmatpush1.bf16.msra.mxu1 %v1316_v38  ;;  %2753 = vmatmul.mubr.msk.bf16.vlgmr.msra.gmra.mrb[4].mxu0 %vm5623_vm10, %v2751_v27  ;;  %vm5627_vm3 = vmmov %vm5623_vm10  ;;  %vm1862_vm10 = vcmask 1043456  }
 0x13e   : > { %1901 = vmatprep.mubr.bf16.mxu0 %v5352_v19  ;;  %2758 = vmatprep.subr.msk.bf16.mxu1 %vm5625_vm5, %v1699_v3  ;;  %v1704_v54 = vsel %vm5626_vm11, %v1698_v6, 0  ;;  %vm5664_vm5 = vcmp.lt.s32.totalorder %v3319_v33, 15 }
 0x13f   : > { %2099 = vperm.xlu1 %2836, %v4489_v10   ;;  %vm5665_vm11 = vmmov %vm5664_vm5 }
 0x140   : > { %2747 = vmatmul.mubr.msk.bf16.vlgmr.msra.gmra.mrb[0].mxu1 %vm5624_vm15, %v987_v42  ;;  %2103 = vperm.xlu0 %2835, %v4475_v9   ;;  %vm1855_vm15 = vcmask 64512  }
 0x141   : > { %1741 = vmatprep.mubr.bf16.mxu1 %v5352_v19  ;;  %1710 = vmatpush1.bf16.msra.mxu1 %v1704_v54  ;;  %v5633_v54 = vmov 7  }
 0x143   : > { %2837 = vset.pattern.permute.xlu1 %v5629_v43 }
 0x144   : > { %2155 = vperm.xlu1 %2837, %v4496_v31   ;;  %2838 = vset.pattern.permute.xlu0 %v5629_v43 }
 0x145   : > { %2159 = vperm.xlu0 %2838, %v4482_v35  }
 0x148   : > { %2759 = vmatmul.mubr.msk.bf16.vlgmr.msra.gmra.mrb[4].mxu1 %vm5627_vm3, %v2757_v26  ;;  %2163 = vperm.xlu1 %2837, %v4489_v10   ;;  %v5634_v26 = vmov 8   ;;  %vm5666_vm3 = vcmp.lt.s32.totalorder %v3319_v33, 17 }
 0x149   : > { %2609 = vmatprep.mubr.bf16.mxu1 %v5352_v19  ;;  %2839 = vset.pattern.permute.xlu0 %v5630_v25 }
 0x14a   : > { %2195 = vperm.xlu0 %2839, %v4496_v31  }
 0x14c   : > { %2167 = vperm.xlu1 %2837, %v4475_v9  }
 0x14e   : > { %2207 = vperm.xlu0 %2839, %v4475_v9  }
 0x150   : > { %2840 = vset.pattern.permute.xlu1 %v5630_v25  ;;  %v1780_v25 = vld [vmem:[%s659_s3] sm:$0xff] }
 0x151   : > { %2199 = vperm.xlu1 %2840, %v4482_v35  }
 0x152   : > { %2842 = vset.pattern.permute.xlu0 %v5631_v22 }
 0x153   : > { %2263 = vperm.xlu0 %2842, %v4482_v35  }
 0x155   : > { %2203 = vperm.xlu1 %2840, %v4489_v10  }
 0x157   : > { %2843 = vset.pattern.permute.xlu0 %v5632_v12 }
 0x158   : > { %2323 = vperm.xlu0 %2843, %v4496_v31  }
 0x159   : > { %2841 = vset.pattern.permute.xlu1 %v5631_v22 }
 0x15a   : > { %2259 = vperm.xlu1 %2841, %v4496_v31  }
 0x15c   : > { %2335 = vperm.xlu0 %2843, %v4475_v9  }
 0x15e   : > { %2267 = vperm.xlu1 %2841, %v4489_v10  }
 0x160   : > { %2846 = vset.pattern.permute.xlu0 %v5633_v54 }
 0x161   : > { %2391 = vperm.xlu0 %2846, %v4482_v35  }
 0x162   : > { %2271 = vperm.xlu1 %2841, %v4475_v9  }
 0x165   : > { %2847 = vset.pattern.permute.xlu0 %v5634_v26 }
 0x166   : > { %2844 = vset.pattern.permute.xlu1 %v5632_v12  ;;  %2451 = vperm.xlu0 %2847, %v4496_v31  }
 0x167   : > { %2327 = vperm.xlu1 %2844, %v4482_v35  }
 0x16a   : > { %2463 = vperm.xlu0 %2847, %v4475_v9  }
 0x16b   : > { %2331 = vperm.xlu1 %2844, %v4489_v10  }
 0x16e   : > { %2849 = vset.pattern.permute.xlu0 %v5352_v19 }
 0x16f   : > { %2845 = vset.pattern.permute.xlu1 %v5633_v54  ;;  %1965 = vperm.xlu0 %2849, %v4482_v35  }
 0x170   : > { %2387 = vperm.xlu1 %2845, %v4496_v31  }
 0x173   : > { %1975 = vperm.xlu0 %2849, %v4475_v9  }
 0x174   : > { %2395 = vperm.xlu1 %2845, %v4489_v10  }
 0x178   : > { %2399 = vperm.xlu1 %2845, %v4475_v9  }
 0x17c   : > { %2848 = vset.pattern.permute.xlu1 %v5634_v26 }
 0x17d   : > { %2455 = vperm.xlu1 %2848, %v4482_v35  }
 0x181   : > { %2459 = vperm.xlu1 %2848, %v4489_v10  }
 0x185   : > { %2850 = vset.pattern.permute.xlu1 %v5352_v19 }
 0x1d6   : > { %v1305_v59 = vpop.f32.mrb[0].mxu0 }
 0x1d7   : > { %v1307_v40 = vpop.f32.mrb[1].mxu0 }
 0x1d8   : > { %v1309_v63 = vpop.f32.mrb[2].mxu0 }
 0x1d9   : > { %v1310_v15 = vpop.f32.mrb[3].mxu0 }
 0x210   : > { %v1654_v51 = vpop.f32.mrb[4].mxu0 }
 0x211   : > { %v1656_v60 = vpop.f32.mrb[5].mxu0 }
 0x212   : > { %v1658_v23 = vpop.f32.mrb[6].mxu0 }
 0x213   : > { %v1355_v34 = vpop.f32.mrb[0].mxu1  ;;  %v1659_v44 = vpop.f32.mrb[7].mxu0 }
 0x214   : > { %v1356_v37 = vadd.f32 %v1355_v34, %v1305_v59  ;;  %v1357_v39 = vpop.f32.mrb[1].mxu1  ;;  %v2867_v34 = vld [vmem:[%s3057_s22] sm:$0xff] }
 0x215   : > { %v1358_v41 = vadd.f32 %v1357_v39, %v1307_v40  ;;  %v1359_v5 = vpop.f32.mrb[2].mxu1  ;;  %v2868_v39 = vld [vmem:[%s3057_s22 + $0x8] sm:$0xff] }
 0x216   : > { %v1661_v46 = vadd.f32 %v1654_v51, %v1356_v37  ;;  %v1360_v48 = vpop.f32.mrb[3].mxu1  ;;  %v1781_v37 = vld [vmem:[%s659_s3 + $0x8] sm:$0xff] }
 0x217   : > { %v1662_v36 = vadd.f32 %v1656_v60, %v1358_v41 }
 0x21b   : > { %v1743_v0 = vpop.f32.mrb[4].mxu1 }
 0x21c   : > { %v1750_v17 = vadd.f32 %v1743_v0, %v1661_v46  ;;  %v1745_v14 = vpop.f32.mrb[5].mxu1 }
 0x21d   : > { %v1751_v56 = vadd.f32 %v1745_v14, %v1662_v36  ;;  %v1747_v8 = vpop.f32.mrb[6].mxu1 }
 0x21e   : > { %v1758_v49 = vadd.f32 %v1756_v21, %v1750_v17  ;;  %v1748_v1 = vpop.f32.mrb[7].mxu1 }
 0x21f   : > { %v1759_v11 = vadd.f32 %v1756_v21, %v1751_v56 }
 0x220   : > { %v1762_v24 = vmul.f32 0.044715, %v1758_v49  ;;  %v1760_v63 = vmul.f32 0.5, %v1758_v49 }
 0x221   : > { %v1763_v58 = vmul.f32 0.044715, %v1759_v11  ;;  %v1761_v52 = vmul.f32 0.5, %v1759_v11 }
 0x222   : > { %v1764_v27 = vmul.f32 %v1762_v24, %v1758_v49 }
 0x223   : > { %v1765_v47 = vmul.f32 %v1763_v58, %v1759_v11 }
 0x224   : > { %v1766_v38 = vmul.f32 %v1764_v27, %v1758_v49 }
 0x225   : > { %v1767_v53 = vmul.f32 %v1765_v47, %v1759_v11 }
 0x226   : > { %v1768_v61 = vadd.f32 %v1766_v38, %v1758_v49 }
 0x227   : > { %v1769_v42 = vadd.f32 %v1767_v53, %v1759_v11 }
 0x228   : > { %v1770_v3 = vmul.f32 0.7978846, %v1768_v61 }
 0x229   : > { %v1771_v6 = vmul.f32 0.7978846, %v1769_v42 }
 0x22a   : > { %2853 = vtanh.f32 %v1770_v3 }
 0x22b   : > { %2855 = vtanh.f32 %v1771_v6 }
 0x234   : > { %v2854_v59 = vpop.eup %2853 }
 0x235   : > { %v2856_v40 = vpop.eup %2855  ;;  %v1774_v15 = vadd.f32 1.0, %v2854_v59 }
 0x236   : > { %v1775_v43 = vadd.f32 1.0, %v2856_v40 }
 0x237   : > { %v1776_v51 = vmul.f32 %v1774_v15, %v1760_v63 }
 0x238   : > { %v1777_v60 = vmul.f32 %v1775_v43, %v1761_v52 }
 0x239   : > { %v1778_v23 = vmul.f32 %v2867_v34, %v1776_v51 }
 0x23a   : > { %v1779_v44 = vmul.f32 %v2868_v39, %v1777_v60  ;;  %v1827_v60 = vpop.permute.xlu1 %1826 }
 0x23b   : > { %v4540_v41 = vadd.f32 %v1780_v25, %v1778_v23  ;;  %v1835_v23 = vpop.permute.xlu0 %1834 }
 0x23c   : > { %v4542_v5 = vadd.f32 %v1781_v37, %v1779_v44 }
 0x23d   : > { %5636 = vst [vmem:[#allocation10_spill] sm:$0xff] %v4540_v41  ;;  %v1784_v31 = vrot.slane %v4540_v41, 4 }
 0x23e   : > { %5637 = vst [vmem:[#allocation15_spill] sm:$0xff] %v4542_v5  ;;  %v1790_v46 = vrot.slane %v4542_v5, 4 }
 0x23f   : > { %v1785_v48 = vadd.f32 %v1784_v31, %v4540_v41 }
 0x240   : > { %v1791_v36 = vadd.f32 %v1790_v46, %v4542_v5 }
 0x241   : > { %v1786_v0 = vrot.slane %v1785_v48, 2 }
 0x242   : > { %v1792_v22 = vrot.slane %v1791_v36, 2 }
 0x243   : > { %v1787_v17 = vadd.f32 %v1786_v0, %v1785_v48  ;;  %v2852_v0 = vld [vmem:[%s5203_s13 + $0x8] sm:$0xff]  }
 0x244   : > { %v1793_v14 = vadd.f32 %v1792_v22, %v1791_v36  ;;  %v2851_v36 = vld [vmem:[%s5203_s13] sm:$0xff]   ;;  %v4563_v22 = vpop.permute.xlu0 %2031 }
 0x245   : > { %v1788_v21 = vrot.slane %v1787_v17, 1 }
 0x246   : > { %v1794_v56 = vrot.slane %v1793_v14, 1 }
 0x247   : > { %v1789_v8 = vadd.f32 %v1788_v21, %v1787_v17 }
 0x248   : > { %v1795_v9 = vadd.f32 %v1794_v56, %v1793_v14  ;;  %v4565_v17 = vpop.permute.xlu0 %2091  ;;  %v4567_v14 = vpop.permute.xlu1 %1960 }
 0x249   : > { %v1797_v49 = vmul.f32 0.125, %v1789_v8 }
 0x24a   : > { %v1798_v1 = vmul.f32 0.125, %v1795_v9 }
 0x24b   : > { %v1799_v11 = vsub.f32 %v4540_v41, %v1797_v49 }
 0x24c   : > { %v1800_v24 = vsub.f32 %v4542_v5, %v1798_v1  ;;  %v4569_v21 = vpop.permute.xlu0 %2103  ;;  %v4571_v56 = vpop.permute.xlu1 %1970 }
 0x24d   : > { %v1801_v12 = vmul.f32 %v1799_v11, %v1799_v11  ;;  %5638 = vst [vmem:[#allocation8_spill] sm:$0xff] %v4569_v21  ;;  %5639 = vst [vmem:[#allocation11_spill] sm:$0xff] %v4571_v56 }
 0x24e   : > { %v1802_v58 = vmul.f32 %v1800_v24, %v1800_v24 }
 0x24f   : > { %v1803_v27 = vrot.slane %v1801_v12, 4 }
 0x250   : > { %v1809_v35 = vrot.slane %v1802_v58, 4  ;;  %v4573_v8 = vpop.permute.xlu0 %2159  ;;  %v4583_v49 = vpop.permute.xlu1 %2027 }
 0x251   : > { %v1804_v47 = vadd.f32 %v1803_v27, %v1801_v12 }
 0x252   : > { %v1810_v38 = vadd.f32 %v1809_v35, %v1802_v58 }
 0x253   : > { %v1805_v53 = vrot.slane %v1804_v47, 2 }
 0x254   : > { %v1811_v61 = vrot.slane %v1810_v38, 2  ;;  %v4595_v12 = vpop.permute.xlu1 %2035 }
 0x255   : > { %v1806_v42 = vadd.f32 %v1805_v53, %v1804_v47  ;;  %5640 = vst [vmem:[#allocation9_spill] sm:$0xff] %v4595_v12 }
 0x256   : > { %v1812_v10 = vadd.f32 %v1811_v61, %v1810_v38 }
 0x257   : > { %v1807_v3 = vrot.slane %v1806_v42, 1 }
 0x258   : > { %v1813_v6 = vrot.slane %v1812_v10, 1 }
 0x259   : > { %v1808_v54 = vadd.f32 %v1807_v3, %v1806_v42  ;;  %v4623_v3 = vpop.permute.xlu1 %2039 }
 0x25a   : > { %v1814_v26 = vadd.f32 %v1813_v6, %v1812_v10  ;;  %5649 = vst [vmem:[#allocation7_spill] sm:$0xff] %v4623_v3 }
 0x25b   : > { %v1815_v59 = vmul.f32 0.125, %v1808_v54 }
 0x25c   : > { %v1816_v40 = vmul.f32 0.125, %v1814_v26 }
 0x25d   : > { %v1818_v63 = vadd.f32 1e-06, %v1815_v59  ;;  %v4629_v6 = vpop.permute.xlu1 %2095 }
 0x25e   : > { %v1819_v15 = vadd.f32 1e-06, %v1816_v40 }
 0x25f   : > { %2857 = vrsqrt.f32 %v1818_v63 }
 0x260   : > { %2859 = vrsqrt.f32 %v1819_v15 }
 0x261   : > { %v4639_v54 = vpop.permute.xlu1 %2099 }
 0x262   : > { %5650 = vst [vmem:[#allocation6_spill] sm:$0xff] %v4639_v54 }
 0x265   : > { %v4645_v26 = vpop.permute.xlu1 %2155 }
 0x269   : > { %v2858_v52 = vpop.eup %2857  ;;  %v4655_v59 = vpop.permute.xlu1 %2163 }
 0x26a   : > { %v2860_v43 = vpop.eup %2859  ;;  %v1822_v51 = vmul.f32 %v2858_v52, %v1799_v11  ;;  %5651 = vst [vmem:[#allocation13_spill] sm:$0xff] %v4655_v59 }
 0x26b   : > { %v1823_v25 = vmul.f32 %v2860_v43, %v1800_v24  ;;  %v4589_v24 = vpop.permute.xlu0 %2195 }
 0x26c   : > { %v1829_v34 = vmul.f32 %v1827_v60, %v1822_v51 }
 0x26d   : > { %v1830_v37 = vmul.f32 %v1827_v60, %v1823_v25  ;;  %v4661_v40 = vpop.permute.xlu1 %2167 }
 0x26e   : > { %v1837_v39 = vadd.f32 %v1835_v23, %v1829_v34  ;;  %5652 = vst [vmem:[#allocation16_spill] sm:$0xff] %v4661_v40 }
 0x26f   : > { %v1838_v44 = vadd.f32 %v1835_v23, %v1830_v37  ;;  %v2208_v35 = vpop.permute.xlu0 %2207 }
 0x270   : > { %v1843_v31 = vpack.c.bf16 %v1837_v39, %v1837_v39 }
 0x271   : > { %v1844_v46 = vpack.c.bf16 %v1838_v44, %v1838_v44  ;;  %v4671_v63 = vpop.permute.xlu1 %2199 }
 0x272   : > { %v1864_v48 = vsel %vm1862_vm10, %v1843_v31, 0 }
 0x273   : > { %2762 = vmatprep.subr.msk.bf16.mxu0 %vm1862_vm10, %v1844_v46  ;;  %v4695_v51 = vpop.permute.xlu0 %2263  ;;  %vm5667_vm10 = vmmov %vm5666_vm3 }
 0x274   : > { %1870 = vmatpush1.bf16.msra.mxu0 %v1864_v48 }
 0x275   : > { %v4677_v15 = vpop.permute.xlu1 %2203 }
 0x276   : > { %5653 = vst [vmem:[#allocation14_spill] sm:$0xff] %v4677_v15 }
 0x277   : > { %2763 = vmatmul.mubr.msk.bf16.vlgmr.msra.gmra.mrb[8].mxu0 %vm1855_vm15, %v2851_v36  ;;  %v4707_v25 = vpop.permute.xlu0 %2323 }
 0x278   : > { %1911 = vmatprep.mubr.bf16.mxu0 %v5352_v19 }
 0x279   : > { %v4683_v52 = vpop.permute.xlu1 %2259 }
 0x27b   : > { %v4715_v23 = vpop.permute.xlu0 %2335 }
 0x27c   : > { %5656 = vst [vmem:[#allocation23_spill] sm:$0xff] %v4715_v23  ;;  %v2529_v23 = vld [vmem:[%s5207_s17 + $0x8] sm:$0xff] }
 0x27d   : > { %v4693_v43 = vpop.permute.xlu1 %2267  ;;  %v5738_v16 = vld [vmem:[#allocation14_spill] sm:$0xff] }
 0x27e   : > { %5654 = vst [vmem:[#allocation18_spill] sm:$0xff] %v4693_v43 }
 0x27f   : > { %2764 = vmatmul.mubr.msk.bf16.gmra.mrb[12].mxu0 %vm1855_vm15, %v2852_v0  ;;  %v4727_v39 = vpop.permute.xlu0 %2391  ;;  %vm5668_vm15 = vnez %v5518_v2 }
 0x281   : > { %v4701_v60 = vpop.permute.xlu1 %2271 }
 0x282   : > { %5655 = vst [vmem:[#allocation22_spill] sm:$0xff] %v4701_v60  ;;  %v2486_v60 = vld [vmem:[%s5205_s15] sm:$0xff] }
 0x283   : > { %v4735_v31 = vpop.permute.xlu0 %2451 }
 0x285   : > { %v4709_v34 = vpop.permute.xlu1 %2327 }
 0x287   : > { %v4747_v48 = vpop.permute.xlu0 %2463 }
 0x288   : > { %5659 = vst [vmem:[#allocation26_spill] sm:$0xff] %v4747_v48 }
 0x289   : > { %v4721_v37 = vpop.permute.xlu1 %2331 }
 0x28a   : > { %5657 = vst [vmem:[#allocation24_spill] sm:$0xff] %v4721_v37 }
 0x28b   : > { %v4755_v0 = vpop.permute.xlu0 %1965 }
 0x28d   : > { %v4729_v44 = vpop.permute.xlu1 %2387 }
 0x291   : > { %v4741_v46 = vpop.permute.xlu1 %2395 }
 0x292   : > { %5658 = vst [vmem:[#allocation25_spill] sm:$0xff] %v4741_v46 }
 0x295   : > { %v4749_v36 = vpop.permute.xlu1 %2399 }
 0x296   : > { %5660 = vst [vmem:[#allocation27_spill] sm:$0xff] %v4749_v36  ;;  %v2487_v36 = vld [vmem:[%s5205_s15 + $0x8] sm:$0xff] }
 0x34a   : > { %v4575_v9 = vpop.f32.mrb[8].mxu0 }
 0x34b   : > { %2058 = vrot.lane.b32.xlu1 %v4575_v9, %s2888_s24  ;;  %1926 = vrot.lane.b32.xlu0 %v4575_v9, %s2886_s2  ;;  %v4581_v19 = vpop.f32.mrb[9].mxu0 }
 0x34c   : > { %v4585_v1 = vpop.f32.mrb[10].mxu0 }
 0x34d   : > { %v4587_v11 = vpop.f32.mrb[11].mxu0 }
 0x34f   : > { %2290 = vrot.lane.b32.xlu1 %v4575_v9, %s2899_s29  ;;  %1994 = vrot.lane.b32.xlu0 %v4575_v9, %s2884_s21 }
 0x352   : > { %v4597_v58 = vpop.f32.mrb[12].mxu0 }
 0x353   : > { %5641 = vst [vmem:[#allocation17_spill] sm:$0xff] %v4597_v58  ;;  %2354 = vrot.lane.b32.xlu1 %v4575_v9, %s5642_s26  ;;  %2122 = vrot.lane.b32.xlu0 %v4575_v9, %s5643_s1  ;;  %v4603_v27 = vpop.f32.mrb[13].mxu0 }
 0x354   : > { %5644 = vst [vmem:[#allocation5_spill] sm:$0xff] %v4603_v27  ;;  %v4605_v47 = vpop.f32.mrb[14].mxu0 }
 0x355   : > { %v4607_v38 = vpop.f32.mrb[15].mxu0  ;;  %v2192_v53 = vsel %vm5617_vm12, %v4605_v47, 0.0 }
 0x356   : > { %v2193_v61 = vsel %vm5618_vm0, %v4607_v38, 0.0  ;;  %v4615_v42 = vmul.f32 %v2208_v35, %v2192_v53  ;;  %v4767_v53 = vpop.permute.xlu0 %1975 }
 0x357   : > { %2418 = vrot.lane.b32.xlu1 %v4575_v9, %s5646_s16  ;;  %2226 = vrot.lane.b32.xlu0 %v4575_v9, %s5647_s27  ;;  %v4621_v10 = vmul.f32 %v2208_v35, %v2193_v61  ;;  %v4757_v35 = vpop.permute.xlu1 %2455  ;;  %5662 = vst [vmem:[#allocation29_spill] sm:$0xff] %v4767_v53 }
 0x358   : > { %5645 = vst [vmem:[#allocation3_spill] sm:$0xff] %v4615_v42  ;;  %5661 = vst [vmem:[#allocation28_spill] sm:$0xff] %v4757_v35 }
 0x359   : > { %5648 = vst [vmem:[#allocation4_spill] sm:$0xff] %v4621_v10 }
 0x35b   : > { %2066 = vrot.lane.b32.xlu1 %v4581_v19, %s2888_s24  ;;  %1934 = vrot.lane.b32.xlu0 %v4581_v19, %s2886_s2  ;;  %v4769_v61 = vpop.permute.xlu1 %2459 }
 0x35c   : > { %5663 = vst [vmem:[#allocation30_spill] sm:$0xff] %v4769_v61 }
 0x35f   : > { %2298 = vrot.lane.b32.xlu1 %v4581_v19, %s2899_s29  ;;  %2002 = vrot.lane.b32.xlu0 %v4581_v19, %s2884_s21 }
 0x363   : > { %2362 = vrot.lane.b32.xlu1 %v4581_v19, %s5642_s26  ;;  %2130 = vrot.lane.b32.xlu0 %v4581_v19, %s5643_s1 }
 0x367   : > { %2426 = vrot.lane.b32.xlu1 %v4581_v19, %s5646_s16  ;;  %2234 = vrot.lane.b32.xlu0 %v4581_v19, %s5647_s27 }
 0x36b   : > { %2060 = vrot.lane.b32.xlu0 %v4585_v1, %s2888_s24  ;;  %1928 = vrot.lane.b32.xlu1 %v4585_v1, %s2886_s2 }
 0x36f   : > { %2292 = vrot.lane.b32.xlu0 %v4585_v1, %s2899_s29  ;;  %1996 = vrot.lane.b32.xlu1 %v4585_v1, %s2884_s21 }
 0x373   : > { %2356 = vrot.lane.b32.xlu0 %v4585_v1, %s5642_s26  ;;  %2124 = vrot.lane.b32.xlu1 %v4585_v1, %s5643_s1 }
 0x377   : > { %2420 = vrot.lane.b32.xlu0 %v4585_v1, %s5646_s16  ;;  %2228 = vrot.lane.b32.xlu1 %v4585_v1, %s5647_s27 }
 0x37b   : > { %2068 = vrot.lane.b32.xlu0 %v4587_v11, %s2888_s24  ;;  %1936 = vrot.lane.b32.xlu1 %v4587_v11, %s2886_s2 }
 0x37f   : > { %2300 = vrot.lane.b32.xlu0 %v4587_v11, %s2899_s29  ;;  %2004 = vrot.lane.b32.xlu1 %v4587_v11, %s2884_s21 }
 0x383   : > { %2364 = vrot.lane.b32.xlu0 %v4587_v11, %s5642_s26  ;;  %2132 = vrot.lane.b32.xlu1 %v4587_v11, %s5643_s1 }
 0x387   : > { %2428 = vrot.lane.b32.xlu0 %v4587_v11, %s5646_s16  ;;  %2236 = vrot.lane.b32.xlu1 %v4587_v11, %s5647_s27 }
 0x38b   : > { %2062 = vrot.lane.b32.xlu1 %v4597_v58, %s2888_s24  ;;  %1930 = vrot.lane.b32.xlu0 %v4597_v58, %s2886_s2 }
 0x38f   : > { %2294 = vrot.lane.b32.xlu1 %v4597_v58, %s2899_s29  ;;  %1998 = vrot.lane.b32.xlu0 %v4597_v58, %s2884_s21 }
 0x393   : > { %2358 = vrot.lane.b32.xlu1 %v4597_v58, %s5642_s26  ;;  %2126 = vrot.lane.b32.xlu0 %v4597_v58, %s5643_s1 }
 0x397   : > { %2422 = vrot.lane.b32.xlu1 %v4597_v58, %s5646_s16  ;;  %2230 = vrot.lane.b32.xlu0 %v4597_v58, %s5647_s27  ;;  %v5679_v58 = vld [vmem:[#allocation21_spill] sm:$0xff] }
 0x39b   : > { %2070 = vrot.lane.b32.xlu1 %v4603_v27, %s2888_s24  ;;  %1938 = vrot.lane.b32.xlu0 %v4603_v27, %s2886_s2 }
 0x39f   : > { %2302 = vrot.lane.b32.xlu1 %v4603_v27, %s2899_s29  ;;  %2006 = vrot.lane.b32.xlu0 %v4603_v27, %s2884_s21 }
 0x3a3   : > { %2366 = vrot.lane.b32.xlu1 %v4603_v27, %s5642_s26  ;;  %2134 = vrot.lane.b32.xlu0 %v4603_v27, %s5643_s1 }
 0x3a7   : > { %2238 = vrot.lane.b32.xlu0 %v4603_v27, %s5647_s27  ;;  %1932 = vrot.lane.b32.xlu1 %v4605_v47, %s2886_s2 }
 0x3ab   : > { %2064 = vrot.lane.b32.xlu0 %v4605_v47, %s2888_s24  ;;  %2000 = vrot.lane.b32.xlu1 %v4605_v47, %s2884_s21 }
 0x3af   : > { %2296 = vrot.lane.b32.xlu0 %v4605_v47, %s2899_s29  ;;  %2128 = vrot.lane.b32.xlu1 %v4605_v47, %s5643_s1 }
 0x3b3   : > { %2360 = vrot.lane.b32.xlu0 %v4605_v47, %s5642_s26  ;;  %2232 = vrot.lane.b32.xlu1 %v4605_v47, %s5647_s27 }
 0x3b7   : > { %2424 = vrot.lane.b32.xlu0 %v4605_v47, %s5646_s16  ;;  %1940 = vrot.lane.b32.xlu1 %v4607_v38, %s2886_s2 }
 0x3bb   : > { %2072 = vrot.lane.b32.xlu0 %v4607_v38, %s2888_s24  ;;  %2008 = vrot.lane.b32.xlu1 %v4607_v38, %s2884_s21 }
 0x3bd   : > { %v2059_v5 = vpop.permute.xlu1 %2058  ;;  %v1927_v41 = vpop.permute.xlu0 %1926 }
 0x3bf   : > { %2304 = vrot.lane.b32.xlu0 %v4607_v38, %s2899_s29  ;;  %2136 = vrot.lane.b32.xlu1 %v4607_v38, %s5643_s1 }
 0x3c1   : > { %v2291_v47 = vpop.permute.xlu1 %2290  ;;  %v1995_v20 = vpop.permute.xlu0 %1994 }
 0x3c3   : > { %2368 = vrot.lane.b32.xlu0 %v4607_v38, %s5642_s26  ;;  %2240 = vrot.lane.b32.xlu1 %v4607_v38, %s5647_s27 }
 0x3c5   : > { %v2355_v48 = vpop.permute.xlu1 %2354  ;;  %v2123_v61 = vpop.permute.xlu0 %2122 }
 0x3c7   : > { %2432 = vrot.lane.b32.xlu0 %v4607_v38, %s5646_s16  ;;  %2430 = vrot.lane.b32.xlu1 %v4603_v27, %s5646_s16  ;;  %v2516_v38 = vld [vmem:[#allocation2] sm:$0x1]  ;;  %s684_s16 = scalar_lea.vmem %s5209_s19, %s3048_s28 }
 0x3c9   : > { %v2419_v10 = vpop.permute.xlu1 %2418  ;;  %v2227_v42 = vpop.permute.xlu0 %2226 }
 0x3cb   : > { %2495 = vperm.xlu0 %2849, %v2487_v36   ;;  %2490 = vperm.xlu1 %2850, %v2486_v60   ;;  %v2528_v60 = vld [vmem:[%s5207_s17] sm:$0xff] }
 0x3cd   : > { %v2067_v40 = vpop.permute.xlu1 %2066  ;;  %v1935_v46 = vpop.permute.xlu0 %1934 }
 0x3ce   : > { %v2074_v21 = vsel %vm5664_vm5, %v2059_v5, %v2067_v40  ;;  %v2078_v3 = vsel %vm5665_vm11, %v2067_v40, %v2059_v5  ;;  %v1942_v53 = vsel %vm5666_vm3, %v1927_v41, %v1935_v46  ;;  %v1946_v36 = vsel %vm5667_vm10, %v1935_v46, %v1927_v41  ;;  %v5671_v40 = vld [vmem:[#allocation19_spill] sm:$0xff] }
 0x3cf   : > { %2559 = vperm.xlu0 %2849, %v2529_v23   ;;  %2519 = vperm.xlu1 %2850, %v2516_v38   ;;  %v2082_v37 = vsel %vm5668_vm15, %v2078_v3, 0.0  ;;  %vm5669_vm5 = vnez %v5520_v13  ;;  %vm5670_vm11 = vnez %v5492_v29  ;;  %vm5672_vm3 = vnez %v5671_v40  ;;  %vm5676_vm15 = vmmov %vm5675_vm6  ;;  %v5677_v38 = vld [vmem:[#allocation20_spill] sm:$0xff] }
 0x3d0   : > { %v2083_v43 = vsel %vm5669_vm5, %v2074_v21, 0.0  ;;  %v1950_v5 = vsel %vm5670_vm11, %v1946_v36, 0.0  ;;  %v1951_v15 = vsel %vm5672_vm3, %v1942_v53, 0.0  ;;  %vm5673_vm10 = vcmp.lt.s32.totalorder %v3319_v33, 113 }
 0x3d1   : > { %v2299_v27 = vpop.permute.xlu1 %2298  ;;  %v2003_v41 = vpop.permute.xlu0 %2002  ;;  %vm5674_vm7 = vmmov %vm5673_vm10  ;;  %vm5678_vm5 = vnez %v5677_v38  ;;  %vm5680_vm11 = vnez %v5679_v58  ;;  %v1978_v59 = vmul.f32 %v4567_v14, %v1950_v5  ;;  %v1979_v54 = vmul.f32 %v4567_v14, %v1951_v15 }
 0x3d2   : > { %v2306_v23 = vsel %vm5673_vm10, %v2291_v47, %v2299_v27  ;;  %v2310_v46 = vsel %vm5674_vm7, %v2299_v27, %v2291_v47  ;;  %v2010_v3 = vsel %vm5675_vm6, %v1995_v20, %v2003_v41  ;;  %v2014_v21 = vsel %vm5676_vm15, %v2003_v41, %v1995_v20 }
 0x3d3   : > { %v2018_v36 = vsel %vm5678_vm5, %v2014_v21, 0.0  ;;  %v2019_v53 = vsel %vm5680_vm11, %v2010_v3, 0.0  ;;  %2554 = vperm.xlu1 %2850, %v2528_v60   ;;  %v2106_v47 = vmul.f32 %v4565_v17, %v2082_v37  ;;  %v2107_v12 = vmul.f32 %v4565_v17, %v2083_v43 }
 0x3d4   : > { %v2042_v56 = vmul.f32 %v4583_v49, %v2018_v36  ;;  %v2043_v27 = vmul.f32 %v4583_v49, %v2019_v53  ;;  %vm5681_vm7 = vcmp.lt.s32.totalorder %v3319_v33, 112  ;;  %vm5683_vm15 = vcmp.lt.s32.totalorder %v3319_v33, 1 }
 0x3d5   : > { %v2363_v20 = vpop.permute.xlu1 %2362  ;;  %v2131_v41 = vpop.permute.xlu0 %2130  ;;  %vm5682_vm6 = vmmov %vm5681_vm7  ;;  %v2186_v17 = vsel %vm5617_vm12, %v4575_v9, 0.0  ;;  %vm5685_vm11 = vnez %v5533_v50 }
 0x3d6   : > { %v2050_v35 = vadd.f32 %v2042_v56, %v1978_v59  ;;  %v2051_v21 = vadd.f32 %v2043_v27, %v1979_v54  ;;  %v2370_v3 = vsel %vm5681_vm7, %v2355_v48, %v2363_v20  ;;  %v2374_v60 = vsel %vm5682_vm6, %v2363_v20, %v2355_v48  ;;  %vm5684_vm10 = vmmov %vm5683_vm15 }
 0x3d7   : > { %v2138_v14 = vsel %vm5683_vm15, %v2123_v61, %v2131_v41  ;;  %v2142_v49 = vsel %vm5684_vm10, %v2131_v41, %v2123_v61  ;;  %vm5686_vm7 = vnez %v5535_v45  ;;  %v2187_v48 = vsel %vm5618_vm0, %v4581_v19, 0.0 }
 0x3d8   : > { %v2114_v15 = vadd.f32 %v2106_v47, %v2050_v35  ;;  %v2115_v37 = vadd.f32 %v2107_v12, %v2051_v21  ;;  %v2146_v56 = vsel %vm5685_vm11, %v2142_v49, 0.0  ;;  %v2147_v54 = vsel %vm5686_vm7, %v2138_v14, 0.0 }
 0x3d9   : > { %v2427_v59 = vpop.permute.xlu1 %2426  ;;  %v2235_v43 = vpop.permute.xlu0 %2234  ;;  %v2170_v61 = vmul.f32 %v4645_v26, %v2146_v56  ;;  %v2171_v12 = vmul.f32 %v4645_v26, %v2147_v54  ;;  %vm5687_vm6 = vcmp.lt.s32.totalorder %v3319_v33, 111  ;;  %vm5689_vm10 = vcmp.lt.s32.totalorder %v3319_v33, 127 }
 0x3da   : > { %v2434_v35 = vsel %vm5687_vm6, %v2419_v10, %v2427_v59  ;;  %vm5688_vm15 = vmmov %vm5687_vm6  ;;  %v2242_v5 = vsel %vm5689_vm10, %v2227_v42, %v2235_v43  ;;  %v2210_v53 = vmul.f32 %v4589_v24, %v2186_v17  ;;  %v2211_v47 = vmul.f32 %v4589_v24, %v2187_v48 }
 0x3db   : > { %v2438_v9 = vsel %vm5688_vm15, %v2427_v59, %v2419_v10  ;;  %vm5690_vm7 = vmmov %vm5689_vm10  ;;  %v2178_v27 = vadd.f32 %v2170_v61, %v2114_v15  ;;  %v2179_v19 = vadd.f32 %v2171_v12, %v2115_v37  ;;  %v2314_v26 = vsel %vm4300_vm13, %v2306_v23, 0.0 }
 0x3dc   : > { %v2246_v36 = vsel %vm5690_vm7, %v2235_v43, %v2227_v42  ;;  %v2315_v20 = vsel %vm4304_vm2, %v2310_v46, 0.0  ;;  %v2250_v10 = vsel %vm4277_vm8, %v2242_v5, 0.0  ;;  %v2378_v23 = vsel %vm4322_vm9, %v2370_v3, 0.0 }
 0x3dd   : > { %v2251_v41 = vsel %vm4281_vm14, %v2246_v36, 0.0  ;;  %v2061_v21 = vpop.permute.xlu0 %2060  ;;  %v1929_v42 = vpop.permute.xlu1 %1928  ;;  %v2218_v14 = vadd.f32 %v2210_v53, %v2178_v27  ;;  %v2219_v49 = vadd.f32 %v2211_v47, %v2179_v19  ;;  %v2274_v15 = vmul.f32 %v4683_v52, %v2250_v10 }
 0x3de   : > { %v2275_v24 = vmul.f32 %v4683_v52, %v2251_v41  ;;  %v2379_v46 = vsel %vm4326_vm4, %v2374_v60, 0.0  ;;  %v2338_v37 = vmul.f32 %v4707_v25, %v2314_v26  ;;  %v2339_v17 = vmul.f32 %v4707_v25, %v2315_v20 }
 0x3df   : > { %v2282_v56 = vadd.f32 %v2274_v15, %v2218_v14  ;;  %v2442_v59 = vsel %vm4427_vm1, %v2434_v35, 0.0  ;;  %vm5691_vm7 = vnez %v5616_v32  ;;  %v2402_v61 = vmul.f32 %v4729_v44, %v2378_v23 }
 0x3e0   : > { %v2283_v54 = vadd.f32 %v2275_v24, %v2219_v49  ;;  %v2443_v43 = vsel %vm5691_vm7, %v2438_v9, 0.0  ;;  %v2403_v3 = vmul.f32 %v4729_v44, %v2379_v46  ;;  %v2466_v5 = vmul.f32 %v4735_v31, %v2442_v59 }
 0x3e1   : > { %v2293_v48 = vpop.permute.xlu0 %2292  ;;  %v1997_v52 = vpop.permute.xlu1 %1996  ;;  %v2346_v12 = vadd.f32 %v2338_v37, %v2282_v56  ;;  %v2467_v25 = vmul.f32 %v4735_v31, %v2443_v43  ;;  %vm5692_vm6 = vcmp.lt.s32.totalorder %v3319_v33, 15  ;;  %vm5694_vm10 = vcmp.lt.s32.totalorder %v3319_v33, 17 }
 0x3e2   : > { %v2347_v60 = vadd.f32 %v2339_v17, %v2283_v54  ;;  %vm5693_vm15 = vmmov %vm5692_vm6  ;;  %vm5696_vm1 = vnez %v5518_v2  ;;  %vm5697_vm4 = vnez %v5520_v13  ;;  %vm5698_vm9 = vnez %v5492_v29 }
 0x3e3   : > { %v2410_v36 = vadd.f32 %v2402_v61, %v2346_v12  ;;  %vm5695_vm7 = vmmov %vm5694_vm10 }
 0x3e4   : > { %v2411_v53 = vadd.f32 %v2403_v3, %v2347_v60 }
 0x3e5   : > { %v2357_v27 = vpop.permute.xlu0 %2356  ;;  %v2125_v19 = vpop.permute.xlu1 %2124  ;;  %v4887_v35 = vadd.f32 %v2466_v5, %v2410_v36 }
 0x3e6   : > { %v4889_v47 = vadd.f32 %v2467_v25, %v2411_v53 }
 0x3e9   : > { %v2421_v9 = vpop.permute.xlu0 %2420  ;;  %v2229_v26 = vpop.permute.xlu1 %2228 }
 0x3ed   : > { %v2069_v20 = vpop.permute.xlu0 %2068  ;;  %v1937_v10 = vpop.permute.xlu1 %1936 }
 0x3ee   : > { %v2075_v44 = vsel %vm5692_vm6, %v2061_v21, %v2069_v20  ;;  %v2079_v41 = vsel %vm5693_vm15, %v2069_v20, %v2061_v21  ;;  %v1943_v31 = vsel %vm5694_vm10, %v1929_v42, %v1937_v10  ;;  %v1947_v14 = vsel %vm5695_vm7, %v1937_v10, %v1929_v42 }
 0x3ef   : > { %v2084_v49 = vsel %vm5696_vm1, %v2079_v41, 0.0  ;;  %v2085_v15 = vsel %vm5697_vm4, %v2075_v44, 0.0  ;;  %v1952_v24 = vsel %vm5698_vm9, %v1947_v14, 0.0  ;;  %v1953_v23 = vsel %vm5672_vm3, %v1943_v31, 0.0 }
 0x3f0   : > { %vm5699_vm6 = vcmp.lt.s32.totalorder %v3319_v33, 113  ;;  %vm5701_vm7 = vcmp.lt.s32.totalorder %v3319_v33, 16  ;;  %vm5703_vm4 = vnez %v5679_v58  ;;  %v1980_v43 = vmul.f32 %v4755_v0, %v1952_v24 }
 0x3f1   : > { %v2301_v46 = vpop.permute.xlu0 %2300  ;;  %v2005_v21 = vpop.permute.xlu1 %2004  ;;  %vm5700_vm15 = vmmov %vm5699_vm6  ;;  %v1981_v61 = vmul.f32 %v4755_v0, %v1953_v23  ;;  %v2108_v12 = vmul.f32 %v4629_v6, %v2084_v49  ;;  %v2109_v60 = vmul.f32 %v4629_v6, %v2085_v15  ;;  %v2188_v6 = vsel %vm5617_vm12, %v4585_v1, 0.0 }
 0x3f2   : > { %v2307_v37 = vsel %vm5699_vm6, %v2293_v48, %v2301_v46  ;;  %v2311_v42 = vsel %vm5700_vm15, %v2301_v46, %v2293_v48  ;;  %v2011_v17 = vsel %vm5701_vm7, %v1997_v52, %v2005_v21  ;;  %vm5702_vm10 = vmmov %vm5701_vm7  ;;  %vm5704_vm6 = vcmp.lt.s32.totalorder %v3319_v33, 112 }
 0x3f3   : > { %v2015_v56 = vsel %vm5702_vm10, %v2005_v21, %v1997_v52  ;;  %v2021_v59 = vsel %vm5703_vm4, %v2011_v17, 0.0  ;;  %vm5705_vm15 = vmmov %vm5704_vm6  ;;  %vm5706_vm7 = vcmp.lt.s32.totalorder %v3319_v33, 1  ;;  %v2189_v49 = vsel %vm5618_vm0, %v4587_v11, 0.0 }
 0x3f4   : > { %v2020_v54 = vsel %vm5678_vm5, %v2015_v56, 0.0  ;;  %v2045_v48 = vmul.f32 %v4563_v22, %v2021_v59  ;;  %vm5707_vm10 = vmmov %vm5706_vm7  ;;  %v2212_v21 = vmul.f32 %v4671_v63, %v2188_v6  ;;  %v2213_v56 = vmul.f32 %v4671_v63, %v2189_v49 }
 0x3f5   : > { %v2044_v3 = vmul.f32 %v4563_v22, %v2020_v54  ;;  %v2365_v5 = vpop.permute.xlu0 %2364  ;;  %v2133_v52 = vpop.permute.xlu1 %2132  ;;  %v2317_v54 = vsel %vm4304_vm2, %v2311_v42, 0.0 }
 0x3f6   : > { %v2053_v36 = vadd.f32 %v2045_v48, %v1981_v61  ;;  %v2371_v53 = vsel %vm5704_vm6, %v2357_v27, %v2365_v5  ;;  %v2375_v20 = vsel %vm5705_vm15, %v2365_v5, %v2357_v27  ;;  %v2139_v0 = vsel %vm5706_vm7, %v2125_v19, %v2133_v52 }
 0x3f7   : > { %v2052_v25 = vadd.f32 %v2044_v3, %v1980_v43  ;;  %v2143_v22 = vsel %vm5707_vm10, %v2133_v52, %v2125_v19  ;;  %vm5708_vm6 = vnez %v5535_v45  ;;  %vm5709_vm15 = vcmp.lt.s32.totalorder %v3319_v33, 111 }
 0x3f8   : > { %v2117_v44 = vadd.f32 %v2109_v60, %v2053_v36  ;;  %v2148_v41 = vsel %vm5685_vm11, %v2143_v22, 0.0  ;;  %v2149_v31 = vsel %vm5708_vm6, %v2139_v0, 0.0  ;;  %vm5710_vm7 = vmmov %vm5709_vm15  ;;  %vm5711_vm10 = vcmp.lt.s32.totalorder %v3319_v33, 127 }
 0x3f9   : > { %v2116_v10 = vadd.f32 %v2108_v12, %v2052_v25  ;;  %v2429_v14 = vpop.permute.xlu0 %2428  ;;  %v2237_v27 = vpop.permute.xlu1 %2236  ;;  %v2172_v19 = vmul.f32 %v4573_v8, %v2148_v41  ;;  %v2173_v15 = vmul.f32 %v4573_v8, %v2149_v31  ;;  %vm5712_vm12 = vmmov %vm5711_vm10  ;;  %v2316_v8 = vsel %vm4300_vm13, %v2307_v37, 0.0 }
 0x3fa   : > { %v2435_v24 = vsel %vm5709_vm15, %v2421_v9, %v2429_v14  ;;  %v2439_v1 = vsel %vm5710_vm7, %v2429_v14, %v2421_v9  ;;  %v2243_v23 = vsel %vm5711_vm10, %v2229_v26, %v2237_v27  ;;  %v2247_v46 = vsel %vm5712_vm12, %v2237_v27, %v2229_v26 }
 0x3fb   : > { %v2180_v17 = vadd.f32 %v2172_v19, %v2116_v10  ;;  %v2181_v11 = vadd.f32 %v2173_v15, %v2117_v44  ;;  %v2252_v9 = vsel %vm4277_vm8, %v2243_v23, 0.0  ;;  %v2253_v59 = vsel %vm4281_vm14, %v2247_v46, 0.0  ;;  %v5717_v44 = vld [vmem:[#allocation28_spill] sm:$0xff] }
 0x3fc   : > { %v2276_v48 = vmul.f32 %v4695_v51, %v2252_v9  ;;  %v2277_v63 = vmul.f32 %v4695_v51, %v2253_v59  ;;  %vm5713_vm12 = vnez %v5589_v4  ;;  %vm5714_vm15 = vnez %v5591_v30 }
 0x3fd   : > { %v2063_v43 = vpop.permute.xlu1 %2062  ;;  %v1931_v26 = vpop.permute.xlu0 %1930  ;;  %v2220_v61 = vadd.f32 %v2212_v21, %v2180_v17  ;;  %v2221_v3 = vadd.f32 %v2213_v56, %v2181_v11  ;;  %v2380_v37 = vsel %vm5713_vm12, %v2371_v53, 0.0  ;;  %v2381_v42 = vsel %vm5714_vm15, %v2375_v20, 0.0 }
 0x3fe   : > { %v2340_v12 = vmul.f32 %v4709_v34, %v2316_v8  ;;  %v2341_v60 = vmul.f32 %v4709_v34, %v2317_v54  ;;  %vm5715_vm7 = vnez %v5614_v57  ;;  %vm5716_vm10 = vnez %v5616_v32 }
 0x3ff   : > { %v2284_v5 = vadd.f32 %v2276_v48, %v2220_v61  ;;  %v2285_v52 = vadd.f32 %v2277_v63, %v2221_v3  ;;  %v2444_v25 = vsel %vm5715_vm7, %v2435_v24, 0.0  ;;  %v2445_v36 = vsel %vm5716_vm10, %v2439_v1, 0.0  ;;  %v5724_v63 = vld [vmem:[#allocation9_spill] sm:$0xff] }
 0x400   : > { %v2404_v22 = vmul.f32 %v4727_v39, %v2380_v37  ;;  %v2405_v53 = vmul.f32 %v4727_v39, %v2381_v42  ;;  %v2468_v6 = vmul.f32 %v5717_v44, %v2444_v25  ;;  %v2469_v34 = vmul.f32 %v5717_v44, %v2445_v36 }
 0x401   : > { %v2295_v0 = vpop.permute.xlu1 %2294  ;;  %v1999_v51 = vpop.permute.xlu0 %1998  ;;  %v2348_v10 = vadd.f32 %v2340_v12, %v2284_v5  ;;  %v2349_v20 = vadd.f32 %v2341_v60, %v2285_v52  ;;  %vm5718_vm10 = vcmp.lt.s32.totalorder %v3319_v33, 16  ;;  %vm5720_vm15 = vcmp.lt.s32.totalorder %v3319_v33, 17  ;;  %v5725_v5 = vld [vmem:[#allocation11_spill] sm:$0xff] }
 0x402   : > { %vm5719_vm7 = vmmov %vm5718_vm10 }
 0x403   : > { %v2412_v41 = vadd.f32 %v2404_v22, %v2348_v10  ;;  %v2413_v31 = vadd.f32 %v2405_v53, %v2349_v20  ;;  %vm5721_vm12 = vmmov %vm5720_vm15 }
 0x405   : > { %v4979_v14 = vpop.permute.xlu1 %2358  ;;  %v2127_v27 = vpop.permute.xlu0 %2126  ;;  %v4981_v49 = vadd.f32 %v2468_v6, %v2412_v41  ;;  %v4983_v19 = vadd.f32 %v2469_v34, %v2413_v31  ;;  %v5729_v41 = vld [vmem:[#allocation6_spill] sm:$0xff] }
 0x409   : > { %v4985_v15 = vpop.permute.xlu1 %2422  ;;  %v2231_v24 = vpop.permute.xlu0 %2230 }
 0x40d   : > { %v2071_v1 = vpop.permute.xlu1 %2070  ;;  %v1939_v39 = vpop.permute.xlu0 %1938 }
 0x40e   : > { %v1944_v11 = vsel %vm5720_vm15, %v1931_v26, %v1939_v39  ;;  %v1948_v56 = vsel %vm5721_vm12, %v1939_v39, %v1931_v26  ;;  %vm5726_vm12 = vcmp.lt.s32.totalorder %v3319_v33, 1 }
 0x40f   : > { %v1954_v61 = vsel %vm5698_vm9, %v1948_v56, 0.0  ;;  %v1955_v3 = vsel %vm5672_vm3, %v1944_v11, 0.0 }
 0x410   : > { %v1982_v52 = vmul.f32 %v5725_v5, %v1954_v61  ;;  %v1983_v25 = vmul.f32 %v5725_v5, %v1955_v3  ;;  %v5735_v3 = vld [vmem:[#allocation5_spill] sm:$0xff] }
 0x411   : > { %v2303_v23 = vpop.permute.xlu1 %2302  ;;  %v2007_v46 = vpop.permute.xlu0 %2006 }
 0x412   : > { %v2012_v21 = vsel %vm5718_vm10, %v1999_v51, %v2007_v46  ;;  %v2016_v17 = vsel %vm5719_vm7, %v2007_v46, %v1999_v51  ;;  %vm5722_vm7 = vcmp.lt.s32.totalorder %v3319_v33, 15  ;;  %vm5727_vm10 = vmmov %vm5726_vm12  ;;  %v5730_v46 = vld [vmem:[#allocation13_spill] sm:$0xff] }
 0x413   : > { %v2022_v9 = vsel %vm5678_vm5, %v2016_v17, 0.0  ;;  %v2023_v59 = vsel %vm5703_vm4, %v2012_v21, 0.0  ;;  %v2076_v48 = vsel %vm5722_vm7, %v2063_v43, %v2071_v1  ;;  %vm5723_vm15 = vmmov %vm5722_vm7  ;;  %vm5728_vm7 = vnez %v5520_v13 }
 0x414   : > { %v2080_v26 = vsel %vm5723_vm15, %v2071_v1, %v2063_v43  ;;  %v2046_v37 = vmul.f32 %v5724_v63, %v2022_v9  ;;  %v2047_v42 = vmul.f32 %v5724_v63, %v2023_v59  ;;  %v2087_v43 = vsel %vm5728_vm7, %v2076_v48, 0.0  ;;  %v5733_v59 = vld [vmem:[#allocation17_spill] sm:$0xff] }
 0x415   : > { %v2367_v8 = vpop.permute.xlu1 %2366  ;;  %v2135_v54 = vpop.permute.xlu0 %2134  ;;  %v2086_v22 = vsel %vm5696_vm1, %v2080_v26, 0.0  ;;  %vm5731_vm15 = vcmp.lt.s32.totalorder %v3319_v33, 127  ;;  %v2191_v48 = vsel %vm5618_vm0, %v5735_v3, 0.0  ;;  %vm5740_vm0 = vcmp.lt.s32.totalorder %v3319_v33, 17 }
 0x416   : > { %v2140_v36 = vsel %vm5726_vm12, %v2127_v27, %v2135_v54  ;;  %v2144_v51 = vsel %vm5727_vm10, %v2135_v54, %v2127_v27  ;;  %v2054_v53 = vadd.f32 %v2046_v37, %v1982_v52  ;;  %v2055_v10 = vadd.f32 %v2047_v42, %v1983_v25  ;;  %vm5732_vm12 = vmmov %vm5731_vm15 }
 0x417   : > { %v2150_v6 = vsel %vm5685_vm11, %v2144_v51, 0.0  ;;  %v2151_v34 = vsel %vm5708_vm6, %v2140_v36, 0.0  ;;  %v2110_v31 = vmul.f32 %v5729_v41, %v2086_v22  ;;  %v2111_v27 = vmul.f32 %v5729_v41, %v2087_v43  ;;  %v5739_v22 = vld [vmem:[#allocation18_spill] sm:$0xff] }
 0x418   : > { %v2174_v21 = vmul.f32 %v5730_v46, %v2150_v6  ;;  %v2175_v17 = vmul.f32 %v5730_v46, %v2151_v34  ;;  %vm5734_vm10 = vnez %v5344_v62  ;;  %vm5736_vm6 = vcmp.lt.s32.totalorder %v3319_v33, 113 }
 0x419   : > { %v2239_v12 = vpop.permute.xlu0 %2238  ;;  %v1933_v60 = vpop.permute.xlu1 %1932  ;;  %v2118_v1 = vadd.f32 %v2110_v31, %v2054_v53  ;;  %v2119_v39 = vadd.f32 %v2111_v27, %v2055_v10  ;;  %v2190_v61 = vsel %vm5734_vm10, %v5733_v59, 0.0  ;;  %v2308_v26 = vsel %vm5736_vm6, %v2295_v0, %v2303_v23  ;;  %vm5737_vm11 = vmmov %vm5736_vm6  ;;  %v5742_v31 = vld [vmem:[#allocation24_spill] sm:$0xff] }
 0x41a   : > { %v2244_v54 = vsel %vm5731_vm15, %v2231_v24, %v2239_v12  ;;  %v2248_v9 = vsel %vm5732_vm12, %v2239_v12, %v2231_v24  ;;  %v2312_v63 = vsel %vm5737_vm11, %v2303_v23, %v2295_v0  ;;  %v2214_v12 = vmul.f32 %v5738_v16, %v2190_v61  ;;  %vm5741_vm11 = vmmov %vm5740_vm0 }
 0x41b   : > { %v2182_v37 = vadd.f32 %v2174_v21, %v2118_v1  ;;  %v2183_v42 = vadd.f32 %v2175_v17, %v2119_v39  ;;  %v2254_v62 = vsel %vm4277_vm8, %v2244_v54, 0.0  ;;  %v2255_v24 = vsel %vm4281_vm14, %v2248_v9, 0.0 }
 0x41c   : > { %v2215_v25 = vmul.f32 %v5738_v16, %v2191_v48  ;;  %v2318_v36 = vsel %vm4300_vm13, %v2308_v26, 0.0  ;;  %v2319_v0 = vsel %vm4304_vm2, %v2312_v63, 0.0  ;;  %v2278_v43 = vmul.f32 %v5739_v22, %v2254_v62  ;;  %v5749_v63 = vld [vmem:[#allocation29_spill] sm:$0xff] }
 0x41d   : > { %v2065_v20 = vpop.permute.xlu0 %2064  ;;  %v2001_v44 = vpop.permute.xlu1 %2000  ;;  %v2222_v23 = vadd.f32 %v2214_v12, %v2182_v37  ;;  %v2279_v53 = vmul.f32 %v5739_v22, %v2255_v24  ;;  %v2342_v27 = vmul.f32 %v5742_v31, %v2318_v36  ;;  %v2343_v1 = vmul.f32 %v5742_v31, %v2319_v0  ;;  %v5753_v24 = vld [vmem:[#allocation8_spill] sm:$0xff] }
 0x41e   : > { %v2223_v51 = vadd.f32 %v2215_v25, %v2183_v42  ;;  %vm5743_vm6 = vcmp.lt.s32.totalorder %v3319_v33, 112  ;;  %vm5745_vm12 = vcmp.lt.s32.totalorder %v3319_v33, 15  ;;  %v5750_v42 = vld [vmem:[#allocation7_spill] sm:$0xff] }
 0x41f   : > { %v2372_v39 = vsel %vm5743_vm6, %v4979_v14, %v2367_v8  ;;  %vm5744_vm15 = vmmov %vm5743_vm6  ;;  %v2286_v21 = vadd.f32 %v2278_v43, %v2222_v23  ;;  %vm5759_vm6 = vnez %v5533_v50 }
 0x420   : > { %v2376_v46 = vsel %vm5744_vm15, %v2367_v8, %v4979_v14  ;;  %v2287_v17 = vadd.f32 %v2279_v53, %v2223_v51  ;;  %vm5746_vm10 = vmmov %vm5745_vm12  ;;  %vm5760_vm15 = vnez %v5535_v45 }
 0x421   : > { %v2297_v11 = vpop.permute.xlu0 %2296  ;;  %v2129_v56 = vpop.permute.xlu1 %2128  ;;  %v2350_v51 = vadd.f32 %v2342_v27, %v2286_v21 }
 0x422   : > { %v2351_v22 = vadd.f32 %v2343_v1, %v2287_v17  ;;  %v5761_v17 = vld [vmem:[#allocation16_spill] sm:$0xff] }
 0x425   : > { %v5041_v5 = vpop.permute.xlu0 %2360  ;;  %v5043_v52 = vpop.permute.xlu1 %2232 }
 0x429   : > { %v5057_v10 = vpop.permute.xlu0 %2424  ;;  %v1941_v6 = vpop.permute.xlu1 %1940 }
 0x42a   : > { %v1945_v34 = vsel %vm5740_vm0, %v1933_v60, %v1941_v6  ;;  %v1949_v41 = vsel %vm5741_vm11, %v1941_v6, %v1933_v60  ;;  %vm5747_vm0 = vcmp.lt.s32.totalorder %v3319_v33, 16  ;;  %v5758_v6 = vld [vmem:[#allocation25_spill] sm:$0xff] }
 0x42b   : > { %v1956_v54 = vsel %vm5698_vm9, %v1949_v41, 0.0  ;;  %v1957_v60 = vsel %vm5672_vm3, %v1945_v34, 0.0  ;;  %vm5748_vm11 = vmmov %vm5747_vm0  ;;  %vm5751_vm9 = vnez %v5589_v4  ;;  %vm5756_vm3 = vcmp.lt.s32.totalorder %v3319_v33, 1 }
 0x42c   : > { %v1985_v37 = vmul.f32 %v5749_v63, %v1957_v60  ;;  %v2382_v2 = vsel %vm5751_vm9, %v2372_v39, 0.0 }
 0x42d   : > { %v2073_v9 = vpop.permute.xlu0 %2072  ;;  %v2009_v59 = vpop.permute.xlu1 %2008  ;;  %v2406_v34 = vmul.f32 %v5758_v6, %v2382_v2 }
 0x42e   : > { %v2077_v61 = vsel %vm5745_vm12, %v2065_v20, %v2073_v9  ;;  %v2081_v3 = vsel %vm5746_vm10, %v2073_v9, %v2065_v20  ;;  %v2013_v48 = vsel %vm5747_vm0, %v2001_v44, %v2009_v59  ;;  %v2017_v14 = vsel %vm5748_vm11, %v2009_v59, %v2001_v44 }
 0x42f   : > { %v2088_v29 = vsel %vm5696_vm1, %v2081_v3, 0.0  ;;  %v2089_v40 = vsel %vm5728_vm7, %v2077_v61, 0.0  ;;  %v2024_v8 = vsel %vm5678_vm5, %v2017_v14, 0.0  ;;  %v2025_v26 = vsel %vm5703_vm4, %v2013_v48, 0.0  ;;  %vm5757_vm7 = vmmov %vm5756_vm3  ;;  %v5766_v61 = vld [vmem:[#allocation23_spill] sm:$0xff] }
 0x430   : > { %v1984_v20 = vmul.f32 %v5749_v63, %v1956_v54  ;;  %v2048_v62 = vmul.f32 %v5750_v42, %v2024_v8  ;;  %v2049_v44 = vmul.f32 %v5750_v42, %v2025_v26  ;;  %vm5752_vm1 = vnez %v5591_v30  ;;  %v5768_v42 = vld [vmem:[#allocation4_spill] sm:$0xff] }
 0x431   : > { %v2383_v13 = vsel %vm5752_vm1, %v2376_v46, 0.0  ;;  %v2112_v38 = vmul.f32 %v5753_v24, %v2088_v29  ;;  %v2113_v16 = vmul.f32 %v5753_v24, %v2089_v40  ;;  %v2305_v58 = vpop.permute.xlu0 %2304  ;;  %v2137_v12 = vpop.permute.xlu1 %2136  ;;  %vm5754_vm4 = vcmp.lt.s32.totalorder %v3319_v33, 113 }
 0x432   : > { %v2056_v25 = vadd.f32 %v2048_v62, %v1984_v20  ;;  %v2057_v36 = vadd.f32 %v2049_v44, %v1985_v37  ;;  %v2309_v0 = vsel %vm5754_vm4, %v2297_v11, %v2305_v58  ;;  %vm5755_vm5 = vmmov %vm5754_vm4  ;;  %v2141_v43 = vsel %vm5756_vm3, %v2129_v56, %v2137_v12  ;;  %v5767_v20 = vld [vmem:[#allocation3_spill] sm:$0xff]  ;;  %v5769_v44 = vld [vmem:[#allocation22_spill] sm:$0xff] }
 0x433   : > { %v2313_v23 = vsel %vm5755_vm5, %v2305_v58, %v2297_v11  ;;  %v2145_v53 = vsel %vm5757_vm7, %v2137_v12, %v2129_v56  ;;  %v2407_v41 = vmul.f32 %v5758_v6, %v2383_v13  ;;  %v2320_v46 = vsel %vm4300_vm13, %v2309_v0, 0.0  ;;  %v5776_v12 = vld [vmem:[#allocation27_spill] sm:$0xff] }
 0x434   : > { %v2120_v31 = vadd.f32 %v2112_v38, %v2056_v25  ;;  %v2121_v39 = vadd.f32 %v2113_v16, %v2057_v36  ;;  %v2321_v11 = vsel %vm4304_vm2, %v2313_v23, 0.0  ;;  %v2152_v27 = vsel %vm5759_vm6, %v2145_v53, 0.0  ;;  %v5777_v23 = vld [vmem:[#allocation30_spill] sm:$0xff] }
 0x435   : > { %v2153_v1 = vsel %vm5760_vm15, %v2141_v43, 0.0  ;;  %v2369_v21 = vpop.permute.xlu0 %2368  ;;  %v2241_v56 = vpop.permute.xlu1 %2240  ;;  %v2176_v54 = vmul.f32 %v5761_v17, %v2152_v27  ;;  %vm5762_vm12 = vcmp.lt.s32.totalorder %v3319_v33, 112  ;;  %vm5764_vm2 = vcmp.lt.s32.totalorder %v3319_v33, 127  ;;  %v5778_v43 = vld [vmem:[#allocation26_spill] sm:$0xff] }
 0x436   : > { %v2177_v60 = vmul.f32 %v5761_v17, %v2153_v1  ;;  %v2373_v7 = vsel %vm5762_vm12, %v5041_v5, %v2369_v21  ;;  %vm5763_vm13 = vmmov %vm5762_vm12  ;;  %v2245_v50 = vsel %vm5764_vm2, %v5043_v52, %v2241_v56  ;;  %v2414_v9 = vadd.f32 %v2406_v34, %v2350_v51 }
 0x437   : > { %v2377_v55 = vsel %vm5763_vm13, %v2369_v21, %v5041_v5  ;;  %vm5765_vm10 = vmmov %vm5764_vm2  ;;  %v2415_v59 = vadd.f32 %v2407_v41, %v2351_v22  ;;  %v2344_v3 = vmul.f32 %v5766_v61, %v2320_v46  ;;  %v2345_v48 = vmul.f32 %v5766_v61, %v2321_v11 }
 0x438   : > { %v2249_v45 = vsel %vm5765_vm10, %v2241_v56, %v5043_v52  ;;  %v2184_v14 = vadd.f32 %v2176_v54, %v2120_v31  ;;  %v2185_v29 = vadd.f32 %v2177_v60, %v2121_v39  ;;  %v2384_v40 = vsel %vm5751_vm9, %v2373_v7, 0.0 }
 0x439   : > { %v2385_v5 = vsel %vm5752_vm1, %v2377_v55, 0.0  ;;  %v2256_v8 = vsel %vm4277_vm8, %v2245_v50, 0.0  ;;  %v2257_v52 = vsel %vm4281_vm14, %v2249_v45, 0.0  ;;  %v2433_v26 = vpop.permute.xlu0 %2432  ;;  %v2431_v63 = vpop.permute.xlu1 %2430  ;;  %vm5770_vm0 = vcmp.lt.s32.totalorder %v3319_v33, 111 }
 0x43a   : > { %v2224_v37 = vadd.f32 %v5767_v20, %v2184_v14  ;;  %v2225_v62 = vadd.f32 %v5768_v42, %v2185_v29  ;;  %v2280_v2 = vmul.f32 %v5769_v44, %v2256_v8  ;;  %v2281_v4 = vmul.f32 %v5769_v44, %v2257_v52  ;;  %vm5771_vm8 = vmmov %vm5770_vm0 }
 0x43b   : > { %v2437_v30 = vsel %vm5770_vm0, %v5057_v10, %v2433_v26  ;;  %v2441_v28 = vsel %vm5771_vm8, %v2433_v26, %v5057_v10  ;;  %vm5772_vm14 = vmmov %vm5770_vm0  ;;  %vm5774_vm9 = vnez %v5614_v57  ;;  %vm5775_vm1 = vnez %v5616_v32 }
 0x43c   : > { %v2436_v18 = vsel %vm5772_vm14, %v4985_v15, %v2431_v63  ;;  %vm5773_vm11 = vmmov %vm5770_vm0  ;;  %v2288_v24 = vadd.f32 %v2280_v2, %v2224_v37  ;;  %v2289_v38 = vadd.f32 %v2281_v4, %v2225_v62  ;;  %v2448_v16 = vsel %vm5774_vm9, %v2437_v30, 0.0 }
 0x43d   : > { %v2440_v13 = vsel %vm5773_vm11, %v2431_v63, %v4985_v15  ;;  %v2449_v58 = vsel %vm5775_vm1, %v2441_v28, 0.0  ;;  %v2408_v25 = vmul.f32 %v5776_v12, %v2384_v40  ;;  %v2409_v10 = vmul.f32 %v5776_v12, %v2385_v5  ;;  %v5779_v5 = vld [vmem:[#allocation12_spill] sm:$0xff] }
 0x43e   : > { %v2446_v36 = vsel %vm5774_vm9, %v2436_v18, 0.0  ;;  %v2447_v0 = vsel %vm5775_vm1, %v2440_v13, 0.0  ;;  %v2352_v33 = vadd.f32 %v2344_v3, %v2288_v24  ;;  %v2353_v15 = vadd.f32 %v2345_v48, %v2289_v38 }
 0x43f   : > { %v2470_v51 = vmul.f32 %v5777_v23, %v2446_v36  ;;  %v2471_v22 = vmul.f32 %v5777_v23, %v2447_v0  ;;  %v2472_v53 = vmul.f32 %v5778_v43, %v2448_v16  ;;  %v2473_v6 = vmul.f32 %v5778_v43, %v2449_v58 }
 0x440   : > { %v2416_v34 = vadd.f32 %v2408_v25, %v2352_v33  ;;  %v2417_v41 = vadd.f32 %v2409_v10, %v2353_v15  ;;  %vm2573_vm4 = vcmask 130048  }
 0x441   : > { %v2478_v31 = vadd.f32 %v2470_v51, %v2414_v9  ;;  %v2479_v39 = vadd.f32 %v2471_v22, %v2415_v59 }
 0x442   : > { %v2480_v46 = vadd.f32 %v2472_v53, %v2416_v34  ;;  %v2481_v57 = vadd.f32 %v2473_v6, %v2417_v41 }
 0x443   : > { %v2482_v11 = vmul.f32 %v2478_v31, %v4887_v35  ;;  %v2483_v32 = vmul.f32 %v2479_v39, %v4889_v47 }
 0x444   : > { %v2484_v27 = vmul.f32 %v2480_v46, %v4981_v49  ;;  %v2485_v1 = vmul.f32 %v2481_v57, %v4983_v19  ;;  %v2570_v57 = vld [vmem:[%s5208_s18] sm:$0xf] }
 0x44a   : > { %v2496_v21 = vpop.permute.xlu0 %2495  ;;  %v2491_v56 = vpop.permute.xlu1 %2490 }
 0x44b   : > { %v2500_v17 = vmul.f32 %v2496_v21, %v2484_v27  ;;  %v2501_v54 = vmul.f32 %v2496_v21, %v2485_v1  ;;  %v2498_v60 = vmul.f32 %v2491_v56, %v2482_v11  ;;  %v2499_v7 = vmul.f32 %v2491_v56, %v2483_v32  ;;  %v5780_v56 = vld [vmem:[#allocation10_spill] sm:$0xff] }
 0x44d   : > { %v2502_v55 = vadd.f32 %v2500_v17, %v2498_v60  ;;  %v2509_v50 = vadd.f32 %v2501_v54, %v2499_v7 }
 0x44e   : > { %v2520_v14 = vpop.permute.xlu1 %2519  ;;  %v2560_v0 = vpop.permute.xlu0 %2559 }
 0x44f   : > { %v2503_v45 = vrot.slane %v2502_v55, 4  ;;  %v2510_v9 = vrot.slane %v2509_v50, 4  ;;  %v2525_v8 = vrot.slane %v2520_v14, %v5779_v5 }
 0x451   : > { %v2504_v59 = vadd.f32 %v2503_v45, %v2502_v55  ;;  %v2511_v61 = vadd.f32 %v2510_v9, %v2509_v50 }
 0x452   : > { %v2555_v33 = vpop.permute.xlu1 %2554 }
 0x453   : > { %v2505_v3 = vrot.slane %v2504_v59, 2  ;;  %v2512_v35 = vrot.slane %v2511_v61, 2 }
 0x455   : > { %v2506_v48 = vadd.f32 %v2505_v3, %v2504_v59  ;;  %v2513_v47 = vadd.f32 %v2512_v35, %v2511_v61 }
 0x457   : > { %v2507_v49 = vrot.slane %v2506_v48, 1  ;;  %v2514_v29 = vrot.slane %v2513_v47, 1 }
 0x459   : > { %v2508_v19 = vadd.f32 %v2507_v49, %v2506_v48  ;;  %v2515_v40 = vadd.f32 %v2514_v29, %v2513_v47 }
 0x45b   : > { %v2526_v52 = vadd.f32 %v2525_v8, %v2508_v19  ;;  %v2527_v26 = vadd.f32 %v2525_v8, %v2515_v40 }
 0x45d   : > { %v2532_v63 = vmul.f32 0.044715, %v2526_v52  ;;  %v2533_v20 = vmul.f32 0.044715, %v2527_v26  ;;  %v2530_v24 = vmul.f32 0.5, %v2526_v52  ;;  %v2531_v16 = vmul.f32 0.5, %v2527_v26 }
 0x45f   : > { %v2534_v37 = vmul.f32 %v2532_v63, %v2526_v52  ;;  %v2535_v42 = vmul.f32 %v2533_v20, %v2527_v26 }
 0x461   : > { %v2536_v62 = vmul.f32 %v2534_v37, %v2526_v52  ;;  %v2537_v44 = vmul.f32 %v2535_v42, %v2527_v26 }
 0x463   : > { %v2538_v2 = vadd.f32 %v2536_v62, %v2526_v52  ;;  %v2539_v4 = vadd.f32 %v2537_v44, %v2527_v26 }
 0x465   : > { %v2540_v30 = vmul.f32 0.7978846, %v2538_v2  ;;  %v2541_v28 = vmul.f32 0.7978846, %v2539_v4 }
 0x467   : > { %2861 = vtanh.f32 %v2540_v30 }
 0x468   : > { %2863 = vtanh.f32 %v2541_v28 }
 0x471   : > { %v2862_v18 = vpop.eup %2861 }
 0x472   : > { %v2864_v13 = vpop.eup %2863  ;;  %v2544_v38 = vadd.f32 1.0, %v2862_v18 }
 0x473   : > { %v2545_v58 = vadd.f32 1.0, %v2864_v13 }
 0x474   : > { %v2546_v12 = vmul.f32 %v2544_v38, %v2530_v24 }
 0x475   : > { %v2547_v25 = vmul.f32 %v2545_v58, %v2531_v16 }
 0x476   : > { %v2548_v10 = vsub.f32 %v2482_v11, %v2546_v12  ;;  %v2550_v36 = vsub.f32 %v2484_v27, %v2546_v12 }
 0x477   : > { %v2549_v15 = vsub.f32 %v2483_v32, %v2547_v25  ;;  %v2551_v23 = vsub.f32 %v2485_v1, %v2547_v25 }
 0x478   : > { %v2564_v51 = vmul.f32 %v2560_v0, %v2550_v36  ;;  %v2562_v22 = vmul.f32 %v2555_v33, %v2548_v10 }
 0x479   : > { %v2563_v43 = vmul.f32 %v2555_v33, %v2549_v15  ;;  %v2565_v53 = vmul.f32 %v2560_v0, %v2551_v23 }
 0x47a   : > { %v2568_v6 = vadd.f32 %v2564_v51, %v2484_v27  ;;  %v2566_v34 = vadd.f32 %v2562_v22, %v2482_v11 }
 0x47b   : > { %v2567_v41 = vadd.f32 %v2563_v43, %v2483_v32  ;;  %v2569_v31 = vadd.f32 %v2565_v53, %v2485_v1  ;;  %v5781_v32 = vld [vmem:[#allocation15_spill] sm:$0xff] }
 0x47c   : > { %v2571_v39 = vpack.c.bf16 %v2568_v6, %v2566_v34 }
 0x47d   : > { %v2572_v46 = vpack.c.bf16 %v2569_v31, %v2567_v41 }
 0x47f   : > { %2577 = vmatprep.subr.bf16.mxu1 %v2572_v46 }
 0x480   : > { %2578 = vmatpush1.bf16.msra.mxu1 %v2571_v39 }
 0x483   : > { %2765 = vmatmul.mubr.msk.bf16.vlgmr.msra.gmra.mrb[8].mxu1 %vm2573_vm4, %v2570_v57 }
 0x556   : > { %v2611_v21 = vpop.f32.mrb[8].mxu1 }
 0x557   : > { %v2612_v27 = vadd.f32 %v2611_v21, %v5780_v56  ;;  %v2613_v11 = vpop.f32.mrb[9].mxu1 }
 0x558   : > { %v2614_v1 = vadd.f32 %v2613_v11, %v5781_v32  ;;  %v2615_v17 = vpop.f32.mrb[10].mxu1 }
 0x559   : > { %2618 = vst [vmem:[%s684_s16] sm:$0xff] %v2612_v27  ;;  %v2616_v54 = vpop.f32.mrb[11].mxu1 }
 0x55a   : > { %2619 = vst [vmem:[%s684_s16 + $0x8] sm:$0xff] %v2614_v1 }
 0x55b PF: > { %s31_s20 = sadd.s32 1, %s2875_s20  }
 0x55c   : > { %p28_p4 = scmp.ge.s32.totalorder %s31_s20, 4  }
 0x55e   :  { %30 = sbr.rel (!%p28_p4) target bundleno = 5 (0x5), region = 147 }

</bundles_post_ra>
